<compile_context>
chip_gen: v6e
topology: v6e:2x2x1
jax: 0.10.0
libtpu: 0.0.40
codegen_flags: <defaults>
</compile_context>

<pallas_src>
import jax
import jax.numpy as jnp
import numpy as np
from jax.experimental import pallas as pl
from jax.experimental.pallas import tpu as pltpu


# ----------------------------- Pallas kernel --------------------------------

def fused_mapping_kernel(z_ref, w0_ref, wr_ref, bsh_ref, uw_ref, ub_ref, out_ref):
    """One grid step == one domain branch (shared MLP + that domain's head).

    z:   (N, latent)        f32   (constant index_map -> resident)
    w0:  (latent, H)        bf16  (resident)
    wr:  (3, H, H)          bf16  (resident)
    bsh: (4, 1, H)          f32   row 0 = first-layer bias, rows 1..3 hidden biases
    uw:  (4, H, H)          bf16  rows 0..2 hidden weights, row 3 = 512->style weight
                                  zero-padded to H columns (one slab per domain)
    ub:  (4, 1, H)          f32   matching biases (last row zero-padded)
    out: (N, style)         f32
    """
    bf16 = jnp.bfloat16

    # ---- shared MLP: latent -> 512, then 3 x (512 -> 512), ReLU after each ----
    h = jnp.dot(z_ref[...].astype(bf16), w0_ref[...],
                preferred_element_type=jnp.float32)
    h = jnp.maximum(h + bsh_ref[0], 0.0)
    for i in range(3):  # static unroll
        h = jnp.dot(h.astype(bf16), wr_ref[i],
                    preferred_element_type=jnp.float32)
        h = jnp.maximum(h + bsh_ref[i + 1], 0.0)

    # ---- this domain's unshared branch: 3 x (512 -> 512 + ReLU), 512 -> style ----
    for i in range(3):
        h = jnp.dot(h.astype(bf16), uw_ref[i],
                    preferred_element_type=jnp.float32)
        h = jnp.maximum(h + ub_ref[i], 0.0)
    o = jnp.dot(h.astype(bf16), uw_ref[3],
                preferred_element_type=jnp.float32) + ub_ref[3]

    style = out_ref.shape[-1]
    out_ref[...] = o[:, :style].astype(out_ref.dtype)


# ------------------------------ wrapper --------------------------------------

def mapping_network_forward(params, z, y, style_dim):
    """z: (N, latent) f32, y: (N,) int32 domain labels -> (N, style_dim) f32."""
    w0, wr, bsh = params["w0"], params["wr"], params["bsh"]
    uw, ub = params["uw"], params["ub"]
    num_domains = uw.shape[0]
    n = z.shape[0]

    out = pl.pallas_call(
        fused_mapping_kernel,
        out_shape=jax.ShapeDtypeStruct((num_domains, n, style_dim), jnp.float32),
        grid=(num_domains,),
        in_specs=[
            pl.BlockSpec(z.shape, lambda d: (0, 0)),            # resident
            pl.BlockSpec(w0.shape, lambda d: (0, 0)),            # resident
            pl.BlockSpec(wr.shape, lambda d: (0, 0, 0)),         # resident
            pl.BlockSpec(bsh.shape, lambda d: (0, 0, 0)),        # resident
            pl.BlockSpec((None,) + uw.shape[1:], lambda d: (d, 0, 0, 0)),
            pl.BlockSpec((None,) + ub.shape[1:], lambda d: (d, 0, 0, 0)),
        ],
        out_specs=pl.BlockSpec((None, n, style_dim), lambda d: (d, 0, 0)),
        compiler_params=pltpu.CompilerParams(
            dimension_semantics=("parallel",)),   # v7x: one domain per TensorCore
    )(z, w0, wr, bsh, uw, ub)

    # Per-sample domain selection (glue gather in plain JAX).
    # TODO(synk): for large N, scalar-prefetch y and compute only the selected
    # branch per row inside the kernel instead of computing all domains.
    return out[y, jnp.arange(n)]


# --------------------------- parameter construction --------------------------

def make_params(key, latent_dim=16, style_dim=256, num_domains=2, hidden=512):
    ks = jax.random.split(key, 5)
    scale = 0.05

    def lin(k, fan_in, fan_out):
        kw, kb = jax.random.split(k)
        w = scale * jax.random.normal(kw, (fan_in, fan_out), jnp.float32)
        b = scale * jax.random.normal(kb, (fan_out,), jnp.float32)
        return w, b

    # shared: latent_dim -> 512, then 3 x (512 -> 512)
    w0, b0 = lin(ks[0], latent_dim, hidden)
    wr, brs = [], []
    for i in range(3):
        w, b = lin(ks[1 + i], hidden, hidden)
        wr.append(w)
        brs.append(b)
    wr = jnp.stack(wr)                                   # (3, H, H)
    bsh = jnp.stack([b0] + brs)[:, None, :]              # (4, 1, H) f32

    # unshared: per domain, one packed slab of 4 weight matrices + 4 biases
    dom_keys = jax.random.split(ks[4], num_domains)
    uw, ub = [], []
    for d in range(num_domains):
        dks = jax.random.split(dom_keys[d], 4)
        ws, bs = [], []
        for i in range(3):
            w, b = lin(dks[i], hidden, hidden)
            ws.append(w)
            bs.append(b)
        wl, bl = lin(dks[3], hidden, style_dim)
        wl_pad = jnp.zeros((hidden, hidden), jnp.float32).at[:, :style_dim].set(wl)
        bl_pad = jnp.zeros((hidden,), jnp.float32).at[:style_dim].set(bl)
        uw.append(jnp.stack(ws + [wl_pad]))              # (4, H, H)
        ub.append(jnp.stack(bs + [bl_pad])[:, None, :])  # (4, 1, H)

    return dict(
        w0=w0.astype(jnp.bfloat16),                      # (latent, H)   bf16
        wr=wr.astype(jnp.bfloat16),                      # (3, H, H)     bf16
        bsh=bsh,                                         # (4, 1, H)     f32
        uw=jnp.stack(uw).astype(jnp.bfloat16),           # (D, 4, H, H)  bf16
        ub=jnp.stack(ub),                                # (D, 4, 1, H)  f32
    )


# ------------------------------ JAX reference --------------------------------

def reference_forward(params, z, y, style_dim):
    """Pure-JAX reference mirroring the kernel's bf16-weight / f32-accum numerics."""
    bf16 = jnp.bfloat16
    h = jnp.dot(z.astype(bf16), params["w0"], preferred_element_type=jnp.float32)
    h = jnp.maximum(h + params["bsh"][0], 0.0)
    for i in range(3):
        h = jnp.dot(h.astype(bf16), params["wr"][i],
                    preferred_element_type=jnp.float32)
        h = jnp.maximum(h + params["bsh"][i + 1], 0.0)

    outs = []
    num_domains = params["uw"].shape[0]
    for d in range(num_domains):
        t = h
        for i in range(3):
            t = jnp.dot(t.astype(bf16), params["uw"][d, i],
                        preferred_element_type=jnp.float32)
            t = jnp.maximum(t + params["ub"][d, i], 0.0)
        t = jnp.dot(t.astype(bf16), params["uw"][d, 3],
                    preferred_element_type=jnp.float32) + params["ub"][d, 3]
        outs.append(t[:, :style_dim])
    out = jnp.stack(outs, axis=0)                        # (D, N, style)
    return out[y, jnp.arange(z.shape[0])]


# ----------------------------------- main ------------------------------------

if __name__ == "__main__":
    latent_dim, style_dim, num_domains = 16, 256, 2
    n = 8

    key = jax.random.PRNGKey(0)
    kp, kz, ky = jax.random.split(key, 3)

    params = make_params(kp, latent_dim=latent_dim, style_dim=style_dim,
                         num_domains=num_domains)
    z = jax.random.normal(kz, (n, latent_dim), jnp.float32)
    y = jax.random.randint(ky, (n,), 0, num_domains, jnp.int32)

    s = jax.block_until_ready(mapping_network_forward(params, z, y, style_dim))
    s_ref = jax.block_until_ready(reference_forward(params, z, y, style_dim))

    assert s.shape == (n, style_dim)
    np.testing.assert_allclose(np.asarray(s), np.asarray(s_ref),
                               rtol=1e-2, atol=1e-3)

    print("KERNEL_OK")
</pallas_src>

<mosaic_0001>
module attributes {stable_mosaic.version = 11 : i64} {
  func.func @fused_mapping_kernel(%arg0: i32, %arg1: memref<8x16xf32, #tpu.memory_space<vmem>>, %arg2: memref<16x512xbf16, #tpu.memory_space<vmem>>, %arg3: memref<3x512x512xbf16, #tpu.memory_space<vmem>>, %arg4: memref<4x1x512xf32, #tpu.memory_space<vmem>>, %arg5: memref<1x4x512x512xbf16, #tpu.memory_space<vmem>>, %arg6: memref<1x4x1x512xf32, #tpu.memory_space<vmem>>, %arg7: memref<1x8x256xf32, #tpu.memory_space<vmem>>) attributes {dimension_semantics = [#tpu.dimension_semantics<parallel>], iteration_bounds = array<i64: 2>, scalar_prefetch = 0 : i64, scratch_operands = 0 : i64, tpu.core_type = #tpu.core_type<tc>, window_params = [{pipeline_mode = #tpu.pipeline_mode<synchronous>, transform_indices = @transform_0, window_bounds = array<i64: 8, 16>}, {pipeline_mode = #tpu.pipeline_mode<synchronous>, transform_indices = @transform_1, window_bounds = array<i64: 16, 512>}, {pipeline_mode = #tpu.pipeline_mode<synchronous>, transform_indices = @transform_2, window_bounds = array<i64: 3, 512, 512>}, {pipeline_mode = #tpu.pipeline_mode<synchronous>, transform_indices = @transform_3, window_bounds = array<i64: 4, 1, 512>}, {transform_indices = @transform_4, window_bounds = array<i64: 1, 4, 512, 512>}, {transform_indices = @transform_5, window_bounds = array<i64: 1, 4, 1, 512>}, {transform_indices = @transform_6, window_bounds = array<i64: 1, 8, 256>}]} {
    %c0 = arith.constant 0 : index
    %c0_0 = arith.constant 0 : index
    %0 = vector.load %arg1[%c0, %c0_0] : memref<8x16xf32, #tpu.memory_space<vmem>>, vector<8x16xf32>
    %1 = arith.truncf %0 : vector<8x16xf32> to vector<8x16xbf16>
    %c0_1 = arith.constant 0 : index
    %c0_2 = arith.constant 0 : index
    %2 = vector.load %arg2[%c0_1, %c0_2] : memref<16x512xbf16, #tpu.memory_space<vmem>>, vector<16x512xbf16>
    %cst = arith.constant dense<0.000000e+00> : vector<8x512xf32>
    %3 = tpu.matmul %1, %2, %cst {dimension_numbers = #tpu.dot_dimension_numbers<[1], [0], [0], [1], [0, 0, 1, 1], [], []>} : vector<8x16xbf16>, vector<16x512xbf16>, vector<8x512xf32> -> vector<8x512xf32>
    %c0_3 = arith.constant 0 : index
    %c0_4 = arith.constant 0 : index
    %c0_5 = arith.constant 0 : index
    %4 = vector.load %arg4[%c0_3, %c0_4, %c0_5] : memref<4x1x512xf32, #tpu.memory_space<vmem>>, vector<1x1x512xf32>
    %5 = vector.shape_cast %4 : vector<1x1x512xf32> to vector<1x512xf32>
    %6 = vector.broadcast %5 : vector<1x512xf32> to vector<8x512xf32>
    %7 = arith.addf %3, %6 : vector<8x512xf32>
    %cst_6 = arith.constant 0.000000e+00 : f32
    %8 = vector.broadcast %cst_6 : f32 to vector<8x512xf32>
    %9 = arith.maximumf %7, %8 : vector<8x512xf32>
    %10 = arith.truncf %9 : vector<8x512xf32> to vector<8x512xbf16>
    %c0_7 = arith.constant 0 : index
    %c0_8 = arith.constant 0 : index
    %c0_9 = arith.constant 0 : index
    %11 = vector.load %arg3[%c0_7, %c0_8, %c0_9] : memref<3x512x512xbf16, #tpu.memory_space<vmem>>, vector<1x512x512xbf16>
    %12 = vector.shape_cast %11 : vector<1x512x512xbf16> to vector<512x512xbf16>
    %cst_10 = arith.constant dense<0.000000e+00> : vector<8x512xf32>
    %13 = tpu.matmul %10, %12, %cst_10 {dimension_numbers = #tpu.dot_dimension_numbers<[1], [0], [0], [1], [0, 0, 1, 1], [], []>} : vector<8x512xbf16>, vector<512x512xbf16>, vector<8x512xf32> -> vector<8x512xf32>
    %c1 = arith.constant 1 : index
    %c0_11 = arith.constant 0 : index
    %c0_12 = arith.constant 0 : index
    %14 = vector.load %arg4[%c1, %c0_11, %c0_12] : memref<4x1x512xf32, #tpu.memory_space<vmem>>, vector<1x1x512xf32>
    %15 = vector.shape_cast %14 : vector<1x1x512xf32> to vector<1x512xf32>
    %16 = vector.broadcast %15 : vector<1x512xf32> to vector<8x512xf32>
    %17 = arith.addf %13, %16 : vector<8x512xf32>
    %cst_13 = arith.constant 0.000000e+00 : f32
    %18 = vector.broadcast %cst_13 : f32 to vector<8x512xf32>
    %19 = arith.maximumf %17, %18 : vector<8x512xf32>
    %20 = arith.truncf %19 : vector<8x512xf32> to vector<8x512xbf16>
    %c1_14 = arith.constant 1 : index
    %c0_15 = arith.constant 0 : index
    %c0_16 = arith.constant 0 : index
    %21 = vector.load %arg3[%c1_14, %c0_15, %c0_16] : memref<3x512x512xbf16, #tpu.memory_space<vmem>>, vector<1x512x512xbf16>
    %22 = vector.shape_cast %21 : vector<1x512x512xbf16> to vector<512x512xbf16>
    %cst_17 = arith.constant dense<0.000000e+00> : vector<8x512xf32>
    %23 = tpu.matmul %20, %22, %cst_17 {dimension_numbers = #tpu.dot_dimension_numbers<[1], [0], [0], [1], [0, 0, 1, 1], [], []>} : vector<8x512xbf16>, vector<512x512xbf16>, vector<8x512xf32> -> vector<8x512xf32>
    %c2 = arith.constant 2 : index
    %c0_18 = arith.constant 0 : index
    %c0_19 = arith.constant 0 : index
    %24 = vector.load %arg4[%c2, %c0_18, %c0_19] : memref<4x1x512xf32, #tpu.memory_space<vmem>>, vector<1x1x512xf32>
    %25 = vector.shape_cast %24 : vector<1x1x512xf32> to vector<1x512xf32>
    %26 = vector.broadcast %25 : vector<1x512xf32> to vector<8x512xf32>
    %27 = arith.addf %23, %26 : vector<8x512xf32>
    %cst_20 = arith.constant 0.000000e+00 : f32
    %28 = vector.broadcast %cst_20 : f32 to vector<8x512xf32>
    %29 = arith.maximumf %27, %28 : vector<8x512xf32>
    %30 = arith.truncf %29 : vector<8x512xf32> to vector<8x512xbf16>
    %c2_21 = arith.constant 2 : index
    %c0_22 = arith.constant 0 : index
    %c0_23 = arith.constant 0 : index
    %31 = vector.load %arg3[%c2_21, %c0_22, %c0_23] : memref<3x512x512xbf16, #tpu.memory_space<vmem>>, vector<1x512x512xbf16>
    %32 = vector.shape_cast %31 : vector<1x512x512xbf16> to vector<512x512xbf16>
    %cst_24 = arith.constant dense<0.000000e+00> : vector<8x512xf32>
    %33 = tpu.matmul %30, %32, %cst_24 {dimension_numbers = #tpu.dot_dimension_numbers<[1], [0], [0], [1], [0, 0, 1, 1], [], []>} : vector<8x512xbf16>, vector<512x512xbf16>, vector<8x512xf32> -> vector<8x512xf32>
    %c3 = arith.constant 3 : index
    %c0_25 = arith.constant 0 : index
    %c0_26 = arith.constant 0 : index
    %34 = vector.load %arg4[%c3, %c0_25, %c0_26] : memref<4x1x512xf32, #tpu.memory_space<vmem>>, vector<1x1x512xf32>
    %35 = vector.shape_cast %34 : vector<1x1x512xf32> to vector<1x512xf32>
    %36 = vector.broadcast %35 : vector<1x512xf32> to vector<8x512xf32>
    %37 = arith.addf %33, %36 : vector<8x512xf32>
    %cst_27 = arith.constant 0.000000e+00 : f32
    %38 = vector.broadcast %cst_27 : f32 to vector<8x512xf32>
    %39 = arith.maximumf %37, %38 : vector<8x512xf32>
    %40 = arith.truncf %39 : vector<8x512xf32> to vector<8x512xbf16>
    %c0_28 = arith.constant 0 : index
    %c0_29 = arith.constant 0 : index
    %c0_30 = arith.constant 0 : index
    %c0_31 = arith.constant 0 : index
    %41 = vector.load %arg5[%c0_28, %c0_29, %c0_30, %c0_31] : memref<1x4x512x512xbf16, #tpu.memory_space<vmem>>, vector<1x1x512x512xbf16>
    %42 = vector.shape_cast %41 : vector<1x1x512x512xbf16> to vector<512x512xbf16>
    %cst_32 = arith.constant dense<0.000000e+00> : vector<8x512xf32>
    %43 = tpu.matmul %40, %42, %cst_32 {dimension_numbers = #tpu.dot_dimension_numbers<[1], [0], [0], [1], [0, 0, 1, 1], [], []>} : vector<8x512xbf16>, vector<512x512xbf16>, vector<8x512xf32> -> vector<8x512xf32>
    %c0_33 = arith.constant 0 : index
    %c0_34 = arith.constant 0 : index
    %c0_35 = arith.constant 0 : index
    %c0_36 = arith.constant 0 : index
    %44 = vector.load %arg6[%c0_33, %c0_34, %c0_35, %c0_36] : memref<1x4x1x512xf32, #tpu.memory_space<vmem>>, vector<1x1x1x512xf32>
    %45 = vector.shape_cast %44 : vector<1x1x1x512xf32> to vector<1x512xf32>
    %46 = vector.broadcast %45 : vector<1x512xf32> to vector<8x512xf32>
    %47 = arith.addf %43, %46 : vector<8x512xf32>
    %cst_37 = arith.constant 0.000000e+00 : f32
    %48 = vector.broadcast %cst_37 : f32 to vector<8x512xf32>
    %49 = arith.maximumf %47, %48 : vector<8x512xf32>
    %50 = arith.truncf %49 : vector<8x512xf32> to vector<8x512xbf16>
    %c0_38 = arith.constant 0 : index
    %c1_39 = arith.constant 1 : index
    %c0_40 = arith.constant 0 : index
    %c0_41 = arith.constant 0 : index
    %51 = vector.load %arg5[%c0_38, %c1_39, %c0_40, %c0_41] : memref<1x4x512x512xbf16, #tpu.memory_space<vmem>>, vector<1x1x512x512xbf16>
    %52 = vector.shape_cast %51 : vector<1x1x512x512xbf16> to vector<512x512xbf16>
    %cst_42 = arith.constant dense<0.000000e+00> : vector<8x512xf32>
    %53 = tpu.matmul %50, %52, %cst_42 {dimension_numbers = #tpu.dot_dimension_numbers<[1], [0], [0], [1], [0, 0, 1, 1], [], []>} : vector<8x512xbf16>, vector<512x512xbf16>, vector<8x512xf32> -> vector<8x512xf32>
    %c0_43 = arith.constant 0 : index
    %c1_44 = arith.constant 1 : index
    %c0_45 = arith.constant 0 : index
    %c0_46 = arith.constant 0 : index
    %54 = vector.load %arg6[%c0_43, %c1_44, %c0_45, %c0_46] : memref<1x4x1x512xf32, #tpu.memory_space<vmem>>, vector<1x1x1x512xf32>
    %55 = vector.shape_cast %54 : vector<1x1x1x512xf32> to vector<1x512xf32>
    %56 = vector.broadcast %55 : vector<1x512xf32> to vector<8x512xf32>
    %57 = arith.addf %53, %56 : vector<8x512xf32>
    %cst_47 = arith.constant 0.000000e+00 : f32
    %58 = vector.broadcast %cst_47 : f32 to vector<8x512xf32>
    %59 = arith.maximumf %57, %58 : vector<8x512xf32>
    %60 = arith.truncf %59 : vector<8x512xf32> to vector<8x512xbf16>
    %c0_48 = arith.constant 0 : index
    %c2_49 = arith.constant 2 : index
    %c0_50 = arith.constant 0 : index
    %c0_51 = arith.constant 0 : index
    %61 = vector.load %arg5[%c0_48, %c2_49, %c0_50, %c0_51] : memref<1x4x512x512xbf16, #tpu.memory_space<vmem>>, vector<1x1x512x512xbf16>
    %62 = vector.shape_cast %61 : vector<1x1x512x512xbf16> to vector<512x512xbf16>
    %cst_52 = arith.constant dense<0.000000e+00> : vector<8x512xf32>
    %63 = tpu.matmul %60, %62, %cst_52 {dimension_numbers = #tpu.dot_dimension_numbers<[1], [0], [0], [1], [0, 0, 1, 1], [], []>} : vector<8x512xbf16>, vector<512x512xbf16>, vector<8x512xf32> -> vector<8x512xf32>
    %c0_53 = arith.constant 0 : index
    %c2_54 = arith.constant 2 : index
    %c0_55 = arith.constant 0 : index
    %c0_56 = arith.constant 0 : index
    %64 = vector.load %arg6[%c0_53, %c2_54, %c0_55, %c0_56] : memref<1x4x1x512xf32, #tpu.memory_space<vmem>>, vector<1x1x1x512xf32>
    %65 = vector.shape_cast %64 : vector<1x1x1x512xf32> to vector<1x512xf32>
    %66 = vector.broadcast %65 : vector<1x512xf32> to vector<8x512xf32>
    %67 = arith.addf %63, %66 : vector<8x512xf32>
    %cst_57 = arith.constant 0.000000e+00 : f32
    %68 = vector.broadcast %cst_57 : f32 to vector<8x512xf32>
    %69 = arith.maximumf %67, %68 : vector<8x512xf32>
    %70 = arith.truncf %69 : vector<8x512xf32> to vector<8x512xbf16>
    %c0_58 = arith.constant 0 : index
    %c3_59 = arith.constant 3 : index
    %c0_60 = arith.constant 0 : index
    %c0_61 = arith.constant 0 : index
    %71 = vector.load %arg5[%c0_58, %c3_59, %c0_60, %c0_61] : memref<1x4x512x512xbf16, #tpu.memory_space<vmem>>, vector<1x1x512x512xbf16>
    %72 = vector.shape_cast %71 : vector<1x1x512x512xbf16> to vector<512x512xbf16>
    %cst_62 = arith.constant dense<0.000000e+00> : vector<8x512xf32>
    %73 = tpu.matmul %70, %72, %cst_62 {dimension_numbers = #tpu.dot_dimension_numbers<[1], [0], [0], [1], [0, 0, 1, 1], [], []>} : vector<8x512xbf16>, vector<512x512xbf16>, vector<8x512xf32> -> vector<8x512xf32>
    %c0_63 = arith.constant 0 : index
    %c3_64 = arith.constant 3 : index
    %c0_65 = arith.constant 0 : index
    %c0_66 = arith.constant 0 : index
    %74 = vector.load %arg6[%c0_63, %c3_64, %c0_65, %c0_66] : memref<1x4x1x512xf32, #tpu.memory_space<vmem>>, vector<1x1x1x512xf32>
    %75 = vector.shape_cast %74 : vector<1x1x1x512xf32> to vector<1x512xf32>
    %76 = vector.broadcast %75 : vector<1x512xf32> to vector<8x512xf32>
    %77 = arith.addf %73, %76 : vector<8x512xf32>
    %78 = vector.extract_strided_slice %77 {offsets = [0, 0], sizes = [8, 256], strides = [1, 1]} : vector<8x512xf32> to vector<8x256xf32>
    %c0_67 = arith.constant 0 : index
    %c0_68 = arith.constant 0 : index
    %c0_69 = arith.constant 0 : index
    %79 = vector.load %arg7[%c0_67, %c0_68, %c0_69] : memref<1x8x256xf32, #tpu.memory_space<vmem>>, vector<1x8x256xf32>
    %80 = vector.shape_cast %79 : vector<1x8x256xf32> to vector<8x256xf32>
    %81 = vector.shape_cast %78 : vector<8x256xf32> to vector<1x8x256xf32>
    tpu.vector_store %arg7[%c0_67, %c0_68, %c0_69], %81 {strides = array<i32>} : memref<1x8x256xf32, #tpu.memory_space<vmem>>, vector<1x8x256xf32>,
    return
  }
  func.func @transform_0(%arg0: i32) -> (i32, i32) {
    %c0_i32 = arith.constant 0 : i32
    %c0_i32_0 = arith.constant 0 : i32
    %c0_i32_1 = arith.constant 0 : i32
    return %c0_i32, %c0_i32_0 : i32, i32
  }
  func.func @transform_1(%arg0: i32) -> (i32, i32) {
    %c0_i32 = arith.constant 0 : i32
    %c0_i32_0 = arith.constant 0 : i32
    %c0_i32_1 = arith.constant 0 : i32
    return %c0_i32, %c0_i32_0 : i32, i32
  }
  func.func @transform_2(%arg0: i32) -> (i32, i32, i32) {
    %c0_i32 = arith.constant 0 : i32
    %c0_i32_0 = arith.constant 0 : i32
    %c0_i32_1 = arith.constant 0 : i32
    %c0_i32_2 = arith.constant 0 : i32
    return %c0_i32, %c0_i32_0, %c0_i32_1 : i32, i32, i32
  }
  func.func @transform_3(%arg0: i32) -> (i32, i32, i32) {
    %c0_i32 = arith.constant 0 : i32
    %c0_i32_0 = arith.constant 0 : i32
    %c0_i32_1 = arith.constant 0 : i32
    %c0_i32_2 = arith.constant 0 : i32
    return %c0_i32, %c0_i32_0, %c0_i32_1 : i32, i32, i32
  }
  func.func @transform_4(%arg0: i32) -> (i32, i32, i32, i32) {
    %c0_i32 = arith.constant 0 : i32
    %c0_i32_0 = arith.constant 0 : i32
    %c0_i32_1 = arith.constant 0 : i32
    %c0_i32_2 = arith.constant 0 : i32
    return %arg0, %c0_i32, %c0_i32_0, %c0_i32_1 : i32, i32, i32, i32
  }
  func.func @transform_5(%arg0: i32) -> (i32, i32, i32, i32) {
    %c0_i32 = arith.constant 0 : i32
    %c0_i32_0 = arith.constant 0 : i32
    %c0_i32_1 = arith.constant 0 : i32
    %c0_i32_2 = arith.constant 0 : i32
    return %arg0, %c0_i32, %c0_i32_0, %c0_i32_1 : i32, i32, i32, i32
  }
  func.func @transform_6(%arg0: i32) -> (i32, i32, i32) {
    %c0_i32 = arith.constant 0 : i32
    %c0_i32_0 = arith.constant 0 : i32
    %c0_i32_1 = arith.constant 0 : i32
    return %arg0, %c0_i32, %c0_i32_0 : i32, i32, i32
  }
}

</mosaic_0001>

<bundles_post_ra>
// kernel: tpu_custom_call.1
= control target key start
LH: loop header
LB: loop body
LE: loop exit
PB: predicated region body
PF: predicated region fallthrough
CT: control target
= control target key end

     0   :  { %s10601_s0 = inlined_call_operand.hbm [shape: f32[8,16], index: 0, kind: input, shape index: {}]   ;;  %s10602_s1 = inlined_call_operand.hbm [shape: bf16[16,512], index: 1, kind: input, shape index: {}]   ;;  %s10603_s2 = inlined_call_operand.hbm [shape: bf16[3,512,512], index: 2, kind: input, shape index: {}]   ;;  %s10604_s3 = inlined_call_operand.hbm [shape: f32[4,1,512], index: 3, kind: input, shape index: {}]   ;;  %s10605_s4 = inlined_call_operand.hbm [shape: bf16[2,4,512,512], index: 4, kind: input, shape index: {}]   ;;  %s10606_s5 = inlined_call_operand.hbm [shape: f32[2,4,1,512], index: 5, kind: input, shape index: {}]   ;;  %s10607_s6 = inlined_call_operand.hbm [shape: f32[2,8,256], index: 6, kind: output, shape index: {}]  }
   0x1   :  { %10618 = sst [smem:[#allocation18_spill]] %s10601_s0 }
   0x2   :  { %10619 = sst [smem:[#allocation19_spill]] %s10602_s1 }
   0x3   :  { %10620 = sst [smem:[#allocation20_spill]] %s10603_s2 }
   0x4   :  { %11 = vsyncpa [#allocation3], 0 }
   0x5   :  { %12 = vsyncpa [#allocation6], 0 }
   0x6   :  { %13 = vsyncpa [#allocation9], 0 }
   0x7   :  { %14 = vsyncpa [#allocation4], 0 }
   0x8   :  { %16 = vsyncpa [#allocation4 + $0x1], 0  ;;  %s9736_s21 = smov 0   ;;  %s9738_s22 = smov 0  }
   0x9   :  { %s9740_s23 = smov 0   ;;  %s9742_s24 = smov 0  }
   0xa LB: > { %s9757_s25 = sadd.s32 4294967295, %s9687_s24   ;;  %s6910_s26 = sadd.s32 4294967294, %s9687_s24   ;;  %s9687_s24 = sphi %s9742_s24, %s10650_s24   ;;  %s9683_s23 = sphi %s9740_s23, %s10649_s23   ;;  %s9679_s22 = sphi %s9738_s22, %s10648_s22   ;;  %s9675_s21 = sphi %s9736_s21, %s10647_s21  }
   0xb   : > { %p126_p0 = scmp.ne.s32.totalorder %s9679_s22, %s9675_s21  ;;  %p10608_p1 = scmp.eq.s32.totalorder %s9757_s25, 0 }
   0xc   : > { %p182_p3 = scmp.eq.s32.totalorder %s6910_s26, 1  ;;  %p6911_p5 = scmp.ge.s32.totalorder %s9687_s24, 1 }
   0xd   : > { %p9766_p4 = por %p10608_p1, %p126_p0  ;;  %p189_p7 = scmp.lt.s32.totalorder %s9687_s24, 3 }
   0xe   : > { %p9771_p6 = por %p182_p3, %p126_p0  ;;  %s9689_s30 = smov [#allocation2]  }
   0xf   : > { %s10621_s27 = scalar_select %p9766_p4, 1, 0 }
  0x10   : > { %s10622_s28 = scalar_select %p9771_p6, 1, 0 }
  0x11   : > { %p9776_p8 = pnand %p6911_p5, %p189_p7  ;;  %s202_s7 = sshll.u32 %s9689_s30, 4  ;;  %s203_s7 = int_to_ptr.vmem [resolvable:$true] %s202_s7 }
  0x12   : > { %s9690_s8 = smov [#allocation5]   ;;  %s9462_s11 = scalar_lea.vmem %s203_s7, 128 }
  0x13   : > { %s10623_s29 = scalar_select %p9776_p8, 1, 0 }
  0x14   : > { %p8122_p10 = pneg %p9776_p8  ;;  %s212_s9 = sshll.u32 %s9690_s8, 4  ;;  %s213_s9 = int_to_ptr.vmem [resolvable:$true] %s212_s9 }
  0x15   : > { %p9463_p13 = scmp.ne.s32.totalorder %s203_s7, %s9462_s11  ;;  %p9470_p5 = scmp.lt.s32.totalorder %s203_s7, %s203_s7 }
  0x16   : > { %p9785_p11 = pnand %p8122_p10, %p10608_p1  ;;  %p9471_p7 = scmp.lt.s32.totalorder %s9462_s11, %s9462_s11 }
  0x18   : > { %p10616_p12 = pneg %p9785_p11  ;;  %p9472_p9 = por %p9471_p7, %p9470_p5 }
  0x1a   : > { %p9465_p0 = pnand %p9463_p13, %p10616_p12 }
  0x1c   : > { %p9466_p3 = pneg %p9465_p0 }
  0x1e   : > { %p9473_p2 = pnand %p9472_p9, %p9466_p3 }
  0x20   : > { %9476 = shalt.err (!%p9473_p2)
}
  0x21   : > { %s10625_s0 = sld [smem:[#allocation18_spill]]  ;;  %s9488_s14 = scalar_lea.vmem %s213_s9, 512 }
  0x22   : > { %p9489_p10 = scmp.ne.s32.totalorder %s213_s9, %s9488_s14  ;;  %p9496_p13 = scmp.lt.s32.totalorder %s213_s9, %s213_s9 }
  0x23   : > { %p9497_p0 = scmp.lt.s32.totalorder %s9488_s14, %s9488_s14 }
  0x24   : > { %p9491_p1 = pnand %p9489_p10, %p10616_p12 }
  0x25   : > { %p9498_p4 = por %p9497_p0, %p9496_p13 }
  0x26   : > { %p9492_p6 = pneg %p9491_p1 }
  0x27   : > { %8125 = dma.hbm_to_vmem [thread:$0]  (!%p9785_p11), %s10625_s0, 128, %s203_s7, [#allocation3]  }
  0x28   : > { %p9499_p8 = pnand %p9498_p4, %p9492_p6 }
  0x2a   : > { %9502 = shalt.err (!%p9499_p8)
}
  0x2b   : > { %s10611_s15 = smov 256   ;;  %s10614_s16 = smov 16  }
  0x2c   : > { %s10626_s1 = sld [smem:[#allocation19_spill]]  ;;  %s9811_s19 = sadd.s32 1, %s9687_s24  }
  0x2d   : > { %s113_s20 = sadd.s32 1, %s9683_s23  ;;  %s110_s26 = ssub.s32 %s9687_s24, %s9811_s19 }
  0x2e   : > { %p120_p1 = scmp.ne.s32.totalorder %s9683_s23, %s9679_s22  ;;  %p111_p2 = scmp.eq.s32.totalorder %s110_s26, 0 }
  0x2f   : > { %p121_p4 = scmp.eq.s32.totalorder %s9687_s24, 0  ;;  %p10627_p6 = scmp.eq.s32.totalorder %s9757_s25, 1 }
  0x30   : > { %p8150_p9 = scmp.lt.s32.totalorder %s9687_s24, 2  ;;  %s252_s8 = sand.u32 1, %s9687_s24  }
  0x31   : > { %p9821_p8 = por %p10627_p6, %p120_p1  ;;  %p122_p3 = por %p121_p4, %p120_p1 }
  0x32   : > { %8128 = dma.hbm_to_vmem [thread:$0]  (!%p9785_p11), %s10626_s1, 512, %s213_s9, [#allocation6], %s10611_s15, %s10611_s15, %s10614_s16  }
  0x33   : > { %s10628_s30 = scalar_select %p9821_p8, 1, 0 }
  0x34   : > { %s9827_s7 = scalar_select %p111_p2, %s9683_s23, %s113_s20  }
  0x35   : > { %s10613_s11 = sand.u32 1, %s9683_s23   ;;  %s8097_s12 = sshll.u32 %s9687_s24, 16 }
  0x36   : > { %s6917_s9 = sshll.u32 %s10613_s11, 12  ;;  %s9837_s17 = scalar_lea.hbm %s10605_s4, %s8097_s12 }
  0x37   : > { %s256_s18 = scalar_lea.vmem [#allocation10], %s6917_s9  ;;  %p9839_p5 = pnand %p8150_p9, %p122_p3 }
  0x38   : > { %s263_s26 = sshll.u32 %s256_s18, 4  ;;  %s9693_s20 = smov [#allocation7]   ;;  %s9843_s26 = int_to_ptr.vmem [resolvable:$true] %s263_s26 }
  0x39   : > { %s9845_s11 = sshll.u32 %s9693_s20, 4  ;;  %s9847_s16 = scalar_lea.sflag [#allocation3], %s252_s8  ;;  %s226_s11 = int_to_ptr.vmem [resolvable:$true] %s9845_s11 }
  0x3a   : > { %s9503_s12 = scalar_lea.hbm %s9837_s17, 65536  ;;  %p9505_p10 = pneg %p9839_p5 }
  0x3b   : > { %p9504_p7 = scmp.ne.s32.totalorder %s9837_s17, %s9503_s12  ;;  %s9508_s14 = scalar_lea.hbm %s10605_s4, 131072 }
  0x3c   : > { %p9509_p1 = scmp.lt.s32.totalorder %s9837_s17, %s10605_s4  ;;  %p9510_p2 = scmp.lt.s32.totalorder %s9508_s14, %s9503_s12 }
  0x3d   : > { %p9506_p13 = pnand %p9505_p10, %p9504_p7 }
  0x3e   : > { %p9511_p4 = por %p9510_p2, %p9509_p1 }
  0x3f   : > { %p9507_p0 = pneg %p9506_p13 }
  0x41   : > { %p9512_p6 = pnand %p9511_p4, %p9507_p0 }
  0x43   : > { %9515 = shalt.err (!%p9512_p6)
}
  0x44   : > { %s9516_s8 = scalar_lea.vmem %s9843_s26, 65536  ;;  %s9694_s20 = smov [#allocation10]  }
  0x45   : > { %p9517_p9 = scmp.ne.s32.totalorder %s9843_s26, %s9516_s8  ;;  %s9521_s9 = sshll.u32 %s9694_s20, 4  ;;  %s9522_s9 = int_to_ptr.vmem [resolvable:$false] %s9521_s9 }
  0x46   : > { %s9523_s13 = scalar_lea.vmem %s9522_s9, 131072  ;;  %p9524_p13 = scmp.lt.s32.totalorder %s9843_s26, %s9522_s9 }
  0x47   : > { %p9519_p3 = pnand %p9517_p9, %p9505_p10  ;;  %p9525_p12 = scmp.lt.s32.totalorder %s9523_s13, %s9516_s8 }
  0x49   : > { %p9520_p7 = pneg %p9519_p3  ;;  %p9526_p8 = por %p9525_p12, %p9524_p13 }
  0x4b   : > { %p9527_p1 = pnand %p9526_p8, %p9520_p7 }
  0x4d   : > { %9530 = shalt.err (!%p9527_p1)
}
  0x4e   : > { %s10630_s0 = smov 16   ;;  %s10631_s12 = smov 256  }
  0x4f   : > { %8138 = dma.hbm_to_vmem [thread:$0]  (!%p9839_p5), %s9837_s17, 65536, %s9843_s26, %s9847_s16, %s10631_s12, %s10631_s12, %s10630_s0  }
  0x50   : > { %s9542_s14 = scalar_lea.vmem %s226_s11, 49152  ;;  %p10632_p2 = pneg %p9785_p11 }
  0x51   : > { %p9543_p0 = scmp.ne.s32.totalorder %s226_s11, %s9542_s14  ;;  %p9550_p8 = scmp.lt.s32.totalorder %s226_s11, %s226_s11 }
  0x52   : > { %p9551_p6 = scmp.lt.s32.totalorder %s9542_s14, %s9542_s14 }
  0x53   : > { %p9545_p4 = pnand %p9543_p0, %p10632_p2 }
  0x54   : > { %p9552_p9 = por %p9551_p6, %p9550_p8 }
  0x55   : > { %p9546_p12 = pneg %p9545_p4 }
  0x57   : > { %p9553_p3 = pnand %p9552_p9, %p9546_p12 }
  0x59   : > { %9556 = shalt.err (!%p9553_p3)
}
  0x5a   : > { %s10633_s2 = sld [smem:[#allocation20_spill]]  ;;  %s9695_s17 = smov [#allocation8]  }
  0x5b   : > { %s238_s26 = sshll.u32 %s9695_s17, 4  ;;  %p10634_p13 = pmov %p10632_p2  ;;  %s239_s26 = int_to_ptr.vmem [resolvable:$true] %s238_s26 }
  0x5c   : > { %s9568_s20 = scalar_lea.vmem %s239_s26, 256  ;;  %p9576_p2 = scmp.lt.s32.totalorder %s239_s26, %s239_s26 }
  0x5d   : > { %p9569_p7 = scmp.ne.s32.totalorder %s239_s26, %s9568_s20  ;;  %p9577_p4 = scmp.lt.s32.totalorder %s9568_s20, %s9568_s20 }
  0x5f   : > { %p9571_p1 = pnand %p9569_p7, %p10634_p13  ;;  %p9578_p12 = por %p9577_p4, %p9576_p2 }
  0x60   : > { %8131 = dma.hbm_to_vmem [thread:$0]  (!%p9785_p11), %s10633_s2, 49152, %s226_s11, [#allocation6], %s10631_s12, %s10631_s12, %s10630_s0  }
  0x61   : > { %p9572_p0 = pneg %p9571_p1 }
  0x63   : > { %p9579_p8 = pnand %p9578_p12, %p9572_p0 }
  0x65   : > { %9582 = shalt.err (!%p9579_p8)
}
  0x66   : > { %s9696_s9 = smov 64   ;;  %s9697_s11 = smov 4  }
  0x67   : > { %8134 = dma.hbm_to_vmem [thread:$0]  (!%p9785_p11), %s10604_s3, 256, %s239_s26, [#allocation9], %s9696_s9, %s9696_s9, %s9697_s11  }
  0x68   : > { %s10635_s12 = sand.u32 1, %s9683_s23   ;;  %s8098_s18 = sshll.u32 %s9687_s24, 8 }
  0x69   : > { %s6920_s14 = sshll.u32 %s10635_s12, 4  ;;  %s9906_s20 = scalar_lea.hbm %s10606_s5, %s8098_s18 }
  0x6a   : > { %s277_s1 = scalar_lea.vmem [#allocation11], %s6920_s14  ;;  %s9583_s2 = scalar_lea.hbm %s9906_s20, 256 }
  0x6b   : > { %s284_s10 = sshll.u32 %s277_s1, 4  ;;  %p9584_p6 = scmp.ne.s32.totalorder %s9906_s20, %s9583_s2  ;;  %s285_s10 = int_to_ptr.vmem [resolvable:$true] %s284_s10 }
  0x6c   : > { %s9588_s0 = scalar_lea.hbm %s10606_s5, 512  ;;  %p9589_p3 = scmp.lt.s32.totalorder %s9906_s20, %s10606_s5 }
  0x6d   : > { %p9586_p9 = pnand %p9584_p6, %p9505_p10  ;;  %p9590_p7 = scmp.lt.s32.totalorder %s9588_s0, %s9583_s2 }
  0x6f   : > { %p9587_p11 = pneg %p9586_p9  ;;  %p9591_p13 = por %p9590_p7, %p9589_p3 }
  0x71   : > { %p9592_p1 = pnand %p9591_p13, %p9587_p11 }
  0x73   : > { %9595 = shalt.err (!%p9592_p1)
}
  0x74   : > { %s9596_s1 = scalar_lea.vmem %s285_s10, 256  ;;  %s9698_s14 = smov [#allocation11]  }
  0x75   : > { %p9597_p0 = scmp.ne.s32.totalorder %s285_s10, %s9596_s1  ;;  %s9601_s18 = sshll.u32 %s9698_s14, 4  ;;  %s9602_s18 = int_to_ptr.vmem [resolvable:$false] %s9601_s18 }
  0x76   : > { %s9603_s17 = scalar_lea.vmem %s9602_s18, 512  ;;  %p9604_p12 = scmp.lt.s32.totalorder %s285_s10, %s9602_s18 }
  0x77   : > { %p9599_p2 = pnand %p9597_p0, %p9505_p10  ;;  %p9605_p8 = scmp.lt.s32.totalorder %s9603_s17, %s9596_s1 }
  0x79   : > { %p9600_p4 = pneg %p9599_p2  ;;  %p9606_p6 = por %p9605_p8, %p9604_p12 }
  0x7b   : > { %p9607_p9 = pnand %p9606_p6, %p9600_p4 }
  0x7d   : > { %9610 = shalt.err (!%p9607_p9)
}
  0x7e   : > { %8141 = dma.hbm_to_vmem [thread:$0]  (!%p9839_p5), %s9906_s20, 256, %s285_s10, %s9847_s16, %s9696_s9, %s9696_s9, %s9697_s11  }
  0x7f   : > { %p10636_p10 = scmp.ne.s32.totalorder %s10623_s29, 0 }
  0x80   : > { %p10637_p11 = scmp.eq.s32.totalorder (!%p10636_p10), %s9757_s25, 0 }
  0x81   : > { %296 = sbr.rel (%p10636_p10) target bundleno = 2164 (0x874), region = 44 }
  0x86   : > { %9654 = dma.done.wait (%p10637_p11), [#allocation3], 128   ;;  %p10638_p3 = pmov %p10637_p11 }
  0x88   : > { %9656 = vsyncadd (%p10638_p3), [#allocation3], 4294967168  ;;  %p10639_p7 = pmov %p10638_p3 }
  0x89   : > { %p10640_p13 = pmov %p10638_p3 }
  0x8a   : > { %9658 = dma.done.wait (%p10639_p7), [#allocation6], 49664  }
  0x8b   : > { %9660 = vsyncadd (%p10640_p13), [#allocation6], 4294917632  ;;  %p10641_p1 = pmov %p10638_p3 }
  0x8d   : > { %9662 = dma.done.wait (%p10641_p1), [#allocation9], 256   ;;  %p10642_p5 = pmov %p10641_p1 }
  0x8e   : > { %s314_s2 = sand.u32 1, %s9757_s25   ;;  %s9946_s29 = sand.u32 1, %s9679_s22  }
  0x8f   : > { %9664 = vsyncadd (%p10642_p5), [#allocation9], 4294967040  ;;  %s6928_s15 = sshll.u32 %s9946_s29, 12  ;;  %s315_s16 = scalar_lea.sflag [#allocation3], %s314_s2 }
  0x90   : > { %s9949_s9 = scalar_lea.vmem [#allocation10], %s6928_s15  ;;  %p10643_p0 = scmp.ne.s32.totalorder %s10621_s27, 0 }
  0x92   : > { %9666 = dma.done.wait (%p10643_p0), %s315_s16, 65792  }
  0x93   : > { %9668 = vsyncadd (%p10643_p0), %s315_s16, 4294901504  ;;  %v9699_v0 = vmov 0   ;;  %v8197_v1 = vld [vmem:[#allocation5 + $0x4] ss:$16 sps:$4 sm:$0xff]   ;;  %v8199_v2 = vld [vmem:[#allocation5 + $0xc] ss:$16 sps:$4 sm:$0xff]  }
  0x94   : > { %446 = vmatprep.mubr.bf16.mxu0 %v9699_v0  ;;  %487 = vmatprep.mubr.bf16.mxu1 %v9699_v0  ;;  %v8201_v3 = vld [vmem:[#allocation5] ss:$16 sps:$4 sm:$0xff]   ;;  %v8202_v4 = vld [vmem:[#allocation5 + $0x8] ss:$16 sps:$4 sm:$0xff]   ;;  %vm410_vm0 = vcmask 130048   ;;  %s6929_s27 = sshll.u32 %s9946_s29, 4 }
  0x95   : > { %428 = vmatprep.subr.bf16.mxu0 %v8197_v1  ;;  %v362_v5 = vld [vmem:[#allocation2] sm:$0xff]  ;;  %469 = vmatprep.subr.bf16.mxu1 %v8199_v2  ;;  %v8203_v7 = vld [vmem:[#allocation7 + $0xe0] ss:$16 sps:$4 sm:$0xff]   ;;  %v8205_v8 = vld [vmem:[#allocation7 + $0xe4] ss:$16 sps:$4 sm:$0xff]   ;;  %s10238_s11 = scalar_lea.vmem [#allocation11], %s6929_s27 }
  0x96   : > { %v363_v6 = vpack.c.bf16 %v362_v5, %v362_v5  ;;  %429 = vmatpush1.bf16.msra.mxu0 %v8201_v3  ;;  %470 = vmatpush1.bf16.msra.mxu1 %v8202_v4  ;;  %v8206_v9 = vld [vmem:[#allocation7 + $0x2e0] ss:$16 sps:$4 sm:$0xff]   ;;  %v8208_v10 = vld [vmem:[#allocation7 + $0x2e4] ss:$16 sps:$4 sm:$0xff]   ;;  %s8099_s20 = sshll.u32 %s9757_s25, 8  ;;  %s360_s10 = scalar_lea.vmem [#allocation12], %s6929_s27 }
  0x97   : > { %1295 = vmatprep.subr.bf16.mxu0 %v8205_v8  ;;  %v8211_v11 = vld [vmem:[#allocation7 + $0xc4] ss:$16 sps:$4 sm:$0xff]   ;;  %v8209_v12 = vld [vmem:[#allocation7 + $0xc0] ss:$16 sps:$4 sm:$0xff]   ;;  %1336 = vmatprep.subr.bf16.mxu1 %v8208_v10  ;;  %v8304_v8 = vld [vmem:[#allocation7 + $0x2ec] ss:$16 sps:$4 sm:$0xff]   ;;  %s10558_s12 = scalar_lea.hbm %s10607_s6, %s8099_s20 }
  0x98   : > { %v8214_v13 = vld [vmem:[#allocation7 + $0x2c4] ss:$16 sps:$4 sm:$0xff]   ;;  %v8212_v14 = vld [vmem:[#allocation7 + $0x2c0] ss:$16 sps:$4 sm:$0xff]   ;;  %s6782_s26 = sshll.u32 %s360_s10, 4  ;;  %s6768_s25 = scalar_lea.sflag [#allocation4], %s9946_s29  ;;  %s10560_s26 = int_to_ptr.vmem [resolvable:$true] %s6782_s26 }
  0x99   : > { %6935 = vmatmul.mubr.msk.bf16.vlgmr.msra.gmra.mxu0 %vm410_vm0, %v363_v6  ;;  %6936 = vmatmul.mubr.msk.bf16.vlgmr.msra.gmra.mxu1 %vm410_vm0, %v363_v6  ;;  %v8217_v15 = vld [vmem:[#allocation7 + $0xa4] ss:$16 sps:$4 sm:$0xff]   ;;  %v8215_v17 = vld [vmem:[#allocation7 + $0xa0] ss:$16 sps:$4 sm:$0xff]   ;;  %s9611_s8 = scalar_lea.vmem %s10560_s26, 256  ;;  %p10644_p4 = scmp.ne.s32.totalorder %s10628_s30, 0 }
  0x9a   : > { %1296 = vmatpush1.bf16.msra.mxu0 %v8203_v7  ;;  %1337 = vmatpush1.bf16.msra.mxu1 %v8206_v9  ;;  %v8220_v16 = vld [vmem:[#allocation7 + $0x2a4] ss:$16 sps:$4 sm:$0xff]   ;;  %v8218_v18 = vld [vmem:[#allocation7 + $0x2a0] ss:$16 sps:$4 sm:$0xff]   ;;  %v8301_v7 = vld [vmem:[#allocation7 + $0xec] ss:$16 sps:$4 sm:$0xff]   ;;  %v370_v9 = vlaneseq  ;;  %p9612_p2 = scmp.ne.s32.totalorder %s10560_s26, %s9611_s8 }
  0x9b   : > { %1297 = vmatprep.subr.bf16.mxu0 %v8211_v11  ;;  %1338 = vmatprep.subr.bf16.mxu1 %v8214_v13  ;;  %v8223_v19 = vld [vmem:[#allocation7 + $0x84] ss:$16 sps:$4 sm:$0xff]   ;;  %v8221_v21 = vld [vmem:[#allocation7 + $0x80] ss:$16 sps:$4 sm:$0xff]   ;;  %s9700_s1 = smov [#allocation12]  }
  0x9c   : > { %v8226_v20 = vld [vmem:[#allocation7 + $0x284] ss:$16 sps:$4 sm:$0xff]   ;;  %v8224_v22 = vld [vmem:[#allocation7 + $0x280] ss:$16 sps:$4 sm:$0xff]   ;;  %v371_v10 = vshrl.u32 %v370_v9, 7  ;;  %p9613_p12 = pnand %p9612_p2, %p10644_p4  ;;  %s9615_s14 = sshll.u32 %s9700_s1, 4  ;;  %s9616_s14 = int_to_ptr.vmem [resolvable:$false] %s9615_s14 }
  0x9d   : > { %v8229_v23 = vld [vmem:[#allocation7 + $0x64] ss:$16 sps:$4 sm:$0xff]   ;;  %v8227_v25 = vld [vmem:[#allocation7 + $0x60] ss:$16 sps:$4 sm:$0xff]   ;;  %v8350_v9 = vld [vmem:[#allocation7 + $0x3e8] ss:$16 sps:$4 sm:$0xff]   ;;  %p9618_p6 = scmp.lt.s32.totalorder %s10560_s26, %s9616_s14 }
  0x9e   : > { %1298 = vmatpush1.bf16.msra.mxu0 %v8209_v12  ;;  %1339 = vmatpush1.bf16.msra.mxu1 %v8212_v14  ;;  %v8232_v24 = vld [vmem:[#allocation7 + $0x264] ss:$16 sps:$4 sm:$0xff]   ;;  %v8230_v26 = vld [vmem:[#allocation7 + $0x260] ss:$16 sps:$4 sm:$0xff]   ;;  %v9955_v12 = vsub.s32 0, %v371_v10  ;;  %v9957_v13 = vsub.s32 2, %v371_v10  ;;  %p9614_p8 = pneg %p9613_p12 }
  0x9f   : > { %1299 = vmatprep.subr.bf16.mxu0 %v8217_v15  ;;  %1340 = vmatprep.subr.bf16.mxu1 %v8220_v16  ;;  %v8235_v27 = vld [vmem:[#allocation7 + $0x44] ss:$16 sps:$4 sm:$0xff]   ;;  %v8233_v29 = vld [vmem:[#allocation7 + $0x40] ss:$16 sps:$4 sm:$0xff]   ;;  %v9959_v14 = vsub.s32 1, %v371_v10  ;;  %v9961_v15 = vsub.s32 3, %v371_v10 }
  0xa0   : > { %v8238_v28 = vld [vmem:[#allocation7 + $0x244] ss:$16 sps:$4 sm:$0xff]   ;;  %v8236_v30 = vld [vmem:[#allocation7 + $0x240] ss:$16 sps:$4 sm:$0xff]   ;;  %v8355_v10 = vld [vmem:[#allocation7 + $0x1cc] ss:$16 sps:$4 sm:$0xff]  }
  0xa1   : > { %v8241_v31 = vld [vmem:[#allocation7 + $0x24] ss:$16 sps:$4 sm:$0xff]   ;;  %v8239_v33 = vld [vmem:[#allocation7 + $0x20] ss:$16 sps:$4 sm:$0xff]   ;;  %s9617_s18 = scalar_lea.vmem %s9616_s14, 512 }
  0xa2   : > { %1300 = vmatpush1.bf16.msra.mxu0 %v8215_v17  ;;  %1341 = vmatpush1.bf16.msra.mxu1 %v8218_v18  ;;  %v8244_v32 = vld [vmem:[#allocation7 + $0x224] ss:$16 sps:$4 sm:$0xff]   ;;  %v8242_v34 = vld [vmem:[#allocation7 + $0x220] ss:$16 sps:$4 sm:$0xff]   ;;  %p9619_p9 = scmp.lt.s32.totalorder %s9617_s18, %s9611_s8 }
  0xa3   : > { %1301 = vmatprep.subr.bf16.mxu0 %v8223_v19  ;;  %1342 = vmatprep.subr.bf16.mxu1 %v8226_v20  ;;  %v8247_v35 = vld [vmem:[#allocation7 + $0x4] ss:$16 sps:$4 sm:$0xff]   ;;  %v8245_v37 = vld [vmem:[#allocation7] ss:$16 sps:$4 sm:$0xff]  }
  0xa4   : > { %v8250_v36 = vld [vmem:[#allocation7 + $0x204] ss:$16 sps:$4 sm:$0xff]   ;;  %v8248_v38 = vld [vmem:[#allocation7 + $0x200] ss:$16 sps:$4 sm:$0xff]   ;;  %p9620_p10 = por %p9619_p9, %p9618_p6 }
  0xa5   : > { %v8253_v39 = vld [vmem:[#allocation7 + $0x1e4] ss:$16 sps:$4 sm:$0xff]   ;;  %v8251_v41 = vld [vmem:[#allocation7 + $0x1e0] ss:$16 sps:$4 sm:$0xff]  }
  0xa6   : > { %1302 = vmatpush1.bf16.msra.mxu0 %v8221_v21  ;;  %1343 = vmatpush1.bf16.msra.mxu1 %v8224_v22  ;;  %v8256_v40 = vld [vmem:[#allocation7 + $0x3e4] ss:$16 sps:$4 sm:$0xff]   ;;  %v8254_v42 = vld [vmem:[#allocation7 + $0x3e0] ss:$16 sps:$4 sm:$0xff]   ;;  %p9621_p11 = pnand %p9620_p10, %p9614_p8 }
  0xa7   : > { %1303 = vmatprep.subr.bf16.mxu0 %v8229_v23  ;;  %1344 = vmatprep.subr.bf16.mxu1 %v8232_v24  ;;  %v8259_v43 = vld [vmem:[#allocation7 + $0x1c4] ss:$16 sps:$4 sm:$0xff]   ;;  %v8257_v44 = vld [vmem:[#allocation7 + $0x1c0] ss:$16 sps:$4 sm:$0xff]  }
  0xa8   : > { %v8262_v45 = vld [vmem:[#allocation7 + $0x3c4] ss:$16 sps:$4 sm:$0xff]   ;;  %v8260_v46 = vld [vmem:[#allocation7 + $0x3c0] ss:$16 sps:$4 sm:$0xff]  }
  0xa9   : > { %v8265_v47 = vld [vmem:[#allocation7 + $0x1a4] ss:$16 sps:$4 sm:$0xff]   ;;  %v8263_v49 = vld [vmem:[#allocation7 + $0x1a0] ss:$16 sps:$4 sm:$0xff]  }
  0xaa   : > { %1304 = vmatpush1.bf16.msra.mxu0 %v8227_v25  ;;  %1345 = vmatpush1.bf16.msra.mxu1 %v8230_v26  ;;  %v8268_v48 = vld [vmem:[#allocation7 + $0x3a4] ss:$16 sps:$4 sm:$0xff]   ;;  %v8266_v50 = vld [vmem:[#allocation7 + $0x3a0] ss:$16 sps:$4 sm:$0xff]  }
  0xab   : > { %1305 = vmatprep.subr.bf16.mxu0 %v8235_v27  ;;  %1346 = vmatprep.subr.bf16.mxu1 %v8238_v28  ;;  %v8271_v51 = vld [vmem:[#allocation7 + $0x184] ss:$16 sps:$4 sm:$0xff]   ;;  %v8269_v53 = vld [vmem:[#allocation7 + $0x180] ss:$16 sps:$4 sm:$0xff]  }
  0xac   : > { %v8274_v52 = vld [vmem:[#allocation7 + $0x384] ss:$16 sps:$4 sm:$0xff]   ;;  %v8272_v54 = vld [vmem:[#allocation7 + $0x380] ss:$16 sps:$4 sm:$0xff]  }
  0xad   : > { %v8277_v55 = vld [vmem:[#allocation7 + $0x164] ss:$16 sps:$4 sm:$0xff]   ;;  %v8275_v57 = vld [vmem:[#allocation7 + $0x160] ss:$16 sps:$4 sm:$0xff]  }
  0xae   : > { %1306 = vmatpush1.bf16.msra.mxu0 %v8233_v29  ;;  %1347 = vmatpush1.bf16.msra.mxu1 %v8236_v30  ;;  %v8280_v56 = vld [vmem:[#allocation7 + $0x364] ss:$16 sps:$4 sm:$0xff]   ;;  %v8278_v58 = vld [vmem:[#allocation7 + $0x360] ss:$16 sps:$4 sm:$0xff]  }
  0xaf   : > { %1307 = vmatprep.subr.bf16.mxu0 %v8241_v31  ;;  %1348 = vmatprep.subr.bf16.mxu1 %v8244_v32  ;;  %v8283_v59 = vld [vmem:[#allocation7 + $0x144] ss:$16 sps:$4 sm:$0xff]   ;;  %v8281_v61 = vld [vmem:[#allocation7 + $0x140] ss:$16 sps:$4 sm:$0xff]  }
  0xb0   : > { %v8286_v60 = vld [vmem:[#allocation7 + $0x344] ss:$16 sps:$4 sm:$0xff]   ;;  %v8284_v62 = vld [vmem:[#allocation7 + $0x340] ss:$16 sps:$4 sm:$0xff]  }
  0xb1   : > { %v8289_v63 = vld [vmem:[#allocation7 + $0x124] ss:$16 sps:$4 sm:$0xff]   ;;  %v8287_v1 = vld [vmem:[#allocation7 + $0x120] ss:$16 sps:$4 sm:$0xff]  }
  0xb2   : > { %1308 = vmatpush1.bf16.msra.mxu0 %v8239_v33  ;;  %1349 = vmatpush1.bf16.msra.mxu1 %v8242_v34  ;;  %v8292_v0 = vld [vmem:[#allocation7 + $0x324] ss:$16 sps:$4 sm:$0xff]   ;;  %v8290_v2 = vld [vmem:[#allocation7 + $0x320] ss:$16 sps:$4 sm:$0xff]   ;;  %v8299_v34 = vld [vmem:[#allocation7 + $0xe8] ss:$16 sps:$4 sm:$0xff]  }
  0xb3   : > { %1309 = vmatprep.subr.bf16.mxu0 %v8247_v35  ;;  %1350 = vmatprep.subr.bf16.mxu1 %v8250_v36  ;;  %v8295_v3 = vld [vmem:[#allocation7 + $0x104] ss:$16 sps:$4 sm:$0xff]   ;;  %v8293_v5 = vld [vmem:[#allocation7 + $0x100] ss:$16 sps:$4 sm:$0xff]   ;;  %v8302_v35 = vld [vmem:[#allocation7 + $0x2e8] ss:$16 sps:$4 sm:$0xff]  }
  0xb4   : > { %v8298_v4 = vld [vmem:[#allocation7 + $0x304] ss:$16 sps:$4 sm:$0xff]   ;;  %v8296_v6 = vld [vmem:[#allocation7 + $0x300] ss:$16 sps:$4 sm:$0xff]  }
  0xb5   : > { %v368_v11 = vld [vmem:[#allocation8] sm:$0xf] }
  0xb6   : > { %1310 = vmatpush1.bf16.msra.mxu0 %v8245_v37  ;;  %1351 = vmatpush1.bf16.msra.mxu1 %v8248_v38  ;;  %v373_v16 = vrot.slane %v368_v11, %v9955_v12  ;;  %v381_v17 = vrot.slane %v368_v11, %v9957_v13  ;;  %v377_v18 = vrot.slane %v368_v11, %v9959_v14 }
  0xb7   : > { %1311 = vmatprep.subr.bf16.mxu0 %v8253_v39  ;;  %1352 = vmatprep.subr.bf16.mxu1 %v8256_v40  ;;  %v385_v19 = vrot.slane %v368_v11, %v9961_v15  ;;  %v8358_v11 = vld [vmem:[#allocation7 + $0x3cc] ss:$16 sps:$4 sm:$0xff]  }
  0xba   : > { %1312 = vmatpush2.bf16.msra.mxu0 %v8251_v41  ;;  %1353 = vmatpush2.bf16.msra.mxu1 %v8254_v42  ;;  %v8307_v41 = vld [vmem:[#allocation7 + $0xcc] ss:$16 sps:$4 sm:$0xff]  }
  0xbb   : > { %1313 = vmatprep.subr.bf16.mxu0 %v8259_v43  ;;  %1354 = vmatprep.subr.bf16.mxu1 %v8262_v45  ;;  %v8310_v42 = vld [vmem:[#allocation7 + $0x2cc] ss:$16 sps:$4 sm:$0xff]   ;;  %v8308_v45 = vld [vmem:[#allocation7 + $0x2c8] ss:$16 sps:$4 sm:$0xff]  }
  0xbe   : > { %1314 = vmatpush2.bf16.msra.mxu0 %v8257_v44  ;;  %1355 = vmatpush2.bf16.msra.mxu1 %v8260_v46  ;;  %v8305_v44 = vld [vmem:[#allocation7 + $0xc8] ss:$16 sps:$4 sm:$0xff]   ;;  %v8313_v46 = vld [vmem:[#allocation7 + $0xac] ss:$16 sps:$4 sm:$0xff]  }
  0xbf   : > { %1315 = vmatprep.subr.bf16.mxu0 %v8265_v47  ;;  %1356 = vmatprep.subr.bf16.mxu1 %v8268_v48  ;;  %v8316_v47 = vld [vmem:[#allocation7 + $0x2ac] ss:$16 sps:$4 sm:$0xff]   ;;  %v8311_v48 = vld [vmem:[#allocation7 + $0xa8] ss:$16 sps:$4 sm:$0xff]  }
  0xc2   : > { %1316 = vmatpush2.bf16.msra.mxu0 %v8263_v49  ;;  %1357 = vmatpush2.bf16.msra.mxu1 %v8266_v50  ;;  %v8314_v49 = vld [vmem:[#allocation7 + $0x2a8] ss:$16 sps:$4 sm:$0xff]   ;;  %v8319_v50 = vld [vmem:[#allocation7 + $0x8c] ss:$16 sps:$4 sm:$0xff]  }
  0xc3   : > { %1317 = vmatprep.subr.bf16.mxu0 %v8271_v51  ;;  %1358 = vmatprep.subr.bf16.mxu1 %v8274_v52  ;;  %v8322_v51 = vld [vmem:[#allocation7 + $0x28c] ss:$16 sps:$4 sm:$0xff]   ;;  %v8317_v52 = vld [vmem:[#allocation7 + $0x88] ss:$16 sps:$4 sm:$0xff]  }
  0xc6   : > { %1318 = vmatpush2.bf16.msra.mxu0 %v8269_v53  ;;  %1359 = vmatpush2.bf16.msra.mxu1 %v8272_v54  ;;  %v8320_v53 = vld [vmem:[#allocation7 + $0x288] ss:$16 sps:$4 sm:$0xff]   ;;  %v8325_v54 = vld [vmem:[#allocation7 + $0x6c] ss:$16 sps:$4 sm:$0xff]  }
  0xc7   : > { %1319 = vmatprep.subr.bf16.mxu0 %v8277_v55  ;;  %1360 = vmatprep.subr.bf16.mxu1 %v8280_v56  ;;  %v8328_v55 = vld [vmem:[#allocation7 + $0x26c] ss:$16 sps:$4 sm:$0xff]   ;;  %v8323_v56 = vld [vmem:[#allocation7 + $0x68] ss:$16 sps:$4 sm:$0xff]  }
  0xca   : > { %1320 = vmatpush2.bf16.msra.mxu0 %v8275_v57  ;;  %1361 = vmatpush2.bf16.msra.mxu1 %v8278_v58  ;;  %v8326_v57 = vld [vmem:[#allocation7 + $0x268] ss:$16 sps:$4 sm:$0xff]   ;;  %v8331_v58 = vld [vmem:[#allocation7 + $0x4c] ss:$16 sps:$4 sm:$0xff]  }
  0xcb   : > { %1321 = vmatprep.subr.bf16.mxu0 %v8283_v59  ;;  %1362 = vmatprep.subr.bf16.mxu1 %v8286_v60  ;;  %v8334_v59 = vld [vmem:[#allocation7 + $0x24c] ss:$16 sps:$4 sm:$0xff]   ;;  %v8329_v60 = vld [vmem:[#allocation7 + $0x48] ss:$16 sps:$4 sm:$0xff]  }
  0xce   : > { %1322 = vmatpush2.bf16.msra.mxu0 %v8281_v61  ;;  %1363 = vmatpush2.bf16.msra.mxu1 %v8284_v62  ;;  %v8332_v61 = vld [vmem:[#allocation7 + $0x248] ss:$16 sps:$4 sm:$0xff]   ;;  %v8337_v62 = vld [vmem:[#allocation7 + $0x2c] ss:$16 sps:$4 sm:$0xff]  }
  0xcf   : > { %1323 = vmatprep.subr.bf16.mxu0 %v8289_v63  ;;  %1364 = vmatprep.subr.bf16.mxu1 %v8292_v0  ;;  %v8340_v63 = vld [vmem:[#allocation7 + $0x22c] ss:$16 sps:$4 sm:$0xff]   ;;  %v8335_v0 = vld [vmem:[#allocation7 + $0x28] ss:$16 sps:$4 sm:$0xff]  }
  0xd2   : > { %1324 = vmatpush2.bf16.msra.mxu0 %v8287_v1  ;;  %1365 = vmatpush2.bf16.msra.mxu1 %v8290_v2  ;;  %v8338_v1 = vld [vmem:[#allocation7 + $0x228] ss:$16 sps:$4 sm:$0xff]   ;;  %v8343_v2 = vld [vmem:[#allocation7 + $0xc] ss:$16 sps:$4 sm:$0xff]  }
  0xd3   : > { %1325 = vmatprep.subr.bf16.mxu0 %v8295_v3  ;;  %1366 = vmatprep.subr.bf16.mxu1 %v8298_v4  ;;  %v8346_v3 = vld [vmem:[#allocation7 + $0x20c] ss:$16 sps:$4 sm:$0xff]   ;;  %v8341_v4 = vld [vmem:[#allocation7 + $0x8] ss:$16 sps:$4 sm:$0xff]  }
  0xd6   : > { %1326 = vmatpush2.bf16.msra.mxu0 %v8293_v5  ;;  %1367 = vmatpush2.bf16.msra.mxu1 %v8296_v6  ;;  %v8344_v5 = vld [vmem:[#allocation7 + $0x208] ss:$16 sps:$4 sm:$0xff]   ;;  %v8349_v6 = vld [vmem:[#allocation7 + $0x1ec] ss:$16 sps:$4 sm:$0xff]  }
  0xd7   : > { %1377 = vmatprep.subr.bf16.mxu0 %v8301_v7  ;;  %1418 = vmatprep.subr.bf16.mxu1 %v8304_v8  ;;  %v8352_v7 = vld [vmem:[#allocation7 + $0x3ec] ss:$16 sps:$4 sm:$0xff]   ;;  %v8347_v8 = vld [vmem:[#allocation7 + $0x1e8] ss:$16 sps:$4 sm:$0xff]  }
 0x159   : > { %v448_v20 = vpop.f32.mrf.mxu0  ;;  %v489_v21 = vpop.f32.mrf.mxu1 }
 0x15a   : > { %v449_v22 = vadd.f32 %v448_v20, %v373_v16  ;;  %v490_v23 = vadd.f32 %v489_v21, %v381_v17  ;;  %v8353_v16 = vld [vmem:[#allocation7 + $0x1c8] ss:$16 sps:$4 sm:$0xff]  }
 0x15b   : > { %v450_v24 = vpop.f32.mrf.mxu0  ;;  %v491_v25 = vpop.f32.mrf.mxu1  ;;  %v8356_v17 = vld [vmem:[#allocation7 + $0x3c8] ss:$16 sps:$4 sm:$0xff]  }
 0x15c   : > { %v498_v26 = vmax.f32 %v490_v23, 0.0  ;;  %v451_v27 = vadd.f32 %v450_v24, %v377_v18  ;;  %v492_v28 = vadd.f32 %v491_v25, %v385_v19  ;;  %v496_v29 = vmax.f32 %v449_v22, 0.0  ;;  %v8361_v18 = vld [vmem:[#allocation7 + $0x1ac] ss:$16 sps:$4 sm:$0xff]   ;;  %v8359_v20 = vld [vmem:[#allocation7 + $0x1a8] ss:$16 sps:$4 sm:$0xff]  }
 0x15d   : > { %v452_v30 = vpop.f32.mrf.mxu0  ;;  %v493_v31 = vpop.f32.mrf.mxu1  ;;  %v8364_v19 = vld [vmem:[#allocation7 + $0x3ac] ss:$16 sps:$4 sm:$0xff]   ;;  %v8362_v21 = vld [vmem:[#allocation7 + $0x3a8] ss:$16 sps:$4 sm:$0xff]  }
 0x15e   : > { %v497_v32 = vmax.f32 %v451_v27, 0.0  ;;  %v499_v33 = vmax.f32 %v492_v28, 0.0  ;;  %v9967_v36 = vpack.c.bf16 %v498_v26, %v498_v26  ;;  %v9969_v43 = vpack.c.bf16 %v496_v29, %v496_v29  ;;  %v8367_v22 = vld [vmem:[#allocation7 + $0x18c] ss:$16 sps:$4 sm:$0xff]   ;;  %v8365_v24 = vld [vmem:[#allocation7 + $0x188] ss:$16 sps:$4 sm:$0xff]  }
 0x15f   : > { %v453_v37 = vpop.f32.mrf.mxu0  ;;  %v494_v38 = vpop.f32.mrf.mxu1  ;;  %v8370_v23 = vld [vmem:[#allocation7 + $0x38c] ss:$16 sps:$4 sm:$0xff]   ;;  %v8368_v25 = vld [vmem:[#allocation7 + $0x388] ss:$16 sps:$4 sm:$0xff]  }
 0x160   : > { %v501_v39 = vpack.c.bf16 %v497_v32, %v497_v32  ;;  %v503_v40 = vpack.c.bf16 %v499_v33, %v499_v33  ;;  %v8373_v26 = vld [vmem:[#allocation7 + $0x16c] ss:$16 sps:$4 sm:$0xff]   ;;  %v8371_v28 = vld [vmem:[#allocation7 + $0x168] ss:$16 sps:$4 sm:$0xff]  }
 0x161   : > { %v8376_v27 = vld [vmem:[#allocation7 + $0x36c] ss:$16 sps:$4 sm:$0xff]   ;;  %v8374_v29 = vld [vmem:[#allocation7 + $0x368] ss:$16 sps:$4 sm:$0xff]  }
 0x162   : > { %1327 = vmatprep.mubr.bf16.mxu0 %v501_v39  ;;  %1368 = vmatprep.mubr.bf16.mxu1 %v503_v40  ;;  %v8379_v30 = vld [vmem:[#allocation7 + $0x14c] ss:$16 sps:$4 sm:$0xff]   ;;  %v8377_v32 = vld [vmem:[#allocation7 + $0x148] ss:$16 sps:$4 sm:$0xff]  }
 0x163   : > { %1328 = vmatmul.mubr.bf16.vlgmr.msra.gmra.mxu0 %v9969_v43  ;;  %1369 = vmatmul.mubr.bf16.vlgmr.msra.gmra.mxu1 %v9967_v36  ;;  %v8382_v31 = vld [vmem:[#allocation7 + $0x34c] ss:$16 sps:$4 sm:$0xff]   ;;  %v8380_v33 = vld [vmem:[#allocation7 + $0x348] ss:$16 sps:$4 sm:$0xff]  }
 0x164   : > { %1378 = vmatpush1.bf16.msra.mxu0 %v8299_v34  ;;  %1419 = vmatpush1.bf16.msra.mxu1 %v8302_v35  ;;  %v8385_v34 = vld [vmem:[#allocation7 + $0x12c] ss:$16 sps:$4 sm:$0xff]   ;;  %v8383_v37 = vld [vmem:[#allocation7 + $0x128] ss:$16 sps:$4 sm:$0xff]  }
 0x165   : > { %1409 = vmatprep.mubr.bf16.mxu0 %v501_v39  ;;  %1450 = vmatprep.mubr.bf16.mxu1 %v503_v40  ;;  %v8388_v35 = vld [vmem:[#allocation7 + $0x32c] ss:$16 sps:$4 sm:$0xff]   ;;  %v8386_v38 = vld [vmem:[#allocation7 + $0x328] ss:$16 sps:$4 sm:$0xff]  }
 0x166   : > { %1379 = vmatprep.subr.bf16.mxu0 %v8307_v41  ;;  %1420 = vmatprep.subr.bf16.mxu1 %v8310_v42  ;;  %v8391_v39 = vld [vmem:[#allocation7 + $0x10c] ss:$16 sps:$4 sm:$0xff]   ;;  %v8389_v41 = vld [vmem:[#allocation7 + $0x108] ss:$16 sps:$4 sm:$0xff]  }
 0x167   : > { %v8394_v40 = vld [vmem:[#allocation7 + $0x30c] ss:$16 sps:$4 sm:$0xff]   ;;  %v8392_v42 = vld [vmem:[#allocation7 + $0x308] ss:$16 sps:$4 sm:$0xff]  }
 0x168   : > { %1380 = vmatpush1.bf16.msra.mxu0 %v8305_v44  ;;  %1421 = vmatpush1.bf16.msra.mxu1 %v8308_v45  ;;  %v8397_v44 = vld [vmem:[#allocation7 + $0x4e4] ss:$16 sps:$4 sm:$0xff]   ;;  %v8395_v45 = vld [vmem:[#allocation7 + $0x4e0] ss:$16 sps:$4 sm:$0xff]  }
 0x169   : > { %1381 = vmatprep.subr.bf16.mxu0 %v8313_v46  ;;  %1422 = vmatprep.subr.bf16.mxu1 %v8316_v47  ;;  %v8400_v46 = vld [vmem:[#allocation7 + $0x4c4] ss:$16 sps:$4 sm:$0xff]   ;;  %v8398_v47 = vld [vmem:[#allocation7 + $0x4c0] ss:$16 sps:$4 sm:$0xff]  }
 0x16c   : > { %1382 = vmatpush1.bf16.msra.mxu0 %v8311_v48  ;;  %1423 = vmatpush1.bf16.msra.mxu1 %v8314_v49  ;;  %v8403_v48 = vld [vmem:[#allocation7 + $0x4a4] ss:$16 sps:$4 sm:$0xff]   ;;  %v8401_v49 = vld [vmem:[#allocation7 + $0x4a0] ss:$16 sps:$4 sm:$0xff]  }
 0x16d   : > { %1383 = vmatprep.subr.bf16.mxu0 %v8319_v50  ;;  %1424 = vmatprep.subr.bf16.mxu1 %v8322_v51  ;;  %v8406_v50 = vld [vmem:[#allocation7 + $0x484] ss:$16 sps:$4 sm:$0xff]   ;;  %v8404_v51 = vld [vmem:[#allocation7 + $0x480] ss:$16 sps:$4 sm:$0xff]  }
 0x170   : > { %1384 = vmatpush1.bf16.msra.mxu0 %v8317_v52  ;;  %1425 = vmatpush1.bf16.msra.mxu1 %v8320_v53  ;;  %v8443_v52 = vld [vmem:[#allocation7 + $0x6e0] ss:$16 sps:$4 sm:$0xff]   ;;  %v8445_v53 = vld [vmem:[#allocation7 + $0x6e4] ss:$16 sps:$4 sm:$0xff]  }
 0x171   : > { %1385 = vmatprep.subr.bf16.mxu0 %v8325_v54  ;;  %1426 = vmatprep.subr.bf16.mxu1 %v8328_v55  ;;  %v8409_v54 = vld [vmem:[#allocation7 + $0x464] ss:$16 sps:$4 sm:$0xff]   ;;  %v8407_v55 = vld [vmem:[#allocation7 + $0x460] ss:$16 sps:$4 sm:$0xff]  }
 0x174   : > { %1386 = vmatpush1.bf16.msra.mxu0 %v8323_v56  ;;  %1427 = vmatpush1.bf16.msra.mxu1 %v8326_v57  ;;  %v8451_v56 = vld [vmem:[#allocation7 + $0x6c4] ss:$16 sps:$4 sm:$0xff]   ;;  %v8410_v57 = vld [vmem:[#allocation7 + $0x440] ss:$16 sps:$4 sm:$0xff]  }
 0x175   : > { %1387 = vmatprep.subr.bf16.mxu0 %v8331_v58  ;;  %1428 = vmatprep.subr.bf16.mxu1 %v8334_v59  ;;  %v8455_v58 = vld [vmem:[#allocation7 + $0x6a0] ss:$16 sps:$4 sm:$0xff]   ;;  %v8457_v59 = vld [vmem:[#allocation7 + $0x6a4] ss:$16 sps:$4 sm:$0xff]  }
 0x178   : > { %1388 = vmatpush1.bf16.msra.mxu0 %v8329_v60  ;;  %1429 = vmatpush1.bf16.msra.mxu1 %v8332_v61  ;;  %v8415_v60 = vld [vmem:[#allocation7 + $0x424] ss:$16 sps:$4 sm:$0xff]   ;;  %v8413_v61 = vld [vmem:[#allocation7 + $0x420] ss:$16 sps:$4 sm:$0xff]  }
 0x179   : > { %1389 = vmatprep.subr.bf16.mxu0 %v8337_v62  ;;  %1430 = vmatprep.subr.bf16.mxu1 %v8340_v63  ;;  %v8461_v62 = vld [vmem:[#allocation7 + $0x680] ss:$16 sps:$4 sm:$0xff]   ;;  %v8463_v63 = vld [vmem:[#allocation7 + $0x684] ss:$16 sps:$4 sm:$0xff]  }
 0x17c   : > { %1390 = vmatpush1.bf16.msra.mxu0 %v8335_v0  ;;  %1431 = vmatpush1.bf16.msra.mxu1 %v8338_v1  ;;  %v8418_v0 = vld [vmem:[#allocation7 + $0x404] ss:$16 sps:$4 sm:$0xff]   ;;  %v8416_v1 = vld [vmem:[#allocation7 + $0x400] ss:$16 sps:$4 sm:$0xff]  }
 0x17d   : > { %1391 = vmatprep.subr.bf16.mxu0 %v8343_v2  ;;  %1432 = vmatprep.subr.bf16.mxu1 %v8346_v3  ;;  %v8467_v2 = vld [vmem:[#allocation7 + $0x660] ss:$16 sps:$4 sm:$0xff]   ;;  %v8469_v3 = vld [vmem:[#allocation7 + $0x664] ss:$16 sps:$4 sm:$0xff]  }
 0x180   : > { %1392 = vmatpush1.bf16.msra.mxu0 %v8341_v4  ;;  %1433 = vmatpush1.bf16.msra.mxu1 %v8344_v5  ;;  %v8421_v4 = vld [vmem:[#allocation7 + $0x5e4] ss:$16 sps:$4 sm:$0xff]   ;;  %v8419_v5 = vld [vmem:[#allocation7 + $0x5e0] ss:$16 sps:$4 sm:$0xff]  }
 0x181   : > { %1393 = vmatprep.subr.bf16.mxu0 %v8349_v6  ;;  %1434 = vmatprep.subr.bf16.mxu1 %v8352_v7  ;;  %v8473_v6 = vld [vmem:[#allocation7 + $0x640] ss:$16 sps:$4 sm:$0xff]   ;;  %v8475_v7 = vld [vmem:[#allocation7 + $0x644] ss:$16 sps:$4 sm:$0xff]  }
 0x184   : > { %1394 = vmatpush2.bf16.msra.mxu0 %v8347_v8  ;;  %1435 = vmatpush2.bf16.msra.mxu1 %v8350_v9  ;;  %v8424_v8 = vld [vmem:[#allocation7 + $0x5c4] ss:$16 sps:$4 sm:$0xff]   ;;  %v8422_v9 = vld [vmem:[#allocation7 + $0x5c0] ss:$16 sps:$4 sm:$0xff]  }
 0x185   : > { %1395 = vmatprep.subr.bf16.mxu0 %v8355_v10  ;;  %1436 = vmatprep.subr.bf16.mxu1 %v8358_v11  ;;  %v8479_v10 = vld [vmem:[#allocation7 + $0x620] ss:$16 sps:$4 sm:$0xff]   ;;  %v8481_v11 = vld [vmem:[#allocation7 + $0x624] ss:$16 sps:$4 sm:$0xff]  }
 0x188   : > { %1396 = vmatpush2.bf16.msra.mxu0 %v8353_v16  ;;  %1437 = vmatpush2.bf16.msra.mxu1 %v8356_v17  ;;  %v8427_v16 = vld [vmem:[#allocation7 + $0x5a4] ss:$16 sps:$4 sm:$0xff]   ;;  %v8425_v17 = vld [vmem:[#allocation7 + $0x5a0] ss:$16 sps:$4 sm:$0xff]  }
 0x189   : > { %1397 = vmatprep.subr.bf16.mxu0 %v8361_v18  ;;  %1438 = vmatprep.subr.bf16.mxu1 %v8364_v19  ;;  %v8485_v18 = vld [vmem:[#allocation7 + $0x600] ss:$16 sps:$4 sm:$0xff]   ;;  %v8487_v19 = vld [vmem:[#allocation7 + $0x604] ss:$16 sps:$4 sm:$0xff]  }
 0x18c   : > { %1398 = vmatpush2.bf16.msra.mxu0 %v8359_v20  ;;  %1439 = vmatpush2.bf16.msra.mxu1 %v8362_v21  ;;  %v8430_v20 = vld [vmem:[#allocation7 + $0x584] ss:$16 sps:$4 sm:$0xff]   ;;  %v8428_v21 = vld [vmem:[#allocation7 + $0x580] ss:$16 sps:$4 sm:$0xff]  }
 0x18d   : > { %1399 = vmatprep.subr.bf16.mxu0 %v8367_v22  ;;  %1440 = vmatprep.subr.bf16.mxu1 %v8370_v23  ;;  %v8491_v22 = vld [vmem:[#allocation7 + $0x7e0] ss:$16 sps:$4 sm:$0xff]   ;;  %v8493_v23 = vld [vmem:[#allocation7 + $0x7e4] ss:$16 sps:$4 sm:$0xff]  }
 0x190   : > { %1400 = vmatpush2.bf16.msra.mxu0 %v8365_v24  ;;  %1441 = vmatpush2.bf16.msra.mxu1 %v8368_v25  ;;  %v8433_v24 = vld [vmem:[#allocation7 + $0x564] ss:$16 sps:$4 sm:$0xff]   ;;  %v8431_v25 = vld [vmem:[#allocation7 + $0x560] ss:$16 sps:$4 sm:$0xff]  }
 0x191   : > { %1401 = vmatprep.subr.bf16.mxu0 %v8373_v26  ;;  %1442 = vmatprep.subr.bf16.mxu1 %v8376_v27  ;;  %v8497_v26 = vld [vmem:[#allocation7 + $0x7c0] ss:$16 sps:$4 sm:$0xff]   ;;  %v8499_v27 = vld [vmem:[#allocation7 + $0x7c4] ss:$16 sps:$4 sm:$0xff]  }
 0x194   : > { %1402 = vmatpush2.bf16.msra.mxu0 %v8371_v28  ;;  %1443 = vmatpush2.bf16.msra.mxu1 %v8374_v29  ;;  %v8436_v28 = vld [vmem:[#allocation7 + $0x544] ss:$16 sps:$4 sm:$0xff]   ;;  %v8434_v29 = vld [vmem:[#allocation7 + $0x540] ss:$16 sps:$4 sm:$0xff]  }
 0x195   : > { %1403 = vmatprep.subr.bf16.mxu0 %v8379_v30  ;;  %1444 = vmatprep.subr.bf16.mxu1 %v8382_v31  ;;  %v8503_v30 = vld [vmem:[#allocation7 + $0x7a0] ss:$16 sps:$4 sm:$0xff]   ;;  %v8505_v31 = vld [vmem:[#allocation7 + $0x7a4] ss:$16 sps:$4 sm:$0xff]  }
 0x198   : > { %1404 = vmatpush2.bf16.msra.mxu0 %v8377_v32  ;;  %1445 = vmatpush2.bf16.msra.mxu1 %v8380_v33  ;;  %v8439_v32 = vld [vmem:[#allocation7 + $0x524] ss:$16 sps:$4 sm:$0xff]   ;;  %v8437_v33 = vld [vmem:[#allocation7 + $0x520] ss:$16 sps:$4 sm:$0xff]  }
 0x199   : > { %1405 = vmatprep.subr.bf16.mxu0 %v8385_v34  ;;  %1446 = vmatprep.subr.bf16.mxu1 %v8388_v35  ;;  %v8509_v34 = vld [vmem:[#allocation7 + $0x780] ss:$16 sps:$4 sm:$0xff]   ;;  %v8511_v35 = vld [vmem:[#allocation7 + $0x784] ss:$16 sps:$4 sm:$0xff]  }
 0x19c   : > { %1406 = vmatpush2.bf16.msra.mxu0 %v8383_v37  ;;  %1447 = vmatpush2.bf16.msra.mxu1 %v8386_v38  ;;  %v8442_v37 = vld [vmem:[#allocation7 + $0x504] ss:$16 sps:$4 sm:$0xff]   ;;  %v8440_v38 = vld [vmem:[#allocation7 + $0x500] ss:$16 sps:$4 sm:$0xff]  }
 0x19d   : > { %1407 = vmatprep.subr.bf16.mxu0 %v8391_v39  ;;  %1448 = vmatprep.subr.bf16.mxu1 %v8394_v40  ;;  %v8515_v39 = vld [vmem:[#allocation7 + $0x760] ss:$16 sps:$4 sm:$0xff]   ;;  %v8517_v40 = vld [vmem:[#allocation7 + $0x764] ss:$16 sps:$4 sm:$0xff]  }
 0x1a0   : > { %1408 = vmatpush2.bf16.msra.mxu0 %v8389_v41  ;;  %1449 = vmatpush2.bf16.msra.mxu1 %v8392_v42  ;;  %v8448_v41 = vld [vmem:[#allocation7 + $0x4ec] ss:$16 sps:$4 sm:$0xff]   ;;  %v8521_v42 = vld [vmem:[#allocation7 + $0x740] ss:$16 sps:$4 sm:$0xff]  }
 0x1a1   : > { %2259 = vmatprep.subr.bf16.mxu0 %v8397_v44  ;;  %2300 = vmatprep.subr.bf16.mxu1 %v8445_v53  ;;  %v8523_v44 = vld [vmem:[#allocation7 + $0x744] ss:$16 sps:$4 sm:$0xff]  }
 0x1a3   : > { %1410 = vmatmul.mubr.bf16.vlgmr.msra.gmra.mxu0 %v9969_v43  ;;  %1451 = vmatmul.mubr.bf16.vlgmr.msra.gmra.mxu1 %v9967_v36  ;;  %v8449_v43 = vld [vmem:[#allocation7 + $0x6c0] ss:$16 sps:$4 sm:$0xff]   ;;  %v8412_v36 = vld [vmem:[#allocation7 + $0x444] ss:$16 sps:$4 sm:$0xff]  }
 0x1a4   : > { %2260 = vmatpush1.bf16.msra.mxu0 %v8395_v45  ;;  %2301 = vmatpush1.bf16.msra.mxu1 %v8443_v52  ;;  %v8529_v45 = vld [vmem:[#allocation7 + $0x724] ss:$16 sps:$4 sm:$0xff]  }
 0x1a5   : > { %2261 = vmatprep.subr.bf16.mxu0 %v8400_v46  ;;  %2302 = vmatprep.subr.bf16.mxu1 %v8451_v56  ;;  %v8527_v46 = vld [vmem:[#allocation7 + $0x720] ss:$16 sps:$4 sm:$0xff]  }
 0x1a8   : > { %2262 = vmatpush1.bf16.msra.mxu0 %v8398_v47  ;;  %2303 = vmatpush1.bf16.msra.mxu1 %v8449_v43  ;;  %v8535_v47 = vld [vmem:[#allocation7 + $0x704] ss:$16 sps:$4 sm:$0xff]  }
 0x1a9   : > { %2263 = vmatprep.subr.bf16.mxu0 %v8403_v48  ;;  %2304 = vmatprep.subr.bf16.mxu1 %v8457_v59  ;;  %v8533_v48 = vld [vmem:[#allocation7 + $0x700] ss:$16 sps:$4 sm:$0xff]  }
 0x1ac   : > { %2264 = vmatpush1.bf16.msra.mxu0 %v8401_v49  ;;  %2305 = vmatpush1.bf16.msra.mxu1 %v8455_v58  ;;  %v8541_v49 = vld [vmem:[#allocation7 + $0x6ec] ss:$16 sps:$4 sm:$0xff]  }
 0x1ad   : > { %2265 = vmatprep.subr.bf16.mxu0 %v8406_v50  ;;  %2306 = vmatprep.subr.bf16.mxu1 %v8463_v63  ;;  %v9975_v50 = vld [vmem:[#allocation8 + $0x4] sm:$0xf] }
 0x1ae   : > { %v642_v52 = vrot.slane %v9975_v50, %v9959_v14 }
 0x1b0   : > { %2266 = vmatpush1.bf16.msra.mxu0 %v8404_v51  ;;  %2307 = vmatpush1.bf16.msra.mxu1 %v8461_v62  ;;  %v638_v51 = vrot.slane %v9975_v50, %v9955_v12 }
 0x1b1   : > { %2267 = vmatprep.subr.bf16.mxu0 %v8409_v54  ;;  %2308 = vmatprep.subr.bf16.mxu1 %v8469_v3 }
 0x1b4   : > { %2268 = vmatpush1.bf16.msra.mxu0 %v8407_v55  ;;  %2309 = vmatpush1.bf16.msra.mxu1 %v8467_v2  ;;  %v8446_v2 = vld [vmem:[#allocation7 + $0x4e8] ss:$16 sps:$4 sm:$0xff]  }
 0x1b5   : > { %2269 = vmatprep.subr.bf16.mxu0 %v8412_v36  ;;  %2310 = vmatprep.subr.bf16.mxu1 %v8475_v7  ;;  %v8458_v7 = vld [vmem:[#allocation7 + $0x4a8] ss:$16 sps:$4 sm:$0xff]  }
 0x1b8   : > { %2270 = vmatpush1.bf16.msra.mxu0 %v8410_v57  ;;  %2311 = vmatpush1.bf16.msra.mxu1 %v8473_v6  ;;  %v8460_v6 = vld [vmem:[#allocation7 + $0x4ac] ss:$16 sps:$4 sm:$0xff]  }
 0x1b9   : > { %2271 = vmatprep.subr.bf16.mxu0 %v8415_v60  ;;  %2312 = vmatprep.subr.bf16.mxu1 %v8481_v11  ;;  %v8470_v11 = vld [vmem:[#allocation7 + $0x468] ss:$16 sps:$4 sm:$0xff]  }
 0x1bc   : > { %2272 = vmatpush1.bf16.msra.mxu0 %v8413_v61  ;;  %2313 = vmatpush1.bf16.msra.mxu1 %v8479_v10  ;;  %v8472_v10 = vld [vmem:[#allocation7 + $0x46c] ss:$16 sps:$4 sm:$0xff]  }
 0x1bd   : > { %2273 = vmatprep.subr.bf16.mxu0 %v8418_v0  ;;  %2314 = vmatprep.subr.bf16.mxu1 %v8487_v19  ;;  %v8482_v19 = vld [vmem:[#allocation7 + $0x428] ss:$16 sps:$4 sm:$0xff]  }
 0x1c0   : > { %2274 = vmatpush1.bf16.msra.mxu0 %v8416_v1  ;;  %2315 = vmatpush1.bf16.msra.mxu1 %v8485_v18  ;;  %v8484_v18 = vld [vmem:[#allocation7 + $0x42c] ss:$16 sps:$4 sm:$0xff]  }
 0x1c1   : > { %2275 = vmatprep.subr.bf16.mxu0 %v8421_v4  ;;  %2316 = vmatprep.subr.bf16.mxu1 %v8493_v23  ;;  %v8454_v4 = vld [vmem:[#allocation7 + $0x4cc] ss:$16 sps:$4 sm:$0xff]   ;;  %v8494_v23 = vld [vmem:[#allocation7 + $0x5e8] ss:$16 sps:$4 sm:$0xff]  }
 0x1c4   : > { %2276 = vmatpush2.bf16.msra.mxu0 %v8419_v5  ;;  %2317 = vmatpush2.bf16.msra.mxu1 %v8491_v22  ;;  %v8452_v5 = vld [vmem:[#allocation7 + $0x4c8] ss:$16 sps:$4 sm:$0xff]   ;;  %v8496_v22 = vld [vmem:[#allocation7 + $0x5ec] ss:$16 sps:$4 sm:$0xff]  }
 0x1c5   : > { %2277 = vmatprep.subr.bf16.mxu0 %v8424_v8  ;;  %2318 = vmatprep.subr.bf16.mxu1 %v8499_v27  ;;  %v8466_v8 = vld [vmem:[#allocation7 + $0x48c] ss:$16 sps:$4 sm:$0xff]   ;;  %v8506_v27 = vld [vmem:[#allocation7 + $0x5a8] ss:$16 sps:$4 sm:$0xff]  }
 0x1c8   : > { %2278 = vmatpush2.bf16.msra.mxu0 %v8422_v9  ;;  %2319 = vmatpush2.bf16.msra.mxu1 %v8497_v26  ;;  %v8464_v9 = vld [vmem:[#allocation7 + $0x488] ss:$16 sps:$4 sm:$0xff]   ;;  %v8508_v26 = vld [vmem:[#allocation7 + $0x5ac] ss:$16 sps:$4 sm:$0xff]  }
 0x1c9   : > { %2279 = vmatprep.subr.bf16.mxu0 %v8427_v16  ;;  %2320 = vmatprep.subr.bf16.mxu1 %v8505_v31  ;;  %v8478_v16 = vld [vmem:[#allocation7 + $0x44c] ss:$16 sps:$4 sm:$0xff]   ;;  %v8518_v31 = vld [vmem:[#allocation7 + $0x568] ss:$16 sps:$4 sm:$0xff]  }
 0x1cc   : > { %2280 = vmatpush2.bf16.msra.mxu0 %v8425_v17  ;;  %2321 = vmatpush2.bf16.msra.mxu1 %v8503_v30  ;;  %v8476_v17 = vld [vmem:[#allocation7 + $0x448] ss:$16 sps:$4 sm:$0xff]   ;;  %v8520_v30 = vld [vmem:[#allocation7 + $0x56c] ss:$16 sps:$4 sm:$0xff]  }
 0x1cd   : > { %2281 = vmatprep.subr.bf16.mxu0 %v8430_v20  ;;  %2322 = vmatprep.subr.bf16.mxu1 %v8511_v35  ;;  %v8490_v20 = vld [vmem:[#allocation7 + $0x40c] ss:$16 sps:$4 sm:$0xff]  }
 0x1ce   : > { %v8532_v35 = vld [vmem:[#allocation7 + $0x52c] ss:$16 sps:$4 sm:$0xff]  }
 0x1d0   : > { %2282 = vmatpush2.bf16.msra.mxu0 %v8428_v21  ;;  %2323 = vmatpush2.bf16.msra.mxu1 %v8509_v34  ;;  %v8488_v21 = vld [vmem:[#allocation7 + $0x408] ss:$16 sps:$4 sm:$0xff]  }
 0x1d1   : > { %2283 = vmatprep.subr.bf16.mxu0 %v8433_v24  ;;  %2324 = vmatprep.subr.bf16.mxu1 %v8517_v40  ;;  %v8502_v24 = vld [vmem:[#allocation7 + $0x5cc] ss:$16 sps:$4 sm:$0xff]   ;;  %v8524_v34 = vld [vmem:[#allocation7 + $0x548] ss:$16 sps:$4 sm:$0xff]  }
 0x1d4   : > { %2284 = vmatpush2.bf16.msra.mxu0 %v8431_v25  ;;  %2325 = vmatpush2.bf16.msra.mxu1 %v8515_v39  ;;  %v8500_v25 = vld [vmem:[#allocation7 + $0x5c8] ss:$16 sps:$4 sm:$0xff]  }
 0x1d5   : > { %2285 = vmatprep.subr.bf16.mxu0 %v8436_v28  ;;  %2326 = vmatprep.subr.bf16.mxu1 %v8523_v44  ;;  %v8514_v28 = vld [vmem:[#allocation7 + $0x58c] ss:$16 sps:$4 sm:$0xff]  }
 0x1d8   : > { %2286 = vmatpush2.bf16.msra.mxu0 %v8434_v29  ;;  %2327 = vmatpush2.bf16.msra.mxu1 %v8521_v42  ;;  %v8512_v29 = vld [vmem:[#allocation7 + $0x588] ss:$16 sps:$4 sm:$0xff]  }
 0x1d9   : > { %2287 = vmatprep.subr.bf16.mxu0 %v8439_v32  ;;  %2328 = vmatprep.subr.bf16.mxu1 %v8529_v45  ;;  %v8526_v32 = vld [vmem:[#allocation7 + $0x54c] ss:$16 sps:$4 sm:$0xff]  }
 0x1da   : > { %v8538_v45 = vld [vmem:[#allocation7 + $0x50c] ss:$16 sps:$4 sm:$0xff]  }
 0x1dc   : > { %2288 = vmatpush2.bf16.msra.mxu0 %v8437_v33  ;;  %2329 = vmatpush2.bf16.msra.mxu1 %v8527_v46  ;;  %v646_v33 = vrot.slane %v9975_v50, %v9957_v13 }
 0x1dd   : > { %2289 = vmatprep.subr.bf16.mxu0 %v8442_v37  ;;  %2330 = vmatprep.subr.bf16.mxu1 %v8535_v47  ;;  %v650_v37 = vrot.slane %v9975_v50, %v9961_v15 }
 0x1e0   : > { %2290 = vmatpush2.bf16.msra.mxu0 %v8440_v38  ;;  %2331 = vmatpush2.bf16.msra.mxu1 %v8533_v48 }
 0x1e1   : > { %2341 = vmatprep.subr.bf16.mxu0 %v8448_v41  ;;  %2382 = vmatprep.subr.bf16.mxu1 %v8541_v49  ;;  %v8530_v41 = vld [vmem:[#allocation7 + $0x528] ss:$16 sps:$4 sm:$0xff]  }
 0x223   : > { %v1329_v53 = vpop.f32.mrf.mxu0  ;;  %v1370_v54 = vpop.f32.mrf.mxu1 }
 0x224   : > { %v1330_v55 = vadd.f32 %v1329_v53, %v638_v51 }
 0x225   : > { %v1331_v43 = vpop.f32.mrf.mxu0  ;;  %v1372_v56 = vpop.f32.mrf.mxu1 }
 0x226   : > { %v1371_v36 = vadd.f32 %v1370_v54, %v1330_v55  ;;  %v1332_v57 = vadd.f32 %v1331_v43, %v642_v52  ;;  %v8536_v52 = vld [vmem:[#allocation7 + $0x508] ss:$16 sps:$4 sm:$0xff]  }
 0x227   : > { %v1333_v58 = vpop.f32.mrf.mxu0  ;;  %v1374_v59 = vpop.f32.mrf.mxu1 }
 0x228   : > { %v1373_v60 = vadd.f32 %v1372_v56, %v1332_v57  ;;  %v1459_v61 = vmax.f32 %v1371_v36, 0.0  ;;  %v8539_v56 = vld [vmem:[#allocation7 + $0x6e8] ss:$16 sps:$4 sm:$0xff]   ;;  %v8544_v57 = vld [vmem:[#allocation7 + $0x6cc] ss:$16 sps:$4 sm:$0xff]  }
 0x229   : > { %v1334_v62 = vpop.f32.mrf.mxu0  ;;  %v1375_v63 = vpop.f32.mrf.mxu1  ;;  %v8542_v58 = vld [vmem:[#allocation7 + $0x6c8] ss:$16 sps:$4 sm:$0xff]   ;;  %v8547_v59 = vld [vmem:[#allocation7 + $0x6ac] ss:$16 sps:$4 sm:$0xff]  }
 0x22a   : > { %v1460_v0 = vmax.f32 %v1373_v60, 0.0  ;;  %v9981_v3 = vpack.c.bf16 %v1459_v61, %v1459_v61  ;;  %v8545_v60 = vld [vmem:[#allocation7 + $0x6a8] ss:$16 sps:$4 sm:$0xff]   ;;  %v8550_v61 = vld [vmem:[#allocation7 + $0x68c] ss:$16 sps:$4 sm:$0xff]  }
 0x22b   : > { %v8587_v62 = vld [vmem:[#allocation7 + $0x8e0] ss:$16 sps:$4 sm:$0xff]   ;;  %v8589_v63 = vld [vmem:[#allocation7 + $0x8e4] ss:$16 sps:$4 sm:$0xff]  }
 0x22c   : > { %v1464_v1 = vpack.c.bf16 %v1460_v0, %v1460_v0  ;;  %v8592_v0 = vld [vmem:[#allocation7 + $0x8c4] ss:$16 sps:$4 sm:$0xff]  }
 0x22e   : > { %2291 = vmatprep.mubr.bf16.mxu0 %v1464_v1 }
 0x22f   : > { %2292 = vmatmul.mubr.bf16.vlgmr.msra.gmra.mxu0 %v9981_v3 }
 0x230   : > { %2342 = vmatpush1.bf16.msra.mxu0 %v8446_v2  ;;  %2373 = vmatprep.mubr.bf16.mxu0 %v1464_v1  ;;  %v8548_v1 = vld [vmem:[#allocation7 + $0x688] ss:$16 sps:$4 sm:$0xff]   ;;  %v8590_v2 = vld [vmem:[#allocation7 + $0x8c0] ss:$16 sps:$4 sm:$0xff]  }
 0x231   : > { %2343 = vmatprep.subr.bf16.mxu0 %v8454_v4  ;;  %v8553_v4 = vld [vmem:[#allocation7 + $0x66c] ss:$16 sps:$4 sm:$0xff]  }
 0x234   : > { %2344 = vmatpush1.bf16.msra.mxu0 %v8452_v5  ;;  %v8551_v5 = vld [vmem:[#allocation7 + $0x668] ss:$16 sps:$4 sm:$0xff]  }
 0x235   : > { %2345 = vmatprep.subr.bf16.mxu0 %v8460_v6  ;;  %v8593_v6 = vld [vmem:[#allocation7 + $0x8a0] ss:$16 sps:$4 sm:$0xff]  }
 0x238   : > { %2346 = vmatpush1.bf16.msra.mxu0 %v8458_v7  ;;  %v8556_v7 = vld [vmem:[#allocation7 + $0x64c] ss:$16 sps:$4 sm:$0xff]  }
 0x239   : > { %2347 = vmatprep.subr.bf16.mxu0 %v8466_v8  ;;  %v8598_v8 = vld [vmem:[#allocation7 + $0x884] ss:$16 sps:$4 sm:$0xff]  }
 0x23c   : > { %2348 = vmatpush1.bf16.msra.mxu0 %v8464_v9  ;;  %v8554_v9 = vld [vmem:[#allocation7 + $0x648] ss:$16 sps:$4 sm:$0xff]  }
 0x23d   : > { %2349 = vmatprep.subr.bf16.mxu0 %v8472_v10  ;;  %v8596_v10 = vld [vmem:[#allocation7 + $0x880] ss:$16 sps:$4 sm:$0xff]  }
 0x240   : > { %2350 = vmatpush1.bf16.msra.mxu0 %v8470_v11  ;;  %v8559_v11 = vld [vmem:[#allocation7 + $0x62c] ss:$16 sps:$4 sm:$0xff]  }
 0x241   : > { %2351 = vmatprep.subr.bf16.mxu0 %v8478_v16  ;;  %v8601_v16 = vld [vmem:[#allocation7 + $0x864] ss:$16 sps:$4 sm:$0xff]  }
 0x244   : > { %2352 = vmatpush1.bf16.msra.mxu0 %v8476_v17  ;;  %v8557_v17 = vld [vmem:[#allocation7 + $0x628] ss:$16 sps:$4 sm:$0xff]  }
 0x245   : > { %2353 = vmatprep.subr.bf16.mxu0 %v8484_v18  ;;  %v8599_v18 = vld [vmem:[#allocation7 + $0x860] ss:$16 sps:$4 sm:$0xff]  }
 0x248   : > { %2354 = vmatpush1.bf16.msra.mxu0 %v8482_v19  ;;  %v8562_v19 = vld [vmem:[#allocation7 + $0x60c] ss:$16 sps:$4 sm:$0xff]  }
 0x249   : > { %2355 = vmatprep.subr.bf16.mxu0 %v8490_v20  ;;  %v8604_v20 = vld [vmem:[#allocation7 + $0x844] ss:$16 sps:$4 sm:$0xff]  }
 0x24c   : > { %2356 = vmatpush1.bf16.msra.mxu0 %v8488_v21  ;;  %v8560_v21 = vld [vmem:[#allocation7 + $0x608] ss:$16 sps:$4 sm:$0xff]  }
 0x24d   : > { %2357 = vmatprep.subr.bf16.mxu0 %v8496_v22  ;;  %v8602_v22 = vld [vmem:[#allocation7 + $0x840] ss:$16 sps:$4 sm:$0xff]  }
 0x250   : > { %2358 = vmatpush2.bf16.msra.mxu0 %v8494_v23  ;;  %v8565_v23 = vld [vmem:[#allocation7 + $0x7ec] ss:$16 sps:$4 sm:$0xff]  }
 0x251   : > { %2359 = vmatprep.subr.bf16.mxu0 %v8502_v24  ;;  %v8607_v24 = vld [vmem:[#allocation7 + $0x824] ss:$16 sps:$4 sm:$0xff]  }
 0x254   : > { %2360 = vmatpush2.bf16.msra.mxu0 %v8500_v25  ;;  %v8563_v25 = vld [vmem:[#allocation7 + $0x7e8] ss:$16 sps:$4 sm:$0xff]  }
 0x255   : > { %2361 = vmatprep.subr.bf16.mxu0 %v8508_v26  ;;  %v8605_v26 = vld [vmem:[#allocation7 + $0x820] ss:$16 sps:$4 sm:$0xff]  }
 0x258   : > { %2362 = vmatpush2.bf16.msra.mxu0 %v8506_v27  ;;  %v8568_v27 = vld [vmem:[#allocation7 + $0x7cc] ss:$16 sps:$4 sm:$0xff]  }
 0x259   : > { %2363 = vmatprep.subr.bf16.mxu0 %v8514_v28  ;;  %v8610_v28 = vld [vmem:[#allocation7 + $0x804] ss:$16 sps:$4 sm:$0xff]  }
 0x25c   : > { %2364 = vmatpush2.bf16.msra.mxu0 %v8512_v29  ;;  %v8566_v29 = vld [vmem:[#allocation7 + $0x7c8] ss:$16 sps:$4 sm:$0xff]  }
 0x25d   : > { %2365 = vmatprep.subr.bf16.mxu0 %v8520_v30  ;;  %v8608_v30 = vld [vmem:[#allocation7 + $0x800] ss:$16 sps:$4 sm:$0xff]  }
 0x260   : > { %2366 = vmatpush2.bf16.msra.mxu0 %v8518_v31  ;;  %v8571_v31 = vld [vmem:[#allocation7 + $0x7ac] ss:$16 sps:$4 sm:$0xff]  }
 0x261   : > { %2367 = vmatprep.subr.bf16.mxu0 %v8526_v32  ;;  %v8613_v32 = vld [vmem:[#allocation7 + $0x9e4] ss:$16 sps:$4 sm:$0xff]  }
 0x263   : > { %v1411_v38 = vpop.f32.mrf.mxu0  ;;  %v1452_v39 = vpop.f32.mrf.mxu1 }
 0x264   : > { %v1412_v40 = vadd.f32 %v1411_v38, %v646_v33  ;;  %2368 = vmatpush2.bf16.msra.mxu0 %v8524_v34  ;;  %v8569_v33 = vld [vmem:[#allocation7 + $0x7a8] ss:$16 sps:$4 sm:$0xff]   ;;  %v8611_v34 = vld [vmem:[#allocation7 + $0x9e0] ss:$16 sps:$4 sm:$0xff]  }
 0x265   : > { %v1413_v42 = vpop.f32.mrf.mxu0  ;;  %v1454_v44 = vpop.f32.mrf.mxu1  ;;  %2369 = vmatprep.subr.bf16.mxu0 %v8532_v35  ;;  %v8574_v35 = vld [vmem:[#allocation7 + $0x78c] ss:$16 sps:$4 sm:$0xff]   ;;  %v8572_v38 = vld [vmem:[#allocation7 + $0x788] ss:$16 sps:$4 sm:$0xff]  }
 0x266   : > { %v1453_v46 = vadd.f32 %v1452_v39, %v1412_v40  ;;  %v1414_v47 = vadd.f32 %v1413_v42, %v650_v37  ;;  %v8616_v37 = vld [vmem:[#allocation7 + $0x9c4] ss:$16 sps:$4 sm:$0xff]   ;;  %v8614_v39 = vld [vmem:[#allocation7 + $0x9c0] ss:$16 sps:$4 sm:$0xff]   ;;  %v8577_v40 = vld [vmem:[#allocation7 + $0x76c] ss:$16 sps:$4 sm:$0xff]  }
 0x267   : > { %v1415_v48 = vpop.f32.mrf.mxu0  ;;  %v1456_v49 = vpop.f32.mrf.mxu1  ;;  %v8575_v42 = vld [vmem:[#allocation7 + $0x768] ss:$16 sps:$4 sm:$0xff]  }
 0x268   : > { %v1455_v51 = vadd.f32 %v1454_v44, %v1414_v47  ;;  %2370 = vmatpush2.bf16.msra.mxu0 %v8530_v41  ;;  %v1461_v53 = vmax.f32 %v1453_v46, 0.0  ;;  %v8619_v41 = vld [vmem:[#allocation7 + $0x9a4] ss:$16 sps:$4 sm:$0xff]   ;;  %v8617_v44 = vld [vmem:[#allocation7 + $0x9a0] ss:$16 sps:$4 sm:$0xff]  }
 0x269   : > { %v1416_v54 = vpop.f32.mrf.mxu0  ;;  %v1457_v55 = vpop.f32.mrf.mxu1  ;;  %2371 = vmatprep.subr.bf16.mxu0 %v8538_v45  ;;  %v8580_v45 = vld [vmem:[#allocation7 + $0x74c] ss:$16 sps:$4 sm:$0xff]   ;;  %v8622_v46 = vld [vmem:[#allocation7 + $0x984] ss:$16 sps:$4 sm:$0xff]   ;;  %v8578_v47 = vld [vmem:[#allocation7 + $0x748] ss:$16 sps:$4 sm:$0xff]  }
 0x26a   : > { %v1462_v50 = vmax.f32 %v1455_v51, 0.0  ;;  %v9988_v36 = vpack.c.bf16 %v1461_v53, %v1461_v53  ;;  %v8620_v48 = vld [vmem:[#allocation7 + $0x980] ss:$16 sps:$4 sm:$0xff]   ;;  %v8583_v49 = vld [vmem:[#allocation7 + $0x72c] ss:$16 sps:$4 sm:$0xff]  }
 0x26b   : > { %v8625_v51 = vld [vmem:[#allocation7 + $0x964] ss:$16 sps:$4 sm:$0xff]   ;;  %v8623_v53 = vld [vmem:[#allocation7 + $0x960] ss:$16 sps:$4 sm:$0xff]   ;;  %v8586_v54 = vld [vmem:[#allocation7 + $0x70c] ss:$16 sps:$4 sm:$0xff]  }
 0x26c   : > { %v1466_v43 = vpack.c.bf16 %v1462_v50, %v1462_v50  ;;  %2372 = vmatpush2.bf16.msra.mxu0 %v8536_v52  ;;  %v8581_v52 = vld [vmem:[#allocation7 + $0x728] ss:$16 sps:$4 sm:$0xff]   ;;  %v8628_v55 = vld [vmem:[#allocation7 + $0x944] ss:$16 sps:$4 sm:$0xff]  }
 0x26d   : > { %3223 = vmatprep.subr.bf16.mxu0 %v8589_v63  ;;  %v8584_v50 = vld [vmem:[#allocation7 + $0x708] ss:$16 sps:$4 sm:$0xff]   ;;  %v8641_v63 = vld [vmem:[#allocation7 + $0xac0] ss:$16 sps:$4 sm:$0xff]  }
 0x26e   : > { %2332 = vmatprep.mubr.bf16.mxu1 %v1466_v43 }
 0x26f   : > { %2333 = vmatmul.mubr.bf16.vlgmr.msra.gmra.mxu1 %v9988_v36  ;;  %2374 = vmatmul.mubr.bf16.vlgmr.msra.gmra.mxu0 %v9981_v3  ;;  %v8595_v3 = vld [vmem:[#allocation7 + $0x8a4] ss:$16 sps:$4 sm:$0xff]  }
 0x270   : > { %2383 = vmatpush1.bf16.msra.mxu1 %v8539_v56  ;;  %2414 = vmatprep.mubr.bf16.mxu1 %v1466_v43  ;;  %v8626_v43 = vld [vmem:[#allocation7 + $0x940] ss:$16 sps:$4 sm:$0xff]   ;;  %v8631_v56 = vld [vmem:[#allocation7 + $0x924] ss:$16 sps:$4 sm:$0xff]  }
 0x271   : > { %2384 = vmatprep.subr.bf16.mxu1 %v8544_v57  ;;  %3224 = vmatpush1.bf16.msra.mxu0 %v8587_v62  ;;  %v8629_v57 = vld [vmem:[#allocation7 + $0x920] ss:$16 sps:$4 sm:$0xff]   ;;  %v8640_v62 = vld [vmem:[#allocation7 + $0x8ec] ss:$16 sps:$4 sm:$0xff]  }
 0x272   : > { %3225 = vmatprep.subr.bf16.mxu0 %v8592_v0  ;;  %v8643_v0 = vld [vmem:[#allocation7 + $0xac4] ss:$16 sps:$4 sm:$0xff]  }
 0x274   : > { %2385 = vmatpush1.bf16.msra.mxu1 %v8542_v58  ;;  %v8634_v58 = vld [vmem:[#allocation7 + $0x904] ss:$16 sps:$4 sm:$0xff]  }
 0x275   : > { %2386 = vmatprep.subr.bf16.mxu1 %v8547_v59  ;;  %3226 = vmatpush1.bf16.msra.mxu0 %v8590_v2  ;;  %v8632_v59 = vld [vmem:[#allocation7 + $0x900] ss:$16 sps:$4 sm:$0xff]  }
 0x276   : > { %3227 = vmatprep.subr.bf16.mxu0 %v8595_v3  ;;  %v8653_v2 = vld [vmem:[#allocation7 + $0xa80] ss:$16 sps:$4 sm:$0xff]  }
 0x277   : > { %v8659_v3 = vld [vmem:[#allocation7 + $0xa60] ss:$16 sps:$4 sm:$0xff]  }
 0x278   : > { %2387 = vmatpush1.bf16.msra.mxu1 %v8545_v60  ;;  %v8635_v60 = vld [vmem:[#allocation7 + $0xae0] ss:$16 sps:$4 sm:$0xff]  }
 0x279   : > { %2388 = vmatprep.subr.bf16.mxu1 %v8550_v61  ;;  %3228 = vmatpush1.bf16.msra.mxu0 %v8593_v6  ;;  %v8637_v61 = vld [vmem:[#allocation7 + $0xae4] ss:$16 sps:$4 sm:$0xff]   ;;  %v8665_v6 = vld [vmem:[#allocation7 + $0xa40] ss:$16 sps:$4 sm:$0xff]  }
 0x27a   : > { %3229 = vmatprep.subr.bf16.mxu0 %v8598_v8  ;;  %v8671_v8 = vld [vmem:[#allocation7 + $0xa20] ss:$16 sps:$4 sm:$0xff]  }
 0x27c   : > { %2389 = vmatpush1.bf16.msra.mxu1 %v8548_v1  ;;  %v8647_v1 = vld [vmem:[#allocation7 + $0xaa0] ss:$16 sps:$4 sm:$0xff]  }
 0x27d   : > { %2390 = vmatprep.subr.bf16.mxu1 %v8553_v4  ;;  %3230 = vmatpush1.bf16.msra.mxu0 %v8596_v10  ;;  %v8655_v4 = vld [vmem:[#allocation7 + $0xa84] ss:$16 sps:$4 sm:$0xff]   ;;  %v8677_v10 = vld [vmem:[#allocation7 + $0xa00] ss:$16 sps:$4 sm:$0xff]  }
 0x27e   : > { %3231 = vmatprep.subr.bf16.mxu0 %v8601_v16  ;;  %v8683_v16 = vld [vmem:[#allocation7 + $0xbe0] ss:$16 sps:$4 sm:$0xff]  }
 0x280   : > { %2391 = vmatpush1.bf16.msra.mxu1 %v8551_v5  ;;  %v8661_v5 = vld [vmem:[#allocation7 + $0xa64] ss:$16 sps:$4 sm:$0xff]  }
 0x281   : > { %2392 = vmatprep.subr.bf16.mxu1 %v8556_v7  ;;  %3232 = vmatpush1.bf16.msra.mxu0 %v8599_v18  ;;  %v8667_v7 = vld [vmem:[#allocation7 + $0xa44] ss:$16 sps:$4 sm:$0xff]   ;;  %v8689_v18 = vld [vmem:[#allocation7 + $0xbc0] ss:$16 sps:$4 sm:$0xff]  }
 0x282   : > { %3233 = vmatprep.subr.bf16.mxu0 %v8604_v20  ;;  %v8695_v20 = vld [vmem:[#allocation7 + $0xba0] ss:$16 sps:$4 sm:$0xff]  }
 0x284   : > { %2393 = vmatpush1.bf16.msra.mxu1 %v8554_v9  ;;  %v8673_v9 = vld [vmem:[#allocation7 + $0xa24] ss:$16 sps:$4 sm:$0xff]  }
 0x285   : > { %2394 = vmatprep.subr.bf16.mxu1 %v8559_v11  ;;  %3234 = vmatpush1.bf16.msra.mxu0 %v8602_v22  ;;  %v8679_v11 = vld [vmem:[#allocation7 + $0xa04] ss:$16 sps:$4 sm:$0xff]   ;;  %v8701_v22 = vld [vmem:[#allocation7 + $0xb80] ss:$16 sps:$4 sm:$0xff]  }
 0x286   : > { %3235 = vmatprep.subr.bf16.mxu0 %v8607_v24  ;;  %v8707_v24 = vld [vmem:[#allocation7 + $0xb60] ss:$16 sps:$4 sm:$0xff]  }
 0x288   : > { %2395 = vmatpush1.bf16.msra.mxu1 %v8557_v17  ;;  %v8685_v17 = vld [vmem:[#allocation7 + $0xbe4] ss:$16 sps:$4 sm:$0xff]  }
 0x289   : > { %2396 = vmatprep.subr.bf16.mxu1 %v8562_v19  ;;  %3236 = vmatpush1.bf16.msra.mxu0 %v8605_v26  ;;  %v8691_v19 = vld [vmem:[#allocation7 + $0xbc4] ss:$16 sps:$4 sm:$0xff]   ;;  %v8713_v26 = vld [vmem:[#allocation7 + $0xb40] ss:$16 sps:$4 sm:$0xff]  }
 0x28a   : > { %3237 = vmatprep.subr.bf16.mxu0 %v8610_v28  ;;  %v8721_v28 = vld [vmem:[#allocation7 + $0xb24] ss:$16 sps:$4 sm:$0xff]  }
 0x28c   : > { %2397 = vmatpush1.bf16.msra.mxu1 %v8560_v21  ;;  %v8697_v21 = vld [vmem:[#allocation7 + $0xba4] ss:$16 sps:$4 sm:$0xff]  }
 0x28d   : > { %2398 = vmatprep.subr.bf16.mxu1 %v8565_v23  ;;  %3238 = vmatpush1.bf16.msra.mxu0 %v8608_v30  ;;  %v8703_v23 = vld [vmem:[#allocation7 + $0xb84] ss:$16 sps:$4 sm:$0xff]   ;;  %v8719_v30 = vld [vmem:[#allocation7 + $0xb20] ss:$16 sps:$4 sm:$0xff]  }
 0x28e   : > { %3239 = vmatprep.subr.bf16.mxu0 %v8613_v32  ;;  %v8727_v32 = vld [vmem:[#allocation7 + $0xb04] ss:$16 sps:$4 sm:$0xff]  }
 0x290   : > { %2399 = vmatpush2.bf16.msra.mxu1 %v8563_v25  ;;  %v8709_v25 = vld [vmem:[#allocation7 + $0xb64] ss:$16 sps:$4 sm:$0xff]  }
 0x291   : > { %2400 = vmatprep.subr.bf16.mxu1 %v8568_v27  ;;  %3240 = vmatpush2.bf16.msra.mxu0 %v8611_v34  ;;  %v8715_v27 = vld [vmem:[#allocation7 + $0xb44] ss:$16 sps:$4 sm:$0xff]   ;;  %v8725_v34 = vld [vmem:[#allocation7 + $0xb00] ss:$16 sps:$4 sm:$0xff]  }
 0x292   : > { %3241 = vmatprep.subr.bf16.mxu0 %v8616_v37  ;;  %v8733_v37 = vld [vmem:[#allocation7 + $0xaec] ss:$16 sps:$4 sm:$0xff]  }
 0x294   : > { %2401 = vmatpush2.bf16.msra.mxu1 %v8566_v29 }
 0x295   : > { %2402 = vmatprep.subr.bf16.mxu1 %v8571_v31  ;;  %3242 = vmatpush2.bf16.msra.mxu0 %v8614_v39 }
 0x296   : > { %3243 = vmatprep.subr.bf16.mxu0 %v8619_v41 }
 0x298   : > { %2403 = vmatpush2.bf16.msra.mxu1 %v8569_v33 }
 0x299   : > { %2404 = vmatprep.subr.bf16.mxu1 %v8574_v35  ;;  %3244 = vmatpush2.bf16.msra.mxu0 %v8617_v44 }
 0x29a   : > { %3245 = vmatprep.subr.bf16.mxu0 %v8622_v46 }
 0x29c   : > { %2405 = vmatpush2.bf16.msra.mxu1 %v8572_v38  ;;  %v9993_v38 = vld [vmem:[#allocation8 + $0x8] sm:$0xf] }
 0x29d   : > { %2406 = vmatprep.subr.bf16.mxu1 %v8577_v40  ;;  %3246 = vmatpush2.bf16.msra.mxu0 %v8620_v48  ;;  %v1602_v39 = vrot.slane %v9993_v38, %v9955_v12  ;;  %v1606_v40 = vrot.slane %v9993_v38, %v9959_v14 }
 0x29e   : > { %3247 = vmatprep.subr.bf16.mxu0 %v8625_v51 }
 0x2a0   : > { %2407 = vmatpush2.bf16.msra.mxu1 %v8575_v42 }
 0x2a1   : > { %2408 = vmatprep.subr.bf16.mxu1 %v8580_v45  ;;  %3248 = vmatpush2.bf16.msra.mxu0 %v8623_v53 }
 0x2a2   : > { %3249 = vmatprep.subr.bf16.mxu0 %v8628_v55 }
 0x2a4   : > { %2409 = vmatpush2.bf16.msra.mxu1 %v8578_v47 }
 0x2a5   : > { %2410 = vmatprep.subr.bf16.mxu1 %v8583_v49  ;;  %3250 = vmatpush2.bf16.msra.mxu0 %v8626_v43 }
 0x2a6   : > { %3251 = vmatprep.subr.bf16.mxu0 %v8631_v56  ;;  %v8638_v56 = vld [vmem:[#allocation7 + $0x8e8] ss:$16 sps:$4 sm:$0xff]  }
 0x2a8   : > { %2411 = vmatpush2.bf16.msra.mxu1 %v8581_v52 }
 0x2a9   : > { %2412 = vmatprep.subr.bf16.mxu1 %v8586_v54  ;;  %3252 = vmatpush2.bf16.msra.mxu0 %v8629_v57 }
 0x2aa   : > { %3253 = vmatprep.subr.bf16.mxu0 %v8634_v58  ;;  %v8646_v58 = vld [vmem:[#allocation7 + $0x8cc] ss:$16 sps:$4 sm:$0xff]  }
 0x2ac   : > { %2413 = vmatpush2.bf16.msra.mxu1 %v8584_v50 }
 0x2ad   : > { %3254 = vmatpush2.bf16.msra.mxu0 %v8632_v59  ;;  %3264 = vmatprep.subr.bf16.mxu1 %v8637_v61  ;;  %v8644_v59 = vld [vmem:[#allocation7 + $0x8c8] ss:$16 sps:$4 sm:$0xff]  }
 0x2ae   : > { %3305 = vmatprep.subr.bf16.mxu0 %v8640_v62  ;;  %v8650_v61 = vld [vmem:[#allocation7 + $0x8a8] ss:$16 sps:$4 sm:$0xff]   ;;  %v8658_v62 = vld [vmem:[#allocation7 + $0x88c] ss:$16 sps:$4 sm:$0xff]  }
 0x2af   : > { %2415 = vmatmul.mubr.bf16.vlgmr.msra.gmra.mxu1 %v9988_v36  ;;  %v8649_v36 = vld [vmem:[#allocation7 + $0xaa4] ss:$16 sps:$4 sm:$0xff]  }
 0x2b0   : > { %3265 = vmatpush1.bf16.msra.mxu1 %v8635_v60  ;;  %v8652_v60 = vld [vmem:[#allocation7 + $0x8ac] ss:$16 sps:$4 sm:$0xff]  }
 0x2b1   : > { %3266 = vmatprep.subr.bf16.mxu1 %v8643_v0  ;;  %v8664_v0 = vld [vmem:[#allocation7 + $0x86c] ss:$16 sps:$4 sm:$0xff]  }
 0x2b4   : > { %3267 = vmatpush1.bf16.msra.mxu1 %v8641_v63  ;;  %v8656_v63 = vld [vmem:[#allocation7 + $0x888] ss:$16 sps:$4 sm:$0xff]  }
 0x2b5   : > { %3268 = vmatprep.subr.bf16.mxu1 %v8649_v36  ;;  %v8670_v36 = vld [vmem:[#allocation7 + $0x84c] ss:$16 sps:$4 sm:$0xff]  }
 0x2b8   : > { %3269 = vmatpush1.bf16.msra.mxu1 %v8647_v1  ;;  %v8662_v1 = vld [vmem:[#allocation7 + $0x868] ss:$16 sps:$4 sm:$0xff]  }
 0x2b9   : > { %3270 = vmatprep.subr.bf16.mxu1 %v8655_v4  ;;  %v8676_v4 = vld [vmem:[#allocation7 + $0x82c] ss:$16 sps:$4 sm:$0xff]  }
 0x2bc   : > { %3271 = vmatpush1.bf16.msra.mxu1 %v8653_v2  ;;  %v8668_v2 = vld [vmem:[#allocation7 + $0x848] ss:$16 sps:$4 sm:$0xff]  }
 0x2bd   : > { %3272 = vmatprep.subr.bf16.mxu1 %v8661_v5  ;;  %v8682_v5 = vld [vmem:[#allocation7 + $0x80c] ss:$16 sps:$4 sm:$0xff]  }
 0x2c0   : > { %3273 = vmatpush1.bf16.msra.mxu1 %v8659_v3  ;;  %v8674_v3 = vld [vmem:[#allocation7 + $0x828] ss:$16 sps:$4 sm:$0xff]  }
 0x2c1   : > { %3274 = vmatprep.subr.bf16.mxu1 %v8667_v7  ;;  %v8688_v7 = vld [vmem:[#allocation7 + $0x9ec] ss:$16 sps:$4 sm:$0xff]  }
 0x2c4   : > { %3275 = vmatpush1.bf16.msra.mxu1 %v8665_v6  ;;  %v8680_v6 = vld [vmem:[#allocation7 + $0x808] ss:$16 sps:$4 sm:$0xff]  }
 0x2c5   : > { %3276 = vmatprep.subr.bf16.mxu1 %v8673_v9  ;;  %v8694_v9 = vld [vmem:[#allocation7 + $0x9cc] ss:$16 sps:$4 sm:$0xff]  }
 0x2c8   : > { %3277 = vmatpush1.bf16.msra.mxu1 %v8671_v8  ;;  %v8686_v8 = vld [vmem:[#allocation7 + $0x9e8] ss:$16 sps:$4 sm:$0xff]  }
 0x2c9   : > { %3278 = vmatprep.subr.bf16.mxu1 %v8679_v11  ;;  %v8700_v11 = vld [vmem:[#allocation7 + $0x9ac] ss:$16 sps:$4 sm:$0xff]  }
 0x2cc   : > { %3279 = vmatpush1.bf16.msra.mxu1 %v8677_v10  ;;  %v8692_v10 = vld [vmem:[#allocation7 + $0x9c8] ss:$16 sps:$4 sm:$0xff]  }
 0x2cd   : > { %3280 = vmatprep.subr.bf16.mxu1 %v8685_v17  ;;  %v8706_v17 = vld [vmem:[#allocation7 + $0x98c] ss:$16 sps:$4 sm:$0xff]  }
 0x2d0   : > { %3281 = vmatpush2.bf16.msra.mxu1 %v8683_v16  ;;  %v8698_v16 = vld [vmem:[#allocation7 + $0x9a8] ss:$16 sps:$4 sm:$0xff]  }
 0x2d1   : > { %3282 = vmatprep.subr.bf16.mxu1 %v8691_v19  ;;  %v8712_v19 = vld [vmem:[#allocation7 + $0x96c] ss:$16 sps:$4 sm:$0xff]  }
 0x2d4   : > { %3283 = vmatpush2.bf16.msra.mxu1 %v8689_v18  ;;  %v8704_v18 = vld [vmem:[#allocation7 + $0x988] ss:$16 sps:$4 sm:$0xff]  }
 0x2d5   : > { %3284 = vmatprep.subr.bf16.mxu1 %v8697_v21  ;;  %v8718_v21 = vld [vmem:[#allocation7 + $0x94c] ss:$16 sps:$4 sm:$0xff]  }
 0x2d8   : > { %3285 = vmatpush2.bf16.msra.mxu1 %v8695_v20  ;;  %v8710_v20 = vld [vmem:[#allocation7 + $0x968] ss:$16 sps:$4 sm:$0xff]  }
 0x2d9   : > { %3286 = vmatprep.subr.bf16.mxu1 %v8703_v23  ;;  %v8716_v23 = vld [vmem:[#allocation7 + $0x948] ss:$16 sps:$4 sm:$0xff]  }
 0x2dc   : > { %3287 = vmatpush2.bf16.msra.mxu1 %v8701_v22  ;;  %v1610_v22 = vrot.slane %v9993_v38, %v9957_v13 }
 0x2dd   : > { %3288 = vmatprep.subr.bf16.mxu1 %v8709_v25  ;;  %v1614_v25 = vrot.slane %v9993_v38, %v9961_v15 }
 0x2e0   : > { %3289 = vmatpush2.bf16.msra.mxu1 %v8707_v24  ;;  %v8724_v24 = vld [vmem:[#allocation7 + $0x92c] ss:$16 sps:$4 sm:$0xff]  }
 0x2e1   : > { %3290 = vmatprep.subr.bf16.mxu1 %v8715_v27  ;;  %v8722_v27 = vld [vmem:[#allocation7 + $0x928] ss:$16 sps:$4 sm:$0xff]  }
 0x2e4   : > { %3291 = vmatpush2.bf16.msra.mxu1 %v8713_v26 }
 0x2e5   : > { %3292 = vmatprep.subr.bf16.mxu1 %v8721_v28 }
 0x2e8   : > { %3293 = vmatpush2.bf16.msra.mxu1 %v8719_v30 }
 0x2e9   : > { %3294 = vmatprep.subr.bf16.mxu1 %v8727_v32 }
 0x2ec   : > { %3295 = vmatpush2.bf16.msra.mxu1 %v8725_v34  ;;  %v8728_v34 = vld [vmem:[#allocation7 + $0x908] ss:$16 sps:$4 sm:$0xff]  }
 0x2ed   : > { %3346 = vmatprep.subr.bf16.mxu1 %v8733_v37 }
 0x2ef   : > { %v2293_v29 = vpop.f32.mrf.mxu0 }
 0x2f0   : > { %v2294_v41 = vadd.f32 %v2293_v29, %v1602_v39  ;;  %v8730_v29 = vld [vmem:[#allocation7 + $0x90c] ss:$16 sps:$4 sm:$0xff]  }
 0x2f1   : > { %v2295_v31 = vpop.f32.mrf.mxu0 }
 0x2f2   : > { %v2296_v45 = vadd.f32 %v2295_v31, %v1606_v40 }
 0x2f3   : > { %v2297_v33 = vpop.f32.mrf.mxu0 }
 0x2f5   : > { %v2298_v35 = vpop.f32.mrf.mxu0 }
 0x32f   : > { %v2334_v42 = vpop.f32.mrf.mxu1  ;;  %v9999_v44 = vpop.f32.mrf.mxu0 }
 0x330   : > { %v2335_v46 = vadd.f32 %v2334_v42, %v2294_v41  ;;  %v2376_v26 = vadd.f32 %v9999_v44, %v1610_v22  ;;  %v8731_v41 = vld [vmem:[#allocation7 + $0xae8] ss:$16 sps:$4 sm:$0xff]   ;;  %v8736_v44 = vld [vmem:[#allocation7 + $0xacc] ss:$16 sps:$4 sm:$0xff]  }
 0x331   : > { %v2336_v47 = vpop.f32.mrf.mxu1  ;;  %v10001_v48 = vpop.f32.mrf.mxu0  ;;  %v8764_v22 = vld [vmem:[#allocation7 + $0xb88] ss:$16 sps:$4 sm:$0xff]  }
 0x332   : > { %v2337_v49 = vadd.f32 %v2336_v47, %v2296_v45  ;;  %v2423_v51 = vmax.f32 %v2335_v46, 0.0  ;;  %v2378_v30 = vadd.f32 %v10001_v48, %v1614_v25  ;;  %v8734_v45 = vld [vmem:[#allocation7 + $0xac8] ss:$16 sps:$4 sm:$0xff]   ;;  %v8739_v46 = vld [vmem:[#allocation7 + $0xaac] ss:$16 sps:$4 sm:$0xff]  }
 0x333   : > { %v2338_v52 = vpop.f32.mrf.mxu1  ;;  %v2379_v53 = vpop.f32.mrf.mxu0  ;;  %v8737_v47 = vld [vmem:[#allocation7 + $0xaa8] ss:$16 sps:$4 sm:$0xff]   ;;  %v8742_v48 = vld [vmem:[#allocation7 + $0xa8c] ss:$16 sps:$4 sm:$0xff]   ;;  %v8811_v25 = vld [vmem:[%s9949_s9 + $0x1a4] ss:$16 sps:$4 sm:$0xff]  }
 0x334   : > { %v2424_v54 = vmax.f32 %v2337_v49, 0.0  ;;  %v10003_v57 = vpack.c.bf16 %v2423_v51, %v2423_v51  ;;  %v8779_v49 = vld [vmem:[%s9949_s9 + $0xe0] ss:$16 sps:$4 sm:$0xff]   ;;  %v8781_v51 = vld [vmem:[%s9949_s9 + $0xe4] ss:$16 sps:$4 sm:$0xff]  }
 0x335   : > { %v2339_v55 = vpop.f32.mrf.mxu1  ;;  %v2380_v50 = vpop.f32.mrf.mxu0  ;;  %v8784_v52 = vld [vmem:[%s9949_s9 + $0xc4] ss:$16 sps:$4 sm:$0xff]   ;;  %v8740_v53 = vld [vmem:[#allocation7 + $0xa88] ss:$16 sps:$4 sm:$0xff]  }
 0x336   : > { %v2428_v43 = vpack.c.bf16 %v2424_v54, %v2424_v54  ;;  %v8782_v54 = vld [vmem:[%s9949_s9 + $0xc0] ss:$16 sps:$4 sm:$0xff]   ;;  %v8745_v55 = vld [vmem:[#allocation7 + $0xa6c] ss:$16 sps:$4 sm:$0xff]   ;;  %v8787_v50 = vld [vmem:[%s9949_s9 + $0xa4] ss:$16 sps:$4 sm:$0xff]  }
 0x338   : > { %3255 = vmatprep.mubr.bf16.mxu0 %v2428_v43 }
 0x339   : > { %3256 = vmatmul.mubr.bf16.vlgmr.msra.gmra.mxu0 %v10003_v57 }
 0x33a   : > { %3306 = vmatpush1.bf16.msra.mxu0 %v8638_v56  ;;  %3337 = vmatprep.mubr.bf16.mxu0 %v2428_v43  ;;  %v8743_v43 = vld [vmem:[#allocation7 + $0xa68] ss:$16 sps:$4 sm:$0xff]   ;;  %v8785_v56 = vld [vmem:[%s9949_s9 + $0xa0] ss:$16 sps:$4 sm:$0xff]  }
 0x33b   : > { %3307 = vmatprep.subr.bf16.mxu0 %v8646_v58  ;;  %v8790_v58 = vld [vmem:[%s9949_s9 + $0x84] ss:$16 sps:$4 sm:$0xff]  }
 0x33e   : > { %3308 = vmatpush1.bf16.msra.mxu0 %v8644_v59  ;;  %v8746_v59 = vld [vmem:[#allocation7 + $0xa48] ss:$16 sps:$4 sm:$0xff]  }
 0x33f   : > { %3309 = vmatprep.subr.bf16.mxu0 %v8652_v60  ;;  %v8788_v60 = vld [vmem:[%s9949_s9 + $0x80] ss:$16 sps:$4 sm:$0xff]  }
 0x342   : > { %3310 = vmatpush1.bf16.msra.mxu0 %v8650_v61  ;;  %v8751_v61 = vld [vmem:[#allocation7 + $0xa2c] ss:$16 sps:$4 sm:$0xff]  }
 0x343   : > { %3311 = vmatprep.subr.bf16.mxu0 %v8658_v62  ;;  %v8793_v62 = vld [vmem:[%s9949_s9 + $0x64] ss:$16 sps:$4 sm:$0xff]  }
 0x346   : > { %3312 = vmatpush1.bf16.msra.mxu0 %v8656_v63  ;;  %v8749_v63 = vld [vmem:[#allocation7 + $0xa28] ss:$16 sps:$4 sm:$0xff]  }
 0x347   : > { %3313 = vmatprep.subr.bf16.mxu0 %v8664_v0  ;;  %v8791_v0 = vld [vmem:[%s9949_s9 + $0x60] ss:$16 sps:$4 sm:$0xff]  }
 0x34a   : > { %3314 = vmatpush1.bf16.msra.mxu0 %v8662_v1  ;;  %v8754_v1 = vld [vmem:[#allocation7 + $0xa0c] ss:$16 sps:$4 sm:$0xff]  }
 0x34b   : > { %3315 = vmatprep.subr.bf16.mxu0 %v8670_v36  ;;  %v8796_v36 = vld [vmem:[%s9949_s9 + $0x44] ss:$16 sps:$4 sm:$0xff]  }
 0x34e   : > { %3316 = vmatpush1.bf16.msra.mxu0 %v8668_v2  ;;  %v8752_v2 = vld [vmem:[#allocation7 + $0xa08] ss:$16 sps:$4 sm:$0xff]  }
 0x34f   : > { %3317 = vmatprep.subr.bf16.mxu0 %v8676_v4  ;;  %v8794_v4 = vld [vmem:[%s9949_s9 + $0x40] ss:$16 sps:$4 sm:$0xff]  }
 0x352   : > { %3318 = vmatpush1.bf16.msra.mxu0 %v8674_v3  ;;  %v8757_v3 = vld [vmem:[#allocation7 + $0xbec] ss:$16 sps:$4 sm:$0xff]  }
 0x353   : > { %3319 = vmatprep.subr.bf16.mxu0 %v8682_v5  ;;  %v8799_v5 = vld [vmem:[%s9949_s9 + $0x24] ss:$16 sps:$4 sm:$0xff]  }
 0x356   : > { %3320 = vmatpush1.bf16.msra.mxu0 %v8680_v6  ;;  %v8755_v6 = vld [vmem:[#allocation7 + $0xbe8] ss:$16 sps:$4 sm:$0xff]  }
 0x357   : > { %3321 = vmatprep.subr.bf16.mxu0 %v8688_v7  ;;  %v8797_v7 = vld [vmem:[%s9949_s9 + $0x20] ss:$16 sps:$4 sm:$0xff]  }
 0x35a   : > { %3322 = vmatpush2.bf16.msra.mxu0 %v8686_v8  ;;  %v8760_v8 = vld [vmem:[#allocation7 + $0xbcc] ss:$16 sps:$4 sm:$0xff]  }
 0x35b   : > { %3323 = vmatprep.subr.bf16.mxu0 %v8694_v9  ;;  %v8802_v9 = vld [vmem:[%s9949_s9 + $0x4] ss:$16 sps:$4 sm:$0xff]  }
 0x35e   : > { %3324 = vmatpush2.bf16.msra.mxu0 %v8692_v10  ;;  %v8758_v10 = vld [vmem:[#allocation7 + $0xbc8] ss:$16 sps:$4 sm:$0xff]  }
 0x35f   : > { %3325 = vmatprep.subr.bf16.mxu0 %v8700_v11  ;;  %v8800_v11 = vld [vmem:[%s9949_s9] ss:$16 sps:$4 sm:$0xff]  }
 0x362   : > { %3326 = vmatpush2.bf16.msra.mxu0 %v8698_v16  ;;  %v8763_v16 = vld [vmem:[#allocation7 + $0xbac] ss:$16 sps:$4 sm:$0xff]  }
 0x363   : > { %3327 = vmatprep.subr.bf16.mxu0 %v8706_v17  ;;  %v8805_v17 = vld [vmem:[%s9949_s9 + $0x1e4] ss:$16 sps:$4 sm:$0xff]  }
 0x366   : > { %3328 = vmatpush2.bf16.msra.mxu0 %v8704_v18  ;;  %v8761_v18 = vld [vmem:[#allocation7 + $0xba8] ss:$16 sps:$4 sm:$0xff]  }
 0x367   : > { %3329 = vmatprep.subr.bf16.mxu0 %v8712_v19  ;;  %v8803_v19 = vld [vmem:[%s9949_s9 + $0x1e0] ss:$16 sps:$4 sm:$0xff]  }
 0x36a   : > { %3330 = vmatpush2.bf16.msra.mxu0 %v8710_v20  ;;  %v8766_v20 = vld [vmem:[#allocation7 + $0xb8c] ss:$16 sps:$4 sm:$0xff]  }
 0x36b   : > { %3331 = vmatprep.subr.bf16.mxu0 %v8718_v21  ;;  %v8808_v21 = vld [vmem:[%s9949_s9 + $0x1c4] ss:$16 sps:$4 sm:$0xff]  }
 0x36e   : > { %3332 = vmatpush2.bf16.msra.mxu0 %v8716_v23  ;;  %v8806_v23 = vld [vmem:[%s9949_s9 + $0x1c0] ss:$16 sps:$4 sm:$0xff]  }
 0x36f   : > { %v2416_v28 = vpop.f32.mrf.mxu1  ;;  %3333 = vmatprep.subr.bf16.mxu0 %v8724_v24  ;;  %v8769_v24 = vld [vmem:[#allocation7 + $0xb6c] ss:$16 sps:$4 sm:$0xff]  }
 0x370   : > { %v2417_v31 = vadd.f32 %v2416_v28, %v2376_v26  ;;  %v8767_v26 = vld [vmem:[#allocation7 + $0xb68] ss:$16 sps:$4 sm:$0xff]   ;;  %v8772_v28 = vld [vmem:[#allocation7 + $0xb4c] ss:$16 sps:$4 sm:$0xff]  }
 0x371   : > { %v2418_v32 = vpop.f32.mrf.mxu1 }
 0x372   : > { %v2419_v33 = vadd.f32 %v2418_v32, %v2378_v30  ;;  %3334 = vmatpush2.bf16.msra.mxu0 %v8722_v27  ;;  %v2425_v35 = vmax.f32 %v2417_v31, 0.0  ;;  %v8809_v27 = vld [vmem:[%s9949_s9 + $0x1a0] ss:$16 sps:$4 sm:$0xff]   ;;  %v8770_v30 = vld [vmem:[#allocation7 + $0xb48] ss:$16 sps:$4 sm:$0xff]  }
 0x373   : > { %v2420_v37 = vpop.f32.mrf.mxu1  ;;  %3335 = vmatprep.subr.bf16.mxu0 %v8730_v29  ;;  %v8814_v29 = vld [vmem:[%s9949_s9 + $0x184] ss:$16 sps:$4 sm:$0xff]   ;;  %v8812_v31 = vld [vmem:[%s9949_s9 + $0x180] ss:$16 sps:$4 sm:$0xff]   ;;  %v8775_v32 = vld [vmem:[#allocation7 + $0xb2c] ss:$16 sps:$4 sm:$0xff]  }
 0x374   : > { %v2426_v39 = vmax.f32 %v2419_v33, 0.0  ;;  %v10012_v42 = vpack.c.bf16 %v2425_v35, %v2425_v35  ;;  %v8817_v33 = vld [vmem:[%s9949_s9 + $0x164] ss:$16 sps:$4 sm:$0xff]   ;;  %v8815_v35 = vld [vmem:[%s9949_s9 + $0x160] ss:$16 sps:$4 sm:$0xff]  }
 0x375   : > { %v2421_v40 = vpop.f32.mrf.mxu1  ;;  %v8778_v37 = vld [vmem:[#allocation7 + $0xb0c] ss:$16 sps:$4 sm:$0xff]  }
 0x376   : > { %v2430_v38 = vpack.c.bf16 %v2426_v39, %v2426_v39  ;;  %3336 = vmatpush2.bf16.msra.mxu0 %v8728_v34  ;;  %v8773_v34 = vld [vmem:[#allocation7 + $0xb28] ss:$16 sps:$4 sm:$0xff]   ;;  %v8820_v39 = vld [vmem:[%s9949_s9 + $0x144] ss:$16 sps:$4 sm:$0xff]  }
 0x377   : > { %4185 = vmatprep.subr.bf16.mxu0 %v8781_v51  ;;  %v8776_v40 = vld [vmem:[#allocation7 + $0xb08] ss:$16 sps:$4 sm:$0xff]   ;;  %v8835_v51 = vld [vmem:[%s9949_s9 + $0x2c4] ss:$16 sps:$4 sm:$0xff]  }
 0x378   : > { %3296 = vmatprep.mubr.bf16.mxu1 %v2430_v38 }
 0x379   : > { %3297 = vmatmul.mubr.bf16.vlgmr.msra.gmra.mxu1 %v10012_v42  ;;  %3338 = vmatmul.mubr.bf16.vlgmr.msra.gmra.mxu0 %v10003_v57  ;;  %v8748_v57 = vld [vmem:[#allocation7 + $0xa4c] ss:$16 sps:$4 sm:$0xff]  }
 0x37a   : > { %3347 = vmatpush1.bf16.msra.mxu1 %v8731_v41  ;;  %3378 = vmatprep.mubr.bf16.mxu1 %v2430_v38  ;;  %v8818_v38 = vld [vmem:[%s9949_s9 + $0x140] ss:$16 sps:$4 sm:$0xff]   ;;  %v8823_v41 = vld [vmem:[%s9949_s9 + $0x124] ss:$16 sps:$4 sm:$0xff]  }
 0x37b   : > { %3348 = vmatprep.subr.bf16.mxu1 %v8736_v44  ;;  %4186 = vmatpush1.bf16.msra.mxu0 %v8779_v49  ;;  %v8821_v44 = vld [vmem:[%s9949_s9 + $0x120] ss:$16 sps:$4 sm:$0xff]   ;;  %v8832_v49 = vld [vmem:[%s9949_s9 + $0xec] ss:$16 sps:$4 sm:$0xff]  }
 0x37c   : > { %4187 = vmatprep.subr.bf16.mxu0 %v8784_v52  ;;  %v8839_v52 = vld [vmem:[%s9949_s9 + $0x2a0] ss:$16 sps:$4 sm:$0xff]  }
 0x37e   : > { %3349 = vmatpush1.bf16.msra.mxu1 %v8734_v45  ;;  %v8826_v45 = vld [vmem:[%s9949_s9 + $0x104] ss:$16 sps:$4 sm:$0xff]  }
 0x37f   : > { %3350 = vmatprep.subr.bf16.mxu1 %v8739_v46  ;;  %4188 = vmatpush1.bf16.msra.mxu0 %v8782_v54  ;;  %v8824_v46 = vld [vmem:[%s9949_s9 + $0x100] ss:$16 sps:$4 sm:$0xff]  }
 0x380   : > { %4189 = vmatprep.subr.bf16.mxu0 %v8787_v50  ;;  %v8845_v54 = vld [vmem:[%s9949_s9 + $0x280] ss:$16 sps:$4 sm:$0xff]  }
 0x381   : > { %v8851_v50 = vld [vmem:[%s9949_s9 + $0x260] ss:$16 sps:$4 sm:$0xff]  }
 0x382   : > { %3351 = vmatpush1.bf16.msra.mxu1 %v8737_v47  ;;  %v8827_v47 = vld [vmem:[%s9949_s9 + $0x2e0] ss:$16 sps:$4 sm:$0xff]  }
 0x383   : > { %3352 = vmatprep.subr.bf16.mxu1 %v8742_v48  ;;  %4190 = vmatpush1.bf16.msra.mxu0 %v8785_v56  ;;  %v8829_v48 = vld [vmem:[%s9949_s9 + $0x2e4] ss:$16 sps:$4 sm:$0xff]   ;;  %v8857_v56 = vld [vmem:[%s9949_s9 + $0x240] ss:$16 sps:$4 sm:$0xff]  }
 0x384   : > { %4191 = vmatprep.subr.bf16.mxu0 %v8790_v58  ;;  %v8863_v58 = vld [vmem:[%s9949_s9 + $0x220] ss:$16 sps:$4 sm:$0xff]  }
 0x386   : > { %3353 = vmatpush1.bf16.msra.mxu1 %v8740_v53  ;;  %v8841_v53 = vld [vmem:[%s9949_s9 + $0x2a4] ss:$16 sps:$4 sm:$0xff]  }
 0x387   : > { %3354 = vmatprep.subr.bf16.mxu1 %v8745_v55  ;;  %4192 = vmatpush1.bf16.msra.mxu0 %v8788_v60  ;;  %v8847_v55 = vld [vmem:[%s9949_s9 + $0x284] ss:$16 sps:$4 sm:$0xff]   ;;  %v8869_v60 = vld [vmem:[%s9949_s9 + $0x200] ss:$16 sps:$4 sm:$0xff]  }
 0x388   : > { %4193 = vmatprep.subr.bf16.mxu0 %v8793_v62  ;;  %v8875_v62 = vld [vmem:[%s9949_s9 + $0x3e0] ss:$16 sps:$4 sm:$0xff]  }
 0x38a   : > { %3355 = vmatpush1.bf16.msra.mxu1 %v8743_v43  ;;  %v8853_v43 = vld [vmem:[%s9949_s9 + $0x264] ss:$16 sps:$4 sm:$0xff]  }
 0x38b   : > { %3356 = vmatprep.subr.bf16.mxu1 %v8748_v57  ;;  %4194 = vmatpush1.bf16.msra.mxu0 %v8791_v0  ;;  %v8859_v57 = vld [vmem:[%s9949_s9 + $0x244] ss:$16 sps:$4 sm:$0xff]   ;;  %v8881_v0 = vld [vmem:[%s9949_s9 + $0x3c0] ss:$16 sps:$4 sm:$0xff]  }
 0x38c   : > { %4195 = vmatprep.subr.bf16.mxu0 %v8796_v36  ;;  %v8887_v36 = vld [vmem:[%s9949_s9 + $0x3a0] ss:$16 sps:$4 sm:$0xff]  }
 0x38e   : > { %3357 = vmatpush1.bf16.msra.mxu1 %v8746_v59  ;;  %v8865_v59 = vld [vmem:[%s9949_s9 + $0x224] ss:$16 sps:$4 sm:$0xff]  }
 0x38f   : > { %3358 = vmatprep.subr.bf16.mxu1 %v8751_v61  ;;  %4196 = vmatpush1.bf16.msra.mxu0 %v8794_v4  ;;  %v8871_v61 = vld [vmem:[%s9949_s9 + $0x204] ss:$16 sps:$4 sm:$0xff]   ;;  %v8893_v4 = vld [vmem:[%s9949_s9 + $0x380] ss:$16 sps:$4 sm:$0xff]  }
 0x390   : > { %4197 = vmatprep.subr.bf16.mxu0 %v8799_v5  ;;  %v8899_v5 = vld [vmem:[%s9949_s9 + $0x360] ss:$16 sps:$4 sm:$0xff]  }
 0x392   : > { %3359 = vmatpush1.bf16.msra.mxu1 %v8749_v63  ;;  %v8877_v63 = vld [vmem:[%s9949_s9 + $0x3e4] ss:$16 sps:$4 sm:$0xff]  }
 0x393   : > { %3360 = vmatprep.subr.bf16.mxu1 %v8754_v1  ;;  %4198 = vmatpush1.bf16.msra.mxu0 %v8797_v7  ;;  %v8883_v1 = vld [vmem:[%s9949_s9 + $0x3c4] ss:$16 sps:$4 sm:$0xff]   ;;  %v8905_v7 = vld [vmem:[%s9949_s9 + $0x340] ss:$16 sps:$4 sm:$0xff]  }
 0x394   : > { %4199 = vmatprep.subr.bf16.mxu0 %v8802_v9  ;;  %v8913_v9 = vld [vmem:[%s9949_s9 + $0x324] ss:$16 sps:$4 sm:$0xff]  }
 0x396   : > { %3361 = vmatpush1.bf16.msra.mxu1 %v8752_v2  ;;  %v8889_v2 = vld [vmem:[%s9949_s9 + $0x3a4] ss:$16 sps:$4 sm:$0xff]  }
 0x397   : > { %3362 = vmatprep.subr.bf16.mxu1 %v8757_v3  ;;  %4200 = vmatpush1.bf16.msra.mxu0 %v8800_v11  ;;  %v8895_v3 = vld [vmem:[%s9949_s9 + $0x384] ss:$16 sps:$4 sm:$0xff]   ;;  %v8911_v11 = vld [vmem:[%s9949_s9 + $0x320] ss:$16 sps:$4 sm:$0xff]  }
 0x398   : > { %4201 = vmatprep.subr.bf16.mxu0 %v8805_v17  ;;  %v8919_v17 = vld [vmem:[%s9949_s9 + $0x304] ss:$16 sps:$4 sm:$0xff]  }
 0x39a   : > { %3363 = vmatpush2.bf16.msra.mxu1 %v8755_v6  ;;  %v8901_v6 = vld [vmem:[%s9949_s9 + $0x364] ss:$16 sps:$4 sm:$0xff]  }
 0x39b   : > { %3364 = vmatprep.subr.bf16.mxu1 %v8760_v8  ;;  %4202 = vmatpush2.bf16.msra.mxu0 %v8803_v19  ;;  %v8907_v8 = vld [vmem:[%s9949_s9 + $0x344] ss:$16 sps:$4 sm:$0xff]   ;;  %v8917_v19 = vld [vmem:[%s9949_s9 + $0x300] ss:$16 sps:$4 sm:$0xff]  }
 0x39c   : > { %4203 = vmatprep.subr.bf16.mxu0 %v8808_v21  ;;  %v8925_v21 = vld [vmem:[%s9949_s9 + $0x2ec] ss:$16 sps:$4 sm:$0xff]  }
 0x39e   : > { %3365 = vmatpush2.bf16.msra.mxu1 %v8758_v10 }
 0x39f   : > { %3366 = vmatprep.subr.bf16.mxu1 %v8763_v16  ;;  %4204 = vmatpush2.bf16.msra.mxu0 %v8806_v23 }
 0x3a0   : > { %4205 = vmatprep.subr.bf16.mxu0 %v8811_v25 }
 0x3a2   : > { %3367 = vmatpush2.bf16.msra.mxu1 %v8761_v18 }
 0x3a3   : > { %3368 = vmatprep.subr.bf16.mxu1 %v8766_v20  ;;  %4206 = vmatpush2.bf16.msra.mxu0 %v8809_v27 }
 0x3a4   : > { %4207 = vmatprep.subr.bf16.mxu0 %v8814_v29 }
 0x3a6   : > { %3369 = vmatpush2.bf16.msra.mxu1 %v8764_v22  ;;  %v10083_v22 = vld [vmem:[#allocation8 + $0xc] sm:$0xf] }
 0x3a7   : > { %3370 = vmatprep.subr.bf16.mxu1 %v8769_v24  ;;  %4208 = vmatpush2.bf16.msra.mxu0 %v8812_v31  ;;  %v2566_v23 = vrot.slane %v10083_v22, %v9955_v12  ;;  %v2570_v24 = vrot.slane %v10083_v22, %v9959_v14 }
 0x3a8   : > { %4209 = vmatprep.subr.bf16.mxu0 %v8817_v33 }
 0x3aa   : > { %3371 = vmatpush2.bf16.msra.mxu1 %v8767_v26 }
 0x3ab   : > { %3372 = vmatprep.subr.bf16.mxu1 %v8772_v28  ;;  %4210 = vmatpush2.bf16.msra.mxu0 %v8815_v35 }
 0x3ac   : > { %4211 = vmatprep.subr.bf16.mxu0 %v8820_v39 }
 0x3ae   : > { %3373 = vmatpush2.bf16.msra.mxu1 %v8770_v30 }
 0x3af   : > { %3374 = vmatprep.subr.bf16.mxu1 %v8775_v32  ;;  %4212 = vmatpush2.bf16.msra.mxu0 %v8818_v38 }
 0x3b0   : > { %4213 = vmatprep.subr.bf16.mxu0 %v8823_v41  ;;  %v8830_v41 = vld [vmem:[%s9949_s9 + $0xe8] ss:$16 sps:$4 sm:$0xff]  }
 0x3b2   : > { %3375 = vmatpush2.bf16.msra.mxu1 %v8773_v34 }
 0x3b3   : > { %3376 = vmatprep.subr.bf16.mxu1 %v8778_v37  ;;  %4214 = vmatpush2.bf16.msra.mxu0 %v8821_v44 }
 0x3b4   : > { %4215 = vmatprep.subr.bf16.mxu0 %v8826_v45  ;;  %v8838_v45 = vld [vmem:[%s9949_s9 + $0xcc] ss:$16 sps:$4 sm:$0xff]  }
 0x3b6   : > { %3377 = vmatpush2.bf16.msra.mxu1 %v8776_v40 }
 0x3b7   : > { %4216 = vmatpush2.bf16.msra.mxu0 %v8824_v46  ;;  %4226 = vmatprep.subr.bf16.mxu1 %v8829_v48  ;;  %v8836_v46 = vld [vmem:[%s9949_s9 + $0xc8] ss:$16 sps:$4 sm:$0xff]  }
 0x3b8   : > { %4267 = vmatprep.subr.bf16.mxu0 %v8832_v49  ;;  %v8842_v48 = vld [vmem:[%s9949_s9 + $0xa8] ss:$16 sps:$4 sm:$0xff]   ;;  %v8850_v49 = vld [vmem:[%s9949_s9 + $0x8c] ss:$16 sps:$4 sm:$0xff]  }
 0x3b9   : > { %3379 = vmatmul.mubr.bf16.vlgmr.msra.gmra.mxu1 %v10012_v42  ;;  %v8833_v42 = vld [vmem:[%s9949_s9 + $0x2c0] ss:$16 sps:$4 sm:$0xff]  }
 0x3ba   : > { %4227 = vmatpush1.bf16.msra.mxu1 %v8827_v47  ;;  %v8844_v47 = vld [vmem:[%s9949_s9 + $0xac] ss:$16 sps:$4 sm:$0xff]  }
 0x3bb   : > { %4228 = vmatprep.subr.bf16.mxu1 %v8835_v51  ;;  %v8856_v51 = vld [vmem:[%s9949_s9 + $0x6c] ss:$16 sps:$4 sm:$0xff]  }
 0x3be   : > { %4229 = vmatpush1.bf16.msra.mxu1 %v8833_v42  ;;  %v8848_v42 = vld [vmem:[%s9949_s9 + $0x88] ss:$16 sps:$4 sm:$0xff]  }
 0x3bf   : > { %4230 = vmatprep.subr.bf16.mxu1 %v8841_v53  ;;  %v8862_v53 = vld [vmem:[%s9949_s9 + $0x4c] ss:$16 sps:$4 sm:$0xff]  }
 0x3c2   : > { %4231 = vmatpush1.bf16.msra.mxu1 %v8839_v52  ;;  %v8854_v52 = vld [vmem:[%s9949_s9 + $0x68] ss:$16 sps:$4 sm:$0xff]  }
 0x3c3   : > { %4232 = vmatprep.subr.bf16.mxu1 %v8847_v55  ;;  %v8868_v55 = vld [vmem:[%s9949_s9 + $0x2c] ss:$16 sps:$4 sm:$0xff]  }
 0x3c6   : > { %4233 = vmatpush1.bf16.msra.mxu1 %v8845_v54  ;;  %v8860_v54 = vld [vmem:[%s9949_s9 + $0x48] ss:$16 sps:$4 sm:$0xff]  }
 0x3c7   : > { %4234 = vmatprep.subr.bf16.mxu1 %v8853_v43  ;;  %v8874_v43 = vld [vmem:[%s9949_s9 + $0xc] ss:$16 sps:$4 sm:$0xff]  }
 0x3ca   : > { %4235 = vmatpush1.bf16.msra.mxu1 %v8851_v50  ;;  %v8866_v50 = vld [vmem:[%s9949_s9 + $0x28] ss:$16 sps:$4 sm:$0xff]  }
 0x3cb   : > { %4236 = vmatprep.subr.bf16.mxu1 %v8859_v57  ;;  %v8880_v57 = vld [vmem:[%s9949_s9 + $0x1ec] ss:$16 sps:$4 sm:$0xff]  }
 0x3ce   : > { %4237 = vmatpush1.bf16.msra.mxu1 %v8857_v56  ;;  %v8872_v56 = vld [vmem:[%s9949_s9 + $0x8] ss:$16 sps:$4 sm:$0xff]  }
 0x3cf   : > { %4238 = vmatprep.subr.bf16.mxu1 %v8865_v59  ;;  %v8886_v59 = vld [vmem:[%s9949_s9 + $0x1cc] ss:$16 sps:$4 sm:$0xff]  }
 0x3d2   : > { %4239 = vmatpush1.bf16.msra.mxu1 %v8863_v58  ;;  %v8878_v58 = vld [vmem:[%s9949_s9 + $0x1e8] ss:$16 sps:$4 sm:$0xff]  }
 0x3d3   : > { %4240 = vmatprep.subr.bf16.mxu1 %v8871_v61  ;;  %v8892_v61 = vld [vmem:[%s9949_s9 + $0x1ac] ss:$16 sps:$4 sm:$0xff]  }
 0x3d6   : > { %4241 = vmatpush1.bf16.msra.mxu1 %v8869_v60  ;;  %v8884_v60 = vld [vmem:[%s9949_s9 + $0x1c8] ss:$16 sps:$4 sm:$0xff]  }
 0x3d7   : > { %4242 = vmatprep.subr.bf16.mxu1 %v8877_v63  ;;  %v8898_v63 = vld [vmem:[%s9949_s9 + $0x18c] ss:$16 sps:$4 sm:$0xff]  }
 0x3da   : > { %4243 = vmatpush2.bf16.msra.mxu1 %v8875_v62  ;;  %v8890_v62 = vld [vmem:[%s9949_s9 + $0x1a8] ss:$16 sps:$4 sm:$0xff]  }
 0x3db   : > { %4244 = vmatprep.subr.bf16.mxu1 %v8883_v1  ;;  %v8904_v1 = vld [vmem:[%s9949_s9 + $0x16c] ss:$16 sps:$4 sm:$0xff]  }
 0x3de   : > { %4245 = vmatpush2.bf16.msra.mxu1 %v8881_v0  ;;  %v8896_v0 = vld [vmem:[%s9949_s9 + $0x188] ss:$16 sps:$4 sm:$0xff]  }
 0x3df   : > { %4246 = vmatprep.subr.bf16.mxu1 %v8889_v2  ;;  %v8910_v2 = vld [vmem:[%s9949_s9 + $0x14c] ss:$16 sps:$4 sm:$0xff]  }
 0x3e2   : > { %4247 = vmatpush2.bf16.msra.mxu1 %v8887_v36  ;;  %v8902_v36 = vld [vmem:[%s9949_s9 + $0x168] ss:$16 sps:$4 sm:$0xff]  }
 0x3e3   : > { %4248 = vmatprep.subr.bf16.mxu1 %v8895_v3  ;;  %v8908_v3 = vld [vmem:[%s9949_s9 + $0x148] ss:$16 sps:$4 sm:$0xff]  }
 0x3e6   : > { %4249 = vmatpush2.bf16.msra.mxu1 %v8893_v4  ;;  %v2574_v4 = vrot.slane %v10083_v22, %v9957_v13 }
 0x3e7   : > { %4250 = vmatprep.subr.bf16.mxu1 %v8901_v6  ;;  %v2578_v6 = vrot.slane %v10083_v22, %v9961_v15 }
 0x3ea   : > { %4251 = vmatpush2.bf16.msra.mxu1 %v8899_v5  ;;  %v8916_v5 = vld [vmem:[%s9949_s9 + $0x12c] ss:$16 sps:$4 sm:$0xff]  }
 0x3eb   : > { %4252 = vmatprep.subr.bf16.mxu1 %v8907_v8  ;;  %v8914_v8 = vld [vmem:[%s9949_s9 + $0x128] ss:$16 sps:$4 sm:$0xff]  }
 0x3ee   : > { %4253 = vmatpush2.bf16.msra.mxu1 %v8905_v7 }
 0x3ef   : > { %4254 = vmatprep.subr.bf16.mxu1 %v8913_v9 }
 0x3f2   : > { %4255 = vmatpush2.bf16.msra.mxu1 %v8911_v11 }
 0x3f3   : > { %4256 = vmatprep.subr.bf16.mxu1 %v8919_v17 }
 0x3f6   : > { %4257 = vmatpush2.bf16.msra.mxu1 %v8917_v19  ;;  %v8920_v19 = vld [vmem:[%s9949_s9 + $0x108] ss:$16 sps:$4 sm:$0xff]  }
 0x3f7   : > { %4308 = vmatprep.subr.bf16.mxu1 %v8925_v21 }
 0x3f9   : > { %v3257_v10 = vpop.f32.mrf.mxu0 }
 0x3fa   : > { %v3258_v25 = vadd.f32 %v3257_v10, %v2566_v23  ;;  %v8922_v10 = vld [vmem:[%s9949_s9 + $0x10c] ss:$16 sps:$4 sm:$0xff]  }
 0x3fb   : > { %v3259_v16 = vpop.f32.mrf.mxu0 }
 0x3fc   : > { %v3260_v28 = vadd.f32 %v3259_v16, %v2570_v24 }
 0x3fd   : > { %v3261_v18 = vpop.f32.mrf.mxu0 }
 0x3ff   : > { %v3262_v20 = vpop.f32.mrf.mxu0 }
 0x439   : > { %v3298_v26 = vpop.f32.mrf.mxu1  ;;  %v10089_v27 = vpop.f32.mrf.mxu0 }
 0x43a   : > { %v3299_v29 = vadd.f32 %v3298_v26, %v3258_v25  ;;  %v3340_v7 = vadd.f32 %v10089_v27, %v2574_v4  ;;  %v8923_v25 = vld [vmem:[%s9949_s9 + $0x2e8] ss:$16 sps:$4 sm:$0xff]   ;;  %v8928_v27 = vld [vmem:[%s9949_s9 + $0x2cc] ss:$16 sps:$4 sm:$0xff]  }
 0x43b   : > { %v3300_v30 = vpop.f32.mrf.mxu1  ;;  %v10091_v31 = vpop.f32.mrf.mxu0  ;;  %v8956_v4 = vld [vmem:[%s9949_s9 + $0x388] ss:$16 sps:$4 sm:$0xff]  }
 0x43c   : > { %v3301_v32 = vadd.f32 %v3300_v30, %v3260_v28  ;;  %v3387_v33 = vmax.f32 %v3299_v29, 0.0  ;;  %v3342_v11 = vadd.f32 %v10091_v31, %v2578_v6  ;;  %v8926_v28 = vld [vmem:[%s9949_s9 + $0x2c8] ss:$16 sps:$4 sm:$0xff]   ;;  %v8931_v29 = vld [vmem:[%s9949_s9 + $0x2ac] ss:$16 sps:$4 sm:$0xff]  }
 0x43d   : > { %v3302_v34 = vpop.f32.mrf.mxu1  ;;  %v3343_v35 = vpop.f32.mrf.mxu0  ;;  %v8929_v30 = vld [vmem:[%s9949_s9 + $0x2a8] ss:$16 sps:$4 sm:$0xff]   ;;  %v8934_v31 = vld [vmem:[%s9949_s9 + $0x28c] ss:$16 sps:$4 sm:$0xff]   ;;  %v9003_v6 = vld [vmem:[%s9949_s9 + $0x5a4] ss:$16 sps:$4 sm:$0xff]  }
 0x43e   : > { %v3388_v37 = vmax.f32 %v3301_v32, 0.0  ;;  %v10094_v44 = vpack.c.bf16 %v3387_v33, %v3387_v33  ;;  %v8971_v32 = vld [vmem:[%s9949_s9 + $0x4e0] ss:$16 sps:$4 sm:$0xff]   ;;  %v8973_v33 = vld [vmem:[%s9949_s9 + $0x4e4] ss:$16 sps:$4 sm:$0xff]  }
 0x43f   : > { %v3303_v39 = vpop.f32.mrf.mxu1  ;;  %v3344_v40 = vpop.f32.mrf.mxu0  ;;  %v8976_v34 = vld [vmem:[%s9949_s9 + $0x4c4] ss:$16 sps:$4 sm:$0xff]   ;;  %v8932_v35 = vld [vmem:[%s9949_s9 + $0x288] ss:$16 sps:$4 sm:$0xff]  }
 0x440   : > { %v3392_v38 = vpack.c.bf16 %v3388_v37, %v3388_v37  ;;  %v8974_v37 = vld [vmem:[%s9949_s9 + $0x4c0] ss:$16 sps:$4 sm:$0xff]   ;;  %v8937_v39 = vld [vmem:[%s9949_s9 + $0x26c] ss:$16 sps:$4 sm:$0xff]   ;;  %v8979_v40 = vld [vmem:[%s9949_s9 + $0x4a4] ss:$16 sps:$4 sm:$0xff]  }
 0x442   : > { %4217 = vmatprep.mubr.bf16.mxu0 %v3392_v38 }
 0x443   : > { %4218 = vmatmul.mubr.bf16.vlgmr.msra.gmra.mxu0 %v10094_v44 }
 0x444   : > { %4268 = vmatpush1.bf16.msra.mxu0 %v8830_v41  ;;  %4299 = vmatprep.mubr.bf16.mxu0 %v3392_v38  ;;  %v8935_v38 = vld [vmem:[%s9949_s9 + $0x268] ss:$16 sps:$4 sm:$0xff]   ;;  %v8977_v41 = vld [vmem:[%s9949_s9 + $0x4a0] ss:$16 sps:$4 sm:$0xff]  }
 0x445   : > { %4269 = vmatprep.subr.bf16.mxu0 %v8838_v45  ;;  %v8982_v45 = vld [vmem:[%s9949_s9 + $0x484] ss:$16 sps:$4 sm:$0xff]  }
 0x448   : > { %4270 = vmatpush1.bf16.msra.mxu0 %v8836_v46  ;;  %v8938_v46 = vld [vmem:[%s9949_s9 + $0x248] ss:$16 sps:$4 sm:$0xff]  }
 0x449   : > { %4271 = vmatprep.subr.bf16.mxu0 %v8844_v47  ;;  %v8980_v47 = vld [vmem:[%s9949_s9 + $0x480] ss:$16 sps:$4 sm:$0xff]  }
 0x44c   : > { %4272 = vmatpush1.bf16.msra.mxu0 %v8842_v48  ;;  %v8943_v48 = vld [vmem:[%s9949_s9 + $0x22c] ss:$16 sps:$4 sm:$0xff]  }
 0x44d   : > { %4273 = vmatprep.subr.bf16.mxu0 %v8850_v49  ;;  %v8985_v49 = vld [vmem:[%s9949_s9 + $0x464] ss:$16 sps:$4 sm:$0xff]  }
 0x450   : > { %4274 = vmatpush1.bf16.msra.mxu0 %v8848_v42  ;;  %v8941_v42 = vld [vmem:[%s9949_s9 + $0x228] ss:$16 sps:$4 sm:$0xff]  }
 0x451   : > { %4275 = vmatprep.subr.bf16.mxu0 %v8856_v51  ;;  %v8983_v51 = vld [vmem:[%s9949_s9 + $0x460] ss:$16 sps:$4 sm:$0xff]  }
 0x454   : > { %4276 = vmatpush1.bf16.msra.mxu0 %v8854_v52  ;;  %v8946_v52 = vld [vmem:[%s9949_s9 + $0x20c] ss:$16 sps:$4 sm:$0xff]  }
 0x455   : > { %4277 = vmatprep.subr.bf16.mxu0 %v8862_v53  ;;  %v8988_v53 = vld [vmem:[%s9949_s9 + $0x444] ss:$16 sps:$4 sm:$0xff]  }
 0x458   : > { %4278 = vmatpush1.bf16.msra.mxu0 %v8860_v54  ;;  %v8944_v54 = vld [vmem:[%s9949_s9 + $0x208] ss:$16 sps:$4 sm:$0xff]  }
 0x459   : > { %4279 = vmatprep.subr.bf16.mxu0 %v8868_v55  ;;  %v8986_v55 = vld [vmem:[%s9949_s9 + $0x440] ss:$16 sps:$4 sm:$0xff]  }
 0x45c   : > { %4280 = vmatpush1.bf16.msra.mxu0 %v8866_v50  ;;  %v8949_v50 = vld [vmem:[%s9949_s9 + $0x3ec] ss:$16 sps:$4 sm:$0xff]  }
 0x45d   : > { %4281 = vmatprep.subr.bf16.mxu0 %v8874_v43  ;;  %v8991_v43 = vld [vmem:[%s9949_s9 + $0x424] ss:$16 sps:$4 sm:$0xff]  }
 0x460   : > { %4282 = vmatpush1.bf16.msra.mxu0 %v8872_v56  ;;  %v8947_v56 = vld [vmem:[%s9949_s9 + $0x3e8] ss:$16 sps:$4 sm:$0xff]  }
 0x461   : > { %4283 = vmatprep.subr.bf16.mxu0 %v8880_v57  ;;  %v8989_v57 = vld [vmem:[%s9949_s9 + $0x420] ss:$16 sps:$4 sm:$0xff]  }
 0x464   : > { %4284 = vmatpush2.bf16.msra.mxu0 %v8878_v58  ;;  %v8952_v58 = vld [vmem:[%s9949_s9 + $0x3cc] ss:$16 sps:$4 sm:$0xff]  }
 0x465   : > { %4285 = vmatprep.subr.bf16.mxu0 %v8886_v59  ;;  %v8994_v59 = vld [vmem:[%s9949_s9 + $0x404] ss:$16 sps:$4 sm:$0xff]  }
 0x468   : > { %4286 = vmatpush2.bf16.msra.mxu0 %v8884_v60  ;;  %v8950_v60 = vld [vmem:[%s9949_s9 + $0x3c8] ss:$16 sps:$4 sm:$0xff]  }
 0x469   : > { %4287 = vmatprep.subr.bf16.mxu0 %v8892_v61  ;;  %v8992_v61 = vld [vmem:[%s9949_s9 + $0x400] ss:$16 sps:$4 sm:$0xff]  }
 0x46c   : > { %4288 = vmatpush2.bf16.msra.mxu0 %v8890_v62  ;;  %v8955_v62 = vld [vmem:[%s9949_s9 + $0x3ac] ss:$16 sps:$4 sm:$0xff]  }
 0x46d   : > { %4289 = vmatprep.subr.bf16.mxu0 %v8898_v63  ;;  %v8997_v63 = vld [vmem:[%s9949_s9 + $0x5e4] ss:$16 sps:$4 sm:$0xff]  }
 0x470   : > { %4290 = vmatpush2.bf16.msra.mxu0 %v8896_v0  ;;  %v8953_v0 = vld [vmem:[%s9949_s9 + $0x3a8] ss:$16 sps:$4 sm:$0xff]  }
 0x471   : > { %4291 = vmatprep.subr.bf16.mxu0 %v8904_v1  ;;  %v8995_v1 = vld [vmem:[%s9949_s9 + $0x5e0] ss:$16 sps:$4 sm:$0xff]  }
 0x474   : > { %4292 = vmatpush2.bf16.msra.mxu0 %v8902_v36  ;;  %v8958_v36 = vld [vmem:[%s9949_s9 + $0x38c] ss:$16 sps:$4 sm:$0xff]  }
 0x475   : > { %4293 = vmatprep.subr.bf16.mxu0 %v8910_v2  ;;  %v9000_v2 = vld [vmem:[%s9949_s9 + $0x5c4] ss:$16 sps:$4 sm:$0xff]  }
 0x478   : > { %4294 = vmatpush2.bf16.msra.mxu0 %v8908_v3  ;;  %v8998_v3 = vld [vmem:[%s9949_s9 + $0x5c0] ss:$16 sps:$4 sm:$0xff]  }
 0x479   : > { %v3380_v9 = vpop.f32.mrf.mxu1  ;;  %4295 = vmatprep.subr.bf16.mxu0 %v8916_v5  ;;  %v8961_v5 = vld [vmem:[%s9949_s9 + $0x36c] ss:$16 sps:$4 sm:$0xff]  }
 0x47a   : > { %v3381_v16 = vadd.f32 %v3380_v9, %v3340_v7  ;;  %v8959_v7 = vld [vmem:[%s9949_s9 + $0x368] ss:$16 sps:$4 sm:$0xff]   ;;  %v8964_v9 = vld [vmem:[%s9949_s9 + $0x34c] ss:$16 sps:$4 sm:$0xff]  }
 0x47b   : > { %v3382_v17 = vpop.f32.mrf.mxu1 }
 0x47c   : > { %v3383_v18 = vadd.f32 %v3382_v17, %v3342_v11  ;;  %4296 = vmatpush2.bf16.msra.mxu0 %v8914_v8  ;;  %v3389_v20 = vmax.f32 %v3381_v16, 0.0  ;;  %v9001_v8 = vld [vmem:[%s9949_s9 + $0x5a0] ss:$16 sps:$4 sm:$0xff]   ;;  %v8962_v11 = vld [vmem:[%s9949_s9 + $0x348] ss:$16 sps:$4 sm:$0xff]  }
 0x47d   : > { %v3384_v21 = vpop.f32.mrf.mxu1  ;;  %4297 = vmatprep.subr.bf16.mxu0 %v8922_v10  ;;  %v9006_v10 = vld [vmem:[%s9949_s9 + $0x584] ss:$16 sps:$4 sm:$0xff]   ;;  %v9004_v16 = vld [vmem:[%s9949_s9 + $0x580] ss:$16 sps:$4 sm:$0xff]   ;;  %v8967_v17 = vld [vmem:[%s9949_s9 + $0x32c] ss:$16 sps:$4 sm:$0xff]  }
 0x47e   : > { %v3390_v22 = vmax.f32 %v3383_v18, 0.0  ;;  %v10134_v26 = vpack.c.bf16 %v3389_v20, %v3389_v20  ;;  %v9009_v18 = vld [vmem:[%s9949_s9 + $0x564] ss:$16 sps:$4 sm:$0xff]   ;;  %v9007_v20 = vld [vmem:[%s9949_s9 + $0x560] ss:$16 sps:$4 sm:$0xff]  }
 0x47f   : > { %v3385_v23 = vpop.f32.mrf.mxu1  ;;  %v8970_v21 = vld [vmem:[%s9949_s9 + $0x30c] ss:$16 sps:$4 sm:$0xff]  }
 0x480   : > { %v3394_v24 = vpack.c.bf16 %v3390_v22, %v3390_v22  ;;  %4298 = vmatpush2.bf16.msra.mxu0 %v8920_v19  ;;  %v8965_v19 = vld [vmem:[%s9949_s9 + $0x328] ss:$16 sps:$4 sm:$0xff]   ;;  %v9012_v22 = vld [vmem:[%s9949_s9 + $0x544] ss:$16 sps:$4 sm:$0xff]  }
 0x481   : > { %5149 = vmatprep.subr.bf16.mxu0 %v8973_v33  ;;  %v8968_v23 = vld [vmem:[%s9949_s9 + $0x308] ss:$16 sps:$4 sm:$0xff]   ;;  %v9027_v33 = vld [vmem:[%s9949_s9 + $0x6c4] ss:$16 sps:$4 sm:$0xff]  }
 0x482   : > { %4258 = vmatprep.mubr.bf16.mxu1 %v3394_v24 }
 0x483   : > { %4259 = vmatmul.mubr.bf16.vlgmr.msra.gmra.mxu1 %v10134_v26  ;;  %4300 = vmatmul.mubr.bf16.vlgmr.msra.gmra.mxu0 %v10094_v44  ;;  %v8940_v44 = vld [vmem:[%s9949_s9 + $0x24c] ss:$16 sps:$4 sm:$0xff]  }
 0x484   : > { %4309 = vmatpush1.bf16.msra.mxu1 %v8923_v25  ;;  %4340 = vmatprep.mubr.bf16.mxu1 %v3394_v24  ;;  %v9010_v24 = vld [vmem:[%s9949_s9 + $0x540] ss:$16 sps:$4 sm:$0xff]   ;;  %v9015_v25 = vld [vmem:[%s9949_s9 + $0x524] ss:$16 sps:$4 sm:$0xff]  }
 0x485   : > { %4310 = vmatprep.subr.bf16.mxu1 %v8928_v27  ;;  %5150 = vmatpush1.bf16.msra.mxu0 %v8971_v32  ;;  %v9013_v27 = vld [vmem:[%s9949_s9 + $0x520] ss:$16 sps:$4 sm:$0xff]   ;;  %v9024_v32 = vld [vmem:[%s9949_s9 + $0x4ec] ss:$16 sps:$4 sm:$0xff]  }
 0x486   : > { %5151 = vmatprep.subr.bf16.mxu0 %v8976_v34  ;;  %v9031_v34 = vld [vmem:[%s9949_s9 + $0x6a0] ss:$16 sps:$4 sm:$0xff]  }
 0x488   : > { %4311 = vmatpush1.bf16.msra.mxu1 %v8926_v28  ;;  %v9018_v28 = vld [vmem:[%s9949_s9 + $0x504] ss:$16 sps:$4 sm:$0xff]  }
 0x489   : > { %4312 = vmatprep.subr.bf16.mxu1 %v8931_v29  ;;  %5152 = vmatpush1.bf16.msra.mxu0 %v8974_v37  ;;  %v9016_v29 = vld [vmem:[%s9949_s9 + $0x500] ss:$16 sps:$4 sm:$0xff]  }
 0x48a   : > { %5153 = vmatprep.subr.bf16.mxu0 %v8979_v40  ;;  %v9037_v37 = vld [vmem:[%s9949_s9 + $0x680] ss:$16 sps:$4 sm:$0xff]  }
 0x48b   : > { %v9043_v40 = vld [vmem:[%s9949_s9 + $0x660] ss:$16 sps:$4 sm:$0xff]  }
 0x48c   : > { %4313 = vmatpush1.bf16.msra.mxu1 %v8929_v30  ;;  %v9019_v30 = vld [vmem:[%s9949_s9 + $0x6e0] ss:$16 sps:$4 sm:$0xff]  }
 0x48d   : > { %4314 = vmatprep.subr.bf16.mxu1 %v8934_v31  ;;  %5154 = vmatpush1.bf16.msra.mxu0 %v8977_v41  ;;  %v9021_v31 = vld [vmem:[%s9949_s9 + $0x6e4] ss:$16 sps:$4 sm:$0xff]   ;;  %v9049_v41 = vld [vmem:[%s9949_s9 + $0x640] ss:$16 sps:$4 sm:$0xff]  }
 0x48e   : > { %5155 = vmatprep.subr.bf16.mxu0 %v8982_v45  ;;  %v9055_v45 = vld [vmem:[%s9949_s9 + $0x620] ss:$16 sps:$4 sm:$0xff]  }
 0x490   : > { %4315 = vmatpush1.bf16.msra.mxu1 %v8932_v35  ;;  %v9033_v35 = vld [vmem:[%s9949_s9 + $0x6a4] ss:$16 sps:$4 sm:$0xff]  }
 0x491   : > { %4316 = vmatprep.subr.bf16.mxu1 %v8937_v39  ;;  %5156 = vmatpush1.bf16.msra.mxu0 %v8980_v47  ;;  %v9039_v39 = vld [vmem:[%s9949_s9 + $0x684] ss:$16 sps:$4 sm:$0xff]   ;;  %v9061_v47 = vld [vmem:[%s9949_s9 + $0x600] ss:$16 sps:$4 sm:$0xff]  }
 0x492   : > { %5157 = vmatprep.subr.bf16.mxu0 %v8985_v49  ;;  %v9067_v49 = vld [vmem:[%s9949_s9 + $0x7e0] ss:$16 sps:$4 sm:$0xff]  }
 0x494   : > { %4317 = vmatpush1.bf16.msra.mxu1 %v8935_v38  ;;  %v9045_v38 = vld [vmem:[%s9949_s9 + $0x664] ss:$16 sps:$4 sm:$0xff]  }
 0x495   : > { %4318 = vmatprep.subr.bf16.mxu1 %v8940_v44  ;;  %5158 = vmatpush1.bf16.msra.mxu0 %v8983_v51  ;;  %v9051_v44 = vld [vmem:[%s9949_s9 + $0x644] ss:$16 sps:$4 sm:$0xff]   ;;  %v9073_v51 = vld [vmem:[%s9949_s9 + $0x7c0] ss:$16 sps:$4 sm:$0xff]  }
 0x496   : > { %5159 = vmatprep.subr.bf16.mxu0 %v8988_v53  ;;  %v9079_v53 = vld [vmem:[%s9949_s9 + $0x7a0] ss:$16 sps:$4 sm:$0xff]  }
 0x498   : > { %4319 = vmatpush1.bf16.msra.mxu1 %v8938_v46  ;;  %v9057_v46 = vld [vmem:[%s9949_s9 + $0x624] ss:$16 sps:$4 sm:$0xff]  }
 0x499   : > { %4320 = vmatprep.subr.bf16.mxu1 %v8943_v48  ;;  %5160 = vmatpush1.bf16.msra.mxu0 %v8986_v55  ;;  %v9063_v48 = vld [vmem:[%s9949_s9 + $0x604] ss:$16 sps:$4 sm:$0xff]   ;;  %v9085_v55 = vld [vmem:[%s9949_s9 + $0x780] ss:$16 sps:$4 sm:$0xff]  }
 0x49a   : > { %5161 = vmatprep.subr.bf16.mxu0 %v8991_v43  ;;  %v9091_v43 = vld [vmem:[%s9949_s9 + $0x760] ss:$16 sps:$4 sm:$0xff]  }
 0x49c   : > { %4321 = vmatpush1.bf16.msra.mxu1 %v8941_v42  ;;  %v9069_v42 = vld [vmem:[%s9949_s9 + $0x7e4] ss:$16 sps:$4 sm:$0xff]  }
 0x49d   : > { %4322 = vmatprep.subr.bf16.mxu1 %v8946_v52  ;;  %5162 = vmatpush1.bf16.msra.mxu0 %v8989_v57  ;;  %v9075_v52 = vld [vmem:[%s9949_s9 + $0x7c4] ss:$16 sps:$4 sm:$0xff]   ;;  %v9097_v57 = vld [vmem:[%s9949_s9 + $0x740] ss:$16 sps:$4 sm:$0xff]  }
 0x49e   : > { %5163 = vmatprep.subr.bf16.mxu0 %v8994_v59  ;;  %v9105_v59 = vld [vmem:[%s9949_s9 + $0x724] ss:$16 sps:$4 sm:$0xff]  }
 0x4a0   : > { %4323 = vmatpush1.bf16.msra.mxu1 %v8944_v54  ;;  %v9081_v54 = vld [vmem:[%s9949_s9 + $0x7a4] ss:$16 sps:$4 sm:$0xff]  }
 0x4a1   : > { %4324 = vmatprep.subr.bf16.mxu1 %v8949_v50  ;;  %5164 = vmatpush1.bf16.msra.mxu0 %v8992_v61  ;;  %v9087_v50 = vld [vmem:[%s9949_s9 + $0x784] ss:$16 sps:$4 sm:$0xff]   ;;  %v9103_v61 = vld [vmem:[%s9949_s9 + $0x720] ss:$16 sps:$4 sm:$0xff]  }
 0x4a2   : > { %5165 = vmatprep.subr.bf16.mxu0 %v8997_v63  ;;  %v9111_v63 = vld [vmem:[%s9949_s9 + $0x704] ss:$16 sps:$4 sm:$0xff]  }
 0x4a4   : > { %4325 = vmatpush2.bf16.msra.mxu1 %v8947_v56  ;;  %v9093_v56 = vld [vmem:[%s9949_s9 + $0x764] ss:$16 sps:$4 sm:$0xff]  }
 0x4a5   : > { %4326 = vmatprep.subr.bf16.mxu1 %v8952_v58  ;;  %5166 = vmatpush2.bf16.msra.mxu0 %v8995_v1  ;;  %v9099_v58 = vld [vmem:[%s9949_s9 + $0x744] ss:$16 sps:$4 sm:$0xff]   ;;  %v9109_v1 = vld [vmem:[%s9949_s9 + $0x700] ss:$16 sps:$4 sm:$0xff]  }
 0x4a6   : > { %5167 = vmatprep.subr.bf16.mxu0 %v9000_v2  ;;  %v9117_v2 = vld [vmem:[%s9949_s9 + $0x6ec] ss:$16 sps:$4 sm:$0xff]  }
 0x4a8   : > { %4327 = vmatpush2.bf16.msra.mxu1 %v8950_v60 }
 0x4a9   : > { %4328 = vmatprep.subr.bf16.mxu1 %v8955_v62  ;;  %5168 = vmatpush2.bf16.msra.mxu0 %v8998_v3 }
 0x4aa   : > { %5169 = vmatprep.subr.bf16.mxu0 %v9003_v6 }
 0x4ac   : > { %4329 = vmatpush2.bf16.msra.mxu1 %v8953_v0 }
 0x4ad   : > { %4330 = vmatprep.subr.bf16.mxu1 %v8958_v36  ;;  %5170 = vmatpush2.bf16.msra.mxu0 %v9001_v8 }
 0x4ae   : > { %5171 = vmatprep.subr.bf16.mxu0 %v9006_v10 }
 0x4b0   : > { %4331 = vmatpush2.bf16.msra.mxu1 %v8956_v4  ;;  %v10241_v4 = vld [vmem:[%s10238_s11] sm:$0xf] }
 0x4b1   : > { %4332 = vmatprep.subr.bf16.mxu1 %v8961_v5  ;;  %5172 = vmatpush2.bf16.msra.mxu0 %v9004_v16  ;;  %v3528_v3 = vrot.slane %v10241_v4, %v9955_v12  ;;  %v3532_v5 = vrot.slane %v10241_v4, %v9959_v14 }
 0x4b2   : > { %5173 = vmatprep.subr.bf16.mxu0 %v9009_v18 }
 0x4b4   : > { %4333 = vmatpush2.bf16.msra.mxu1 %v8959_v7 }
 0x4b5   : > { %4334 = vmatprep.subr.bf16.mxu1 %v8964_v9  ;;  %5174 = vmatpush2.bf16.msra.mxu0 %v9007_v20 }
 0x4b6   : > { %5175 = vmatprep.subr.bf16.mxu0 %v9012_v22 }
 0x4b8   : > { %4335 = vmatpush2.bf16.msra.mxu1 %v8962_v11 }
 0x4b9   : > { %4336 = vmatprep.subr.bf16.mxu1 %v8967_v17  ;;  %5176 = vmatpush2.bf16.msra.mxu0 %v9010_v24 }
 0x4ba   : > { %5177 = vmatprep.subr.bf16.mxu0 %v9015_v25  ;;  %v9022_v25 = vld [vmem:[%s9949_s9 + $0x4e8] ss:$16 sps:$4 sm:$0xff]  }
 0x4bc   : > { %4337 = vmatpush2.bf16.msra.mxu1 %v8965_v19 }
 0x4bd   : > { %4338 = vmatprep.subr.bf16.mxu1 %v8970_v21  ;;  %5178 = vmatpush2.bf16.msra.mxu0 %v9013_v27 }
 0x4be   : > { %5179 = vmatprep.subr.bf16.mxu0 %v9018_v28  ;;  %v9030_v28 = vld [vmem:[%s9949_s9 + $0x4cc] ss:$16 sps:$4 sm:$0xff]  }
 0x4c0   : > { %4339 = vmatpush2.bf16.msra.mxu1 %v8968_v23 }
 0x4c1   : > { %5180 = vmatpush2.bf16.msra.mxu0 %v9016_v29  ;;  %5190 = vmatprep.subr.bf16.mxu1 %v9021_v31  ;;  %v9028_v29 = vld [vmem:[%s9949_s9 + $0x4c8] ss:$16 sps:$4 sm:$0xff]  }
 0x4c2   : > { %5231 = vmatprep.subr.bf16.mxu0 %v9024_v32  ;;  %v9034_v31 = vld [vmem:[%s9949_s9 + $0x4a8] ss:$16 sps:$4 sm:$0xff]   ;;  %v9042_v32 = vld [vmem:[%s9949_s9 + $0x48c] ss:$16 sps:$4 sm:$0xff]  }
 0x4c3   : > { %4341 = vmatmul.mubr.bf16.vlgmr.msra.gmra.mxu1 %v10134_v26  ;;  %v9025_v26 = vld [vmem:[%s9949_s9 + $0x6c0] ss:$16 sps:$4 sm:$0xff]  }
 0x4c4   : > { %5191 = vmatpush1.bf16.msra.mxu1 %v9019_v30  ;;  %v9036_v30 = vld [vmem:[%s9949_s9 + $0x4ac] ss:$16 sps:$4 sm:$0xff]  }
 0x4c5   : > { %5192 = vmatprep.subr.bf16.mxu1 %v9027_v33  ;;  %v9048_v33 = vld [vmem:[%s9949_s9 + $0x46c] ss:$16 sps:$4 sm:$0xff]  }
 0x4c8   : > { %5193 = vmatpush1.bf16.msra.mxu1 %v9025_v26  ;;  %v9040_v26 = vld [vmem:[%s9949_s9 + $0x488] ss:$16 sps:$4 sm:$0xff]  }
 0x4c9   : > { %5194 = vmatprep.subr.bf16.mxu1 %v9033_v35  ;;  %v9054_v35 = vld [vmem:[%s9949_s9 + $0x44c] ss:$16 sps:$4 sm:$0xff]  }
 0x4cc   : > { %5195 = vmatpush1.bf16.msra.mxu1 %v9031_v34  ;;  %v9046_v34 = vld [vmem:[%s9949_s9 + $0x468] ss:$16 sps:$4 sm:$0xff]  }
 0x4cd   : > { %5196 = vmatprep.subr.bf16.mxu1 %v9039_v39  ;;  %v9060_v39 = vld [vmem:[%s9949_s9 + $0x42c] ss:$16 sps:$4 sm:$0xff]  }
 0x4d0   : > { %5197 = vmatpush1.bf16.msra.mxu1 %v9037_v37  ;;  %v9052_v37 = vld [vmem:[%s9949_s9 + $0x448] ss:$16 sps:$4 sm:$0xff]  }
 0x4d1   : > { %5198 = vmatprep.subr.bf16.mxu1 %v9045_v38  ;;  %v9066_v38 = vld [vmem:[%s9949_s9 + $0x40c] ss:$16 sps:$4 sm:$0xff]  }
 0x4d4   : > { %5199 = vmatpush1.bf16.msra.mxu1 %v9043_v40  ;;  %v9058_v40 = vld [vmem:[%s9949_s9 + $0x428] ss:$16 sps:$4 sm:$0xff]  }
 0x4d5   : > { %5200 = vmatprep.subr.bf16.mxu1 %v9051_v44  ;;  %v9072_v44 = vld [vmem:[%s9949_s9 + $0x5ec] ss:$16 sps:$4 sm:$0xff]  }
 0x4d8   : > { %5201 = vmatpush1.bf16.msra.mxu1 %v9049_v41  ;;  %v9064_v41 = vld [vmem:[%s9949_s9 + $0x408] ss:$16 sps:$4 sm:$0xff]  }
 0x4d9   : > { %5202 = vmatprep.subr.bf16.mxu1 %v9057_v46  ;;  %v9078_v46 = vld [vmem:[%s9949_s9 + $0x5cc] ss:$16 sps:$4 sm:$0xff]  }
 0x4dc   : > { %5203 = vmatpush1.bf16.msra.mxu1 %v9055_v45  ;;  %v9070_v45 = vld [vmem:[%s9949_s9 + $0x5e8] ss:$16 sps:$4 sm:$0xff]  }
 0x4dd   : > { %5204 = vmatprep.subr.bf16.mxu1 %v9063_v48  ;;  %v9084_v48 = vld [vmem:[%s9949_s9 + $0x5ac] ss:$16 sps:$4 sm:$0xff]  }
 0x4e0   : > { %5205 = vmatpush1.bf16.msra.mxu1 %v9061_v47  ;;  %v9076_v47 = vld [vmem:[%s9949_s9 + $0x5c8] ss:$16 sps:$4 sm:$0xff]  }
 0x4e1   : > { %5206 = vmatprep.subr.bf16.mxu1 %v9069_v42  ;;  %v9090_v42 = vld [vmem:[%s9949_s9 + $0x58c] ss:$16 sps:$4 sm:$0xff]  }
 0x4e4   : > { %5207 = vmatpush2.bf16.msra.mxu1 %v9067_v49  ;;  %v9082_v49 = vld [vmem:[%s9949_s9 + $0x5a8] ss:$16 sps:$4 sm:$0xff]  }
 0x4e5   : > { %5208 = vmatprep.subr.bf16.mxu1 %v9075_v52  ;;  %v9096_v52 = vld [vmem:[%s9949_s9 + $0x56c] ss:$16 sps:$4 sm:$0xff]  }
 0x4e8   : > { %5209 = vmatpush2.bf16.msra.mxu1 %v9073_v51  ;;  %v9088_v51 = vld [vmem:[%s9949_s9 + $0x588] ss:$16 sps:$4 sm:$0xff]  }
 0x4e9   : > { %5210 = vmatprep.subr.bf16.mxu1 %v9081_v54  ;;  %v9102_v54 = vld [vmem:[%s9949_s9 + $0x54c] ss:$16 sps:$4 sm:$0xff]  }
 0x4ec   : > { %5211 = vmatpush2.bf16.msra.mxu1 %v9079_v53  ;;  %v9094_v53 = vld [vmem:[%s9949_s9 + $0x568] ss:$16 sps:$4 sm:$0xff]  }
 0x4ed   : > { %5212 = vmatprep.subr.bf16.mxu1 %v9087_v50  ;;  %v9100_v50 = vld [vmem:[%s9949_s9 + $0x548] ss:$16 sps:$4 sm:$0xff]  }
 0x4f0   : > { %5213 = vmatpush2.bf16.msra.mxu1 %v9085_v55  ;;  %v3536_v55 = vrot.slane %v10241_v4, %v9957_v13 }
 0x4f1   : > { %5214 = vmatprep.subr.bf16.mxu1 %v9093_v56  ;;  %v3540_v56 = vrot.slane %v10241_v4, %v9961_v15 }
 0x4f4   : > { %5215 = vmatpush2.bf16.msra.mxu1 %v9091_v43  ;;  %v9108_v43 = vld [vmem:[%s9949_s9 + $0x52c] ss:$16 sps:$4 sm:$0xff]  }
 0x4f5   : > { %5216 = vmatprep.subr.bf16.mxu1 %v9099_v58  ;;  %v9106_v58 = vld [vmem:[%s9949_s9 + $0x528] ss:$16 sps:$4 sm:$0xff]  }
 0x4f8   : > { %5217 = vmatpush2.bf16.msra.mxu1 %v9097_v57 }
 0x4f9   : > { %5218 = vmatprep.subr.bf16.mxu1 %v9105_v59 }
 0x4fc   : > { %5219 = vmatpush2.bf16.msra.mxu1 %v9103_v61 }
 0x4fd   : > { %5220 = vmatprep.subr.bf16.mxu1 %v9111_v63 }
 0x500   : > { %5221 = vmatpush2.bf16.msra.mxu1 %v9109_v1  ;;  %v9112_v1 = vld [vmem:[%s9949_s9 + $0x508] ss:$16 sps:$4 sm:$0xff]  }
 0x501   : > { %5272 = vmatprep.subr.bf16.mxu1 %v9117_v2 }
 0x503   : > { %v4219_v60 = vpop.f32.mrf.mxu0 }
 0x504   : > { %v4220_v6 = vadd.f32 %v4219_v60, %v3528_v3  ;;  %v9114_v60 = vld [vmem:[%s9949_s9 + $0x50c] ss:$16 sps:$4 sm:$0xff]  }
 0x505   : > { %v4221_v62 = vpop.f32.mrf.mxu0 }
 0x506   : > { %v4222_v9 = vadd.f32 %v4221_v62, %v3532_v5 }
 0x507   : > { %v4223_v0 = vpop.f32.mrf.mxu0 }
 0x509   : > { %v4224_v36 = vpop.f32.mrf.mxu0 }
 0x543   : > { %v4260_v7 = vpop.f32.mrf.mxu1  ;;  %v10247_v8 = vpop.f32.mrf.mxu0 }
 0x544   : > { %v4261_v10 = vadd.f32 %v4260_v7, %v4220_v6  ;;  %v4302_v57 = vadd.f32 %v10247_v8, %v3536_v55  ;;  %v9115_v6 = vld [vmem:[%s9949_s9 + $0x6e8] ss:$16 sps:$4 sm:$0xff]   ;;  %v9120_v8 = vld [vmem:[%s9949_s9 + $0x6cc] ss:$16 sps:$4 sm:$0xff]  }
 0x545   : > { %v4262_v11 = vpop.f32.mrf.mxu1  ;;  %v10249_v16 = vpop.f32.mrf.mxu0  ;;  %v9148_v55 = vld [vmem:[%s9949_s9 + $0x788] ss:$16 sps:$4 sm:$0xff]  }
 0x546   : > { %v4263_v17 = vadd.f32 %v4262_v11, %v4222_v9  ;;  %v4349_v18 = vmax.f32 %v4261_v10, 0.0  ;;  %v4304_v61 = vadd.f32 %v10249_v16, %v3540_v56  ;;  %v9118_v9 = vld [vmem:[%s9949_s9 + $0x6c8] ss:$16 sps:$4 sm:$0xff]   ;;  %v9123_v10 = vld [vmem:[%s9949_s9 + $0x6ac] ss:$16 sps:$4 sm:$0xff]  }
 0x547   : > { %v4264_v19 = vpop.f32.mrf.mxu1  ;;  %v4305_v20 = vpop.f32.mrf.mxu0  ;;  %v9121_v11 = vld [vmem:[%s9949_s9 + $0x6a8] ss:$16 sps:$4 sm:$0xff]   ;;  %v9126_v16 = vld [vmem:[%s9949_s9 + $0x68c] ss:$16 sps:$4 sm:$0xff]   ;;  %v9195_v56 = vld [vmem:[%s9949_s9 + $0x9a4] ss:$16 sps:$4 sm:$0xff]  }
 0x548   : > { %v4350_v21 = vmax.f32 %v4263_v17, 0.0  ;;  %v10252_v27 = vpack.c.bf16 %v4349_v18, %v4349_v18  ;;  %v9163_v17 = vld [vmem:[%s9949_s9 + $0x8e0] ss:$16 sps:$4 sm:$0xff]   ;;  %v9165_v18 = vld [vmem:[%s9949_s9 + $0x8e4] ss:$16 sps:$4 sm:$0xff]  }
 0x549   : > { %v4265_v22 = vpop.f32.mrf.mxu1  ;;  %v4306_v23 = vpop.f32.mrf.mxu0  ;;  %v9168_v19 = vld [vmem:[%s9949_s9 + $0x8c4] ss:$16 sps:$4 sm:$0xff]   ;;  %v9124_v20 = vld [vmem:[%s9949_s9 + $0x688] ss:$16 sps:$4 sm:$0xff]  }
 0x54a   : > { %v4354_v24 = vpack.c.bf16 %v4350_v21, %v4350_v21  ;;  %v9166_v21 = vld [vmem:[%s9949_s9 + $0x8c0] ss:$16 sps:$4 sm:$0xff]   ;;  %v9129_v22 = vld [vmem:[%s9949_s9 + $0x66c] ss:$16 sps:$4 sm:$0xff]   ;;  %v9171_v23 = vld [vmem:[%s9949_s9 + $0x8a4] ss:$16 sps:$4 sm:$0xff]  }
 0x54c   : > { %5181 = vmatprep.mubr.bf16.mxu0 %v4354_v24 }
 0x54d   : > { %5182 = vmatmul.mubr.bf16.vlgmr.msra.gmra.mxu0 %v10252_v27 }
 0x54e   : > { %5232 = vmatpush1.bf16.msra.mxu0 %v9022_v25  ;;  %5263 = vmatprep.mubr.bf16.mxu0 %v4354_v24  ;;  %v9127_v24 = vld [vmem:[%s9949_s9 + $0x668] ss:$16 sps:$4 sm:$0xff]   ;;  %v9169_v25 = vld [vmem:[%s9949_s9 + $0x8a0] ss:$16 sps:$4 sm:$0xff]  }
 0x54f   : > { %5233 = vmatprep.subr.bf16.mxu0 %v9030_v28  ;;  %v9174_v28 = vld [vmem:[%s9949_s9 + $0x884] ss:$16 sps:$4 sm:$0xff]  }
 0x552   : > { %5234 = vmatpush1.bf16.msra.mxu0 %v9028_v29  ;;  %v9130_v29 = vld [vmem:[%s9949_s9 + $0x648] ss:$16 sps:$4 sm:$0xff]  }
 0x553   : > { %5235 = vmatprep.subr.bf16.mxu0 %v9036_v30  ;;  %v9172_v30 = vld [vmem:[%s9949_s9 + $0x880] ss:$16 sps:$4 sm:$0xff]  }
 0x556   : > { %5236 = vmatpush1.bf16.msra.mxu0 %v9034_v31  ;;  %v9135_v31 = vld [vmem:[%s9949_s9 + $0x62c] ss:$16 sps:$4 sm:$0xff]  }
 0x557   : > { %5237 = vmatprep.subr.bf16.mxu0 %v9042_v32  ;;  %v9177_v32 = vld [vmem:[%s9949_s9 + $0x864] ss:$16 sps:$4 sm:$0xff]  }
 0x55a   : > { %5238 = vmatpush1.bf16.msra.mxu0 %v9040_v26  ;;  %v9133_v26 = vld [vmem:[%s9949_s9 + $0x628] ss:$16 sps:$4 sm:$0xff]  }
 0x55b   : > { %5239 = vmatprep.subr.bf16.mxu0 %v9048_v33  ;;  %v9175_v33 = vld [vmem:[%s9949_s9 + $0x860] ss:$16 sps:$4 sm:$0xff]  }
 0x55e   : > { %5240 = vmatpush1.bf16.msra.mxu0 %v9046_v34  ;;  %v9138_v34 = vld [vmem:[%s9949_s9 + $0x60c] ss:$16 sps:$4 sm:$0xff]  }
 0x55f   : > { %5241 = vmatprep.subr.bf16.mxu0 %v9054_v35  ;;  %v9180_v35 = vld [vmem:[%s9949_s9 + $0x844] ss:$16 sps:$4 sm:$0xff]  }
 0x562   : > { %5242 = vmatpush1.bf16.msra.mxu0 %v9052_v37  ;;  %v9136_v37 = vld [vmem:[%s9949_s9 + $0x608] ss:$16 sps:$4 sm:$0xff]  }
 0x563   : > { %5243 = vmatprep.subr.bf16.mxu0 %v9060_v39  ;;  %v9178_v39 = vld [vmem:[%s9949_s9 + $0x840] ss:$16 sps:$4 sm:$0xff]  }
 0x566   : > { %5244 = vmatpush1.bf16.msra.mxu0 %v9058_v40  ;;  %v9141_v40 = vld [vmem:[%s9949_s9 + $0x7ec] ss:$16 sps:$4 sm:$0xff]  }
 0x567   : > { %5245 = vmatprep.subr.bf16.mxu0 %v9066_v38  ;;  %v9183_v38 = vld [vmem:[%s9949_s9 + $0x824] ss:$16 sps:$4 sm:$0xff]  }
 0x56a   : > { %5246 = vmatpush1.bf16.msra.mxu0 %v9064_v41  ;;  %v9139_v41 = vld [vmem:[%s9949_s9 + $0x7e8] ss:$16 sps:$4 sm:$0xff]  }
 0x56b   : > { %5247 = vmatprep.subr.bf16.mxu0 %v9072_v44  ;;  %v9181_v44 = vld [vmem:[%s9949_s9 + $0x820] ss:$16 sps:$4 sm:$0xff]  }
 0x56e   : > { %5248 = vmatpush2.bf16.msra.mxu0 %v9070_v45  ;;  %v9144_v45 = vld [vmem:[%s9949_s9 + $0x7cc] ss:$16 sps:$4 sm:$0xff]  }
 0x56f   : > { %5249 = vmatprep.subr.bf16.mxu0 %v9078_v46  ;;  %v9186_v46 = vld [vmem:[%s9949_s9 + $0x804] ss:$16 sps:$4 sm:$0xff]  }
 0x572   : > { %5250 = vmatpush2.bf16.msra.mxu0 %v9076_v47  ;;  %v9142_v47 = vld [vmem:[%s9949_s9 + $0x7c8] ss:$16 sps:$4 sm:$0xff]  }
 0x573   : > { %5251 = vmatprep.subr.bf16.mxu0 %v9084_v48  ;;  %v9184_v48 = vld [vmem:[%s9949_s9 + $0x800] ss:$16 sps:$4 sm:$0xff]  }
 0x576   : > { %5252 = vmatpush2.bf16.msra.mxu0 %v9082_v49  ;;  %v9147_v49 = vld [vmem:[%s9949_s9 + $0x7ac] ss:$16 sps:$4 sm:$0xff]  }
 0x577   : > { %5253 = vmatprep.subr.bf16.mxu0 %v9090_v42  ;;  %v9189_v42 = vld [vmem:[%s9949_s9 + $0x9e4] ss:$16 sps:$4 sm:$0xff]  }
 0x57a   : > { %5254 = vmatpush2.bf16.msra.mxu0 %v9088_v51  ;;  %v9145_v51 = vld [vmem:[%s9949_s9 + $0x7a8] ss:$16 sps:$4 sm:$0xff]  }
 0x57b   : > { %5255 = vmatprep.subr.bf16.mxu0 %v9096_v52  ;;  %v9187_v52 = vld [vmem:[%s9949_s9 + $0x9e0] ss:$16 sps:$4 sm:$0xff]  }
 0x57e   : > { %5256 = vmatpush2.bf16.msra.mxu0 %v9094_v53  ;;  %v9150_v53 = vld [vmem:[%s9949_s9 + $0x78c] ss:$16 sps:$4 sm:$0xff]  }
 0x57f   : > { %5257 = vmatprep.subr.bf16.mxu0 %v9102_v54  ;;  %v9192_v54 = vld [vmem:[%s9949_s9 + $0x9c4] ss:$16 sps:$4 sm:$0xff]  }
 0x582   : > { %5258 = vmatpush2.bf16.msra.mxu0 %v9100_v50  ;;  %v9190_v50 = vld [vmem:[%s9949_s9 + $0x9c0] ss:$16 sps:$4 sm:$0xff]  }
 0x583   : > { %v4342_v59 = vpop.f32.mrf.mxu1  ;;  %5259 = vmatprep.subr.bf16.mxu0 %v9108_v43  ;;  %v9153_v43 = vld [vmem:[%s9949_s9 + $0x76c] ss:$16 sps:$4 sm:$0xff]  }
 0x584   : > { %v4343_v62 = vadd.f32 %v4342_v59, %v4302_v57  ;;  %v9151_v57 = vld [vmem:[%s9949_s9 + $0x768] ss:$16 sps:$4 sm:$0xff]   ;;  %v9156_v59 = vld [vmem:[%s9949_s9 + $0x74c] ss:$16 sps:$4 sm:$0xff]  }
 0x585   : > { %v4344_v63 = vpop.f32.mrf.mxu1 }
 0x586   : > { %v4345_v0 = vadd.f32 %v4344_v63, %v4304_v61  ;;  %5260 = vmatpush2.bf16.msra.mxu0 %v9106_v58  ;;  %v4351_v36 = vmax.f32 %v4343_v62, 0.0  ;;  %v9193_v58 = vld [vmem:[%s9949_s9 + $0x9a0] ss:$16 sps:$4 sm:$0xff]   ;;  %v9154_v61 = vld [vmem:[%s9949_s9 + $0x748] ss:$16 sps:$4 sm:$0xff]  }
 0x587   : > { %v4346_v2 = vpop.f32.mrf.mxu1  ;;  %5261 = vmatprep.subr.bf16.mxu0 %v9114_v60  ;;  %v9198_v60 = vld [vmem:[%s9949_s9 + $0x984] ss:$16 sps:$4 sm:$0xff]   ;;  %v9196_v62 = vld [vmem:[%s9949_s9 + $0x980] ss:$16 sps:$4 sm:$0xff]   ;;  %v9159_v63 = vld [vmem:[%s9949_s9 + $0x72c] ss:$16 sps:$4 sm:$0xff]  }
 0x588   : > { %v4352_v4 = vmax.f32 %v4345_v0, 0.0  ;;  %v10292_v7 = vpack.c.bf16 %v4351_v36, %v4351_v36  ;;  %v9201_v0 = vld [vmem:[%s9949_s9 + $0x964] ss:$16 sps:$4 sm:$0xff]   ;;  %v9199_v36 = vld [vmem:[%s9949_s9 + $0x960] ss:$16 sps:$4 sm:$0xff]  }
 0x589   : > { %v4347_v3 = vpop.f32.mrf.mxu1  ;;  %v9162_v2 = vld [vmem:[%s9949_s9 + $0x70c] ss:$16 sps:$4 sm:$0xff]  }
 0x58a   : > { %v4356_v5 = vpack.c.bf16 %v4352_v4, %v4352_v4  ;;  %5262 = vmatpush2.bf16.msra.mxu0 %v9112_v1  ;;  %v9157_v1 = vld [vmem:[%s9949_s9 + $0x728] ss:$16 sps:$4 sm:$0xff]   ;;  %v9204_v4 = vld [vmem:[%s9949_s9 + $0x944] ss:$16 sps:$4 sm:$0xff]  }
 0x58b   : > { %6113 = vmatprep.subr.bf16.mxu0 %v9165_v18  ;;  %v9160_v3 = vld [vmem:[%s9949_s9 + $0x708] ss:$16 sps:$4 sm:$0xff]   ;;  %v9219_v18 = vld [vmem:[%s9949_s9 + $0xac4] ss:$16 sps:$4 sm:$0xff]  }
 0x58c   : > { %5222 = vmatprep.mubr.bf16.mxu1 %v4356_v5 }
 0x58d   : > { %5223 = vmatmul.mubr.bf16.vlgmr.msra.gmra.mxu1 %v10292_v7  ;;  %5264 = vmatmul.mubr.bf16.vlgmr.msra.gmra.mxu0 %v10252_v27  ;;  %v9132_v27 = vld [vmem:[%s9949_s9 + $0x64c] ss:$16 sps:$4 sm:$0xff]  }
 0x58e   : > { %5273 = vmatpush1.bf16.msra.mxu1 %v9115_v6  ;;  %5304 = vmatprep.mubr.bf16.mxu1 %v4356_v5  ;;  %v9202_v5 = vld [vmem:[%s9949_s9 + $0x940] ss:$16 sps:$4 sm:$0xff]   ;;  %v9207_v6 = vld [vmem:[%s9949_s9 + $0x924] ss:$16 sps:$4 sm:$0xff]  }
 0x58f   : > { %5274 = vmatprep.subr.bf16.mxu1 %v9120_v8  ;;  %6114 = vmatpush1.bf16.msra.mxu0 %v9163_v17  ;;  %v9205_v8 = vld [vmem:[%s9949_s9 + $0x920] ss:$16 sps:$4 sm:$0xff]   ;;  %v9216_v17 = vld [vmem:[%s9949_s9 + $0x8ec] ss:$16 sps:$4 sm:$0xff]  }
 0x590   : > { %6115 = vmatprep.subr.bf16.mxu0 %v9168_v19  ;;  %v9223_v19 = vld [vmem:[%s9949_s9 + $0xaa0] ss:$16 sps:$4 sm:$0xff]  }
 0x592   : > { %5275 = vmatpush1.bf16.msra.mxu1 %v9118_v9  ;;  %v9210_v9 = vld [vmem:[%s9949_s9 + $0x904] ss:$16 sps:$4 sm:$0xff]  }
 0x593   : > { %5276 = vmatprep.subr.bf16.mxu1 %v9123_v10  ;;  %6116 = vmatpush1.bf16.msra.mxu0 %v9166_v21  ;;  %v9208_v10 = vld [vmem:[%s9949_s9 + $0x900] ss:$16 sps:$4 sm:$0xff]  }
 0x594   : > { %6117 = vmatprep.subr.bf16.mxu0 %v9171_v23  ;;  %v9229_v21 = vld [vmem:[%s9949_s9 + $0xa80] ss:$16 sps:$4 sm:$0xff]  }
 0x595   : > { %v9235_v23 = vld [vmem:[%s9949_s9 + $0xa60] ss:$16 sps:$4 sm:$0xff]  }
 0x596   : > { %5277 = vmatpush1.bf16.msra.mxu1 %v9121_v11  ;;  %v9211_v11 = vld [vmem:[%s9949_s9 + $0xae0] ss:$16 sps:$4 sm:$0xff]  }
 0x597   : > { %5278 = vmatprep.subr.bf16.mxu1 %v9126_v16  ;;  %6118 = vmatpush1.bf16.msra.mxu0 %v9169_v25  ;;  %v9213_v16 = vld [vmem:[%s9949_s9 + $0xae4] ss:$16 sps:$4 sm:$0xff]   ;;  %v9241_v25 = vld [vmem:[%s9949_s9 + $0xa40] ss:$16 sps:$4 sm:$0xff]  }
 0x598   : > { %6119 = vmatprep.subr.bf16.mxu0 %v9174_v28  ;;  %v9247_v28 = vld [vmem:[%s9949_s9 + $0xa20] ss:$16 sps:$4 sm:$0xff]  }
 0x59a   : > { %5279 = vmatpush1.bf16.msra.mxu1 %v9124_v20  ;;  %v9225_v20 = vld [vmem:[%s9949_s9 + $0xaa4] ss:$16 sps:$4 sm:$0xff]  }
 0x59b   : > { %5280 = vmatprep.subr.bf16.mxu1 %v9129_v22  ;;  %6120 = vmatpush1.bf16.msra.mxu0 %v9172_v30  ;;  %v9231_v22 = vld [vmem:[%s9949_s9 + $0xa84] ss:$16 sps:$4 sm:$0xff]   ;;  %v9253_v30 = vld [vmem:[%s9949_s9 + $0xa00] ss:$16 sps:$4 sm:$0xff]  }
 0x59c   : > { %6121 = vmatprep.subr.bf16.mxu0 %v9177_v32  ;;  %v9259_v32 = vld [vmem:[%s9949_s9 + $0xbe0] ss:$16 sps:$4 sm:$0xff]  }
 0x59e   : > { %5281 = vmatpush1.bf16.msra.mxu1 %v9127_v24  ;;  %v9237_v24 = vld [vmem:[%s9949_s9 + $0xa64] ss:$16 sps:$4 sm:$0xff]  }
 0x59f   : > { %5282 = vmatprep.subr.bf16.mxu1 %v9132_v27  ;;  %6122 = vmatpush1.bf16.msra.mxu0 %v9175_v33  ;;  %v9243_v27 = vld [vmem:[%s9949_s9 + $0xa44] ss:$16 sps:$4 sm:$0xff]   ;;  %v9265_v33 = vld [vmem:[%s9949_s9 + $0xbc0] ss:$16 sps:$4 sm:$0xff]  }
 0x5a0   : > { %6123 = vmatprep.subr.bf16.mxu0 %v9180_v35  ;;  %v9271_v35 = vld [vmem:[%s9949_s9 + $0xba0] ss:$16 sps:$4 sm:$0xff]  }
 0x5a2   : > { %5283 = vmatpush1.bf16.msra.mxu1 %v9130_v29  ;;  %v9249_v29 = vld [vmem:[%s9949_s9 + $0xa24] ss:$16 sps:$4 sm:$0xff]  }
 0x5a3   : > { %5284 = vmatprep.subr.bf16.mxu1 %v9135_v31  ;;  %6124 = vmatpush1.bf16.msra.mxu0 %v9178_v39  ;;  %v9255_v31 = vld [vmem:[%s9949_s9 + $0xa04] ss:$16 sps:$4 sm:$0xff]   ;;  %v9277_v39 = vld [vmem:[%s9949_s9 + $0xb80] ss:$16 sps:$4 sm:$0xff]  }
 0x5a4   : > { %6125 = vmatprep.subr.bf16.mxu0 %v9183_v38  ;;  %v9283_v38 = vld [vmem:[%s9949_s9 + $0xb60] ss:$16 sps:$4 sm:$0xff]  }
 0x5a6   : > { %5285 = vmatpush1.bf16.msra.mxu1 %v9133_v26  ;;  %v9261_v26 = vld [vmem:[%s9949_s9 + $0xbe4] ss:$16 sps:$4 sm:$0xff]  }
 0x5a7   : > { %5286 = vmatprep.subr.bf16.mxu1 %v9138_v34  ;;  %6126 = vmatpush1.bf16.msra.mxu0 %v9181_v44  ;;  %v9267_v34 = vld [vmem:[%s9949_s9 + $0xbc4] ss:$16 sps:$4 sm:$0xff]   ;;  %v9289_v44 = vld [vmem:[%s9949_s9 + $0xb40] ss:$16 sps:$4 sm:$0xff]  }
 0x5a8   : > { %6127 = vmatprep.subr.bf16.mxu0 %v9186_v46  ;;  %v9297_v46 = vld [vmem:[%s9949_s9 + $0xb24] ss:$16 sps:$4 sm:$0xff]  }
 0x5aa   : > { %5287 = vmatpush1.bf16.msra.mxu1 %v9136_v37  ;;  %v9273_v37 = vld [vmem:[%s9949_s9 + $0xba4] ss:$16 sps:$4 sm:$0xff]  }
 0x5ab   : > { %5288 = vmatprep.subr.bf16.mxu1 %v9141_v40  ;;  %6128 = vmatpush1.bf16.msra.mxu0 %v9184_v48  ;;  %v9279_v40 = vld [vmem:[%s9949_s9 + $0xb84] ss:$16 sps:$4 sm:$0xff]   ;;  %v9295_v48 = vld [vmem:[%s9949_s9 + $0xb20] ss:$16 sps:$4 sm:$0xff]  }
 0x5ac   : > { %6129 = vmatprep.subr.bf16.mxu0 %v9189_v42  ;;  %v9303_v42 = vld [vmem:[%s9949_s9 + $0xb04] ss:$16 sps:$4 sm:$0xff]  }
 0x5ae   : > { %5289 = vmatpush2.bf16.msra.mxu1 %v9139_v41  ;;  %v9285_v41 = vld [vmem:[%s9949_s9 + $0xb64] ss:$16 sps:$4 sm:$0xff]  }
 0x5af   : > { %5290 = vmatprep.subr.bf16.mxu1 %v9144_v45  ;;  %6130 = vmatpush2.bf16.msra.mxu0 %v9187_v52  ;;  %v9291_v45 = vld [vmem:[%s9949_s9 + $0xb44] ss:$16 sps:$4 sm:$0xff]   ;;  %v9301_v52 = vld [vmem:[%s9949_s9 + $0xb00] ss:$16 sps:$4 sm:$0xff]  }
 0x5b0   : > { %6131 = vmatprep.subr.bf16.mxu0 %v9192_v54  ;;  %v9309_v54 = vld [vmem:[%s9949_s9 + $0xaec] ss:$16 sps:$4 sm:$0xff]  }
 0x5b2   : > { %5291 = vmatpush2.bf16.msra.mxu1 %v9142_v47 }
 0x5b3   : > { %5292 = vmatprep.subr.bf16.mxu1 %v9147_v49  ;;  %6132 = vmatpush2.bf16.msra.mxu0 %v9190_v50 }
 0x5b4   : > { %6133 = vmatprep.subr.bf16.mxu0 %v9195_v56 }
 0x5b6   : > { %5293 = vmatpush2.bf16.msra.mxu1 %v9145_v51 }
 0x5b7   : > { %5294 = vmatprep.subr.bf16.mxu1 %v9150_v53  ;;  %6134 = vmatpush2.bf16.msra.mxu0 %v9193_v58 }
 0x5b8   : > { %6135 = vmatprep.subr.bf16.mxu0 %v9198_v60 }
 0x5ba   : > { %5295 = vmatpush2.bf16.msra.mxu1 %v9148_v55  ;;  %v10394_v55 = vld [vmem:[%s10238_s11 + $0x4] sm:$0xf] }
 0x5bb   : > { %5296 = vmatprep.subr.bf16.mxu1 %v9153_v43  ;;  %6136 = vmatpush2.bf16.msra.mxu0 %v9196_v62  ;;  %v4492_v50 = vrot.slane %v10394_v55, %v9955_v12  ;;  %v4496_v43 = vrot.slane %v10394_v55, %v9959_v14 }
 0x5bc   : > { %6137 = vmatprep.subr.bf16.mxu0 %v9201_v0 }
 0x5be   : > { %5297 = vmatpush2.bf16.msra.mxu1 %v9151_v57 }
 0x5bf   : > { %5298 = vmatprep.subr.bf16.mxu1 %v9156_v59  ;;  %6138 = vmatpush2.bf16.msra.mxu0 %v9199_v36 }
 0x5c0   : > { %6139 = vmatprep.subr.bf16.mxu0 %v9204_v4 }
 0x5c2   : > { %5299 = vmatpush2.bf16.msra.mxu1 %v9154_v61 }
 0x5c3   : > { %5300 = vmatprep.subr.bf16.mxu1 %v9159_v63  ;;  %6140 = vmatpush2.bf16.msra.mxu0 %v9202_v5 }
 0x5c4   : > { %6141 = vmatprep.subr.bf16.mxu0 %v9207_v6  ;;  %v9214_v6 = vld [vmem:[%s9949_s9 + $0x8e8] ss:$16 sps:$4 sm:$0xff]  }
 0x5c6   : > { %5301 = vmatpush2.bf16.msra.mxu1 %v9157_v1 }
 0x5c7   : > { %5302 = vmatprep.subr.bf16.mxu1 %v9162_v2  ;;  %6142 = vmatpush2.bf16.msra.mxu0 %v9205_v8 }
 0x5c8   : > { %6143 = vmatprep.subr.bf16.mxu0 %v9210_v9  ;;  %v9222_v9 = vld [vmem:[%s9949_s9 + $0x8cc] ss:$16 sps:$4 sm:$0xff]  }
 0x5ca   : > { %5303 = vmatpush2.bf16.msra.mxu1 %v9160_v3 }
 0x5cb   : > { %6144 = vmatpush2.bf16.msra.mxu0 %v9208_v10  ;;  %6154 = vmatprep.subr.bf16.mxu1 %v9213_v16  ;;  %v9220_v10 = vld [vmem:[%s9949_s9 + $0x8c8] ss:$16 sps:$4 sm:$0xff]  }
 0x5cc   : > { %6195 = vmatprep.subr.bf16.mxu0 %v9216_v17  ;;  %v9226_v16 = vld [vmem:[%s9949_s9 + $0x8a8] ss:$16 sps:$4 sm:$0xff]   ;;  %v9234_v17 = vld [vmem:[%s9949_s9 + $0x88c] ss:$16 sps:$4 sm:$0xff]  }
 0x5cd   : > { %5305 = vmatmul.mubr.bf16.vlgmr.msra.gmra.mxu1 %v10292_v7  ;;  %v9217_v7 = vld [vmem:[%s9949_s9 + $0xac0] ss:$16 sps:$4 sm:$0xff]  }
 0x5ce   : > { %6155 = vmatpush1.bf16.msra.mxu1 %v9211_v11  ;;  %v9228_v11 = vld [vmem:[%s9949_s9 + $0x8ac] ss:$16 sps:$4 sm:$0xff]  }
 0x5cf   : > { %6156 = vmatprep.subr.bf16.mxu1 %v9219_v18  ;;  %v9240_v18 = vld [vmem:[%s9949_s9 + $0x86c] ss:$16 sps:$4 sm:$0xff]  }
 0x5d2   : > { %6157 = vmatpush1.bf16.msra.mxu1 %v9217_v7  ;;  %v9232_v7 = vld [vmem:[%s9949_s9 + $0x888] ss:$16 sps:$4 sm:$0xff]  }
 0x5d3   : > { %6158 = vmatprep.subr.bf16.mxu1 %v9225_v20  ;;  %v9246_v20 = vld [vmem:[%s9949_s9 + $0x84c] ss:$16 sps:$4 sm:$0xff]  }
 0x5d6   : > { %6159 = vmatpush1.bf16.msra.mxu1 %v9223_v19  ;;  %v9238_v19 = vld [vmem:[%s9949_s9 + $0x868] ss:$16 sps:$4 sm:$0xff]  }
 0x5d7   : > { %6160 = vmatprep.subr.bf16.mxu1 %v9231_v22  ;;  %v9252_v22 = vld [vmem:[%s9949_s9 + $0x82c] ss:$16 sps:$4 sm:$0xff]  }
 0x5da   : > { %6161 = vmatpush1.bf16.msra.mxu1 %v9229_v21  ;;  %v9244_v21 = vld [vmem:[%s9949_s9 + $0x848] ss:$16 sps:$4 sm:$0xff]  }
 0x5db   : > { %6162 = vmatprep.subr.bf16.mxu1 %v9237_v24  ;;  %v9258_v24 = vld [vmem:[%s9949_s9 + $0x80c] ss:$16 sps:$4 sm:$0xff]  }
 0x5de   : > { %6163 = vmatpush1.bf16.msra.mxu1 %v9235_v23  ;;  %v9250_v23 = vld [vmem:[%s9949_s9 + $0x828] ss:$16 sps:$4 sm:$0xff]  }
 0x5df   : > { %6164 = vmatprep.subr.bf16.mxu1 %v9243_v27  ;;  %v9264_v27 = vld [vmem:[%s9949_s9 + $0x9ec] ss:$16 sps:$4 sm:$0xff]  }
 0x5e2   : > { %6165 = vmatpush1.bf16.msra.mxu1 %v9241_v25  ;;  %v9256_v25 = vld [vmem:[%s9949_s9 + $0x808] ss:$16 sps:$4 sm:$0xff]  }
 0x5e3   : > { %6166 = vmatprep.subr.bf16.mxu1 %v9249_v29  ;;  %v9270_v29 = vld [vmem:[%s9949_s9 + $0x9cc] ss:$16 sps:$4 sm:$0xff]  }
 0x5e6   : > { %6167 = vmatpush1.bf16.msra.mxu1 %v9247_v28  ;;  %v9262_v28 = vld [vmem:[%s9949_s9 + $0x9e8] ss:$16 sps:$4 sm:$0xff]  }
 0x5e7   : > { %6168 = vmatprep.subr.bf16.mxu1 %v9255_v31  ;;  %v9276_v31 = vld [vmem:[%s9949_s9 + $0x9ac] ss:$16 sps:$4 sm:$0xff]  }
 0x5ea   : > { %6169 = vmatpush1.bf16.msra.mxu1 %v9253_v30  ;;  %v9268_v30 = vld [vmem:[%s9949_s9 + $0x9c8] ss:$16 sps:$4 sm:$0xff]  }
 0x5eb   : > { %6170 = vmatprep.subr.bf16.mxu1 %v9261_v26  ;;  %v9282_v26 = vld [vmem:[%s9949_s9 + $0x98c] ss:$16 sps:$4 sm:$0xff]  }
 0x5ee   : > { %6171 = vmatpush2.bf16.msra.mxu1 %v9259_v32  ;;  %v9274_v32 = vld [vmem:[%s9949_s9 + $0x9a8] ss:$16 sps:$4 sm:$0xff]  }
 0x5ef   : > { %6172 = vmatprep.subr.bf16.mxu1 %v9267_v34  ;;  %v9288_v34 = vld [vmem:[%s9949_s9 + $0x96c] ss:$16 sps:$4 sm:$0xff]  }
 0x5f2   : > { %6173 = vmatpush2.bf16.msra.mxu1 %v9265_v33  ;;  %v9280_v33 = vld [vmem:[%s9949_s9 + $0x988] ss:$16 sps:$4 sm:$0xff]  }
 0x5f3   : > { %6174 = vmatprep.subr.bf16.mxu1 %v9273_v37  ;;  %v9294_v37 = vld [vmem:[%s9949_s9 + $0x94c] ss:$16 sps:$4 sm:$0xff]  }
 0x5f6   : > { %6175 = vmatpush2.bf16.msra.mxu1 %v9271_v35  ;;  %v9286_v35 = vld [vmem:[%s9949_s9 + $0x968] ss:$16 sps:$4 sm:$0xff]  }
 0x5f7   : > { %6176 = vmatprep.subr.bf16.mxu1 %v9279_v40  ;;  %v9292_v40 = vld [vmem:[%s9949_s9 + $0x948] ss:$16 sps:$4 sm:$0xff]  }
 0x5fa   : > { %6177 = vmatpush2.bf16.msra.mxu1 %v9277_v39  ;;  %v4500_v39 = vrot.slane %v10394_v55, %v9957_v13 }
 0x5fb   : > { %6178 = vmatprep.subr.bf16.mxu1 %v9285_v41  ;;  %v4504_v41 = vrot.slane %v10394_v55, %v9961_v15 }
 0x5fe   : > { %6179 = vmatpush2.bf16.msra.mxu1 %v9283_v38  ;;  %v9300_v38 = vld [vmem:[%s9949_s9 + $0x92c] ss:$16 sps:$4 sm:$0xff]  }
 0x5ff   : > { %6180 = vmatprep.subr.bf16.mxu1 %v9291_v45  ;;  %v9298_v45 = vld [vmem:[%s9949_s9 + $0x928] ss:$16 sps:$4 sm:$0xff]  }
 0x602   : > { %6181 = vmatpush2.bf16.msra.mxu1 %v9289_v44 }
 0x603   : > { %6182 = vmatprep.subr.bf16.mxu1 %v9297_v46 }
 0x606   : > { %6183 = vmatpush2.bf16.msra.mxu1 %v9295_v48 }
 0x607   : > { %6184 = vmatprep.subr.bf16.mxu1 %v9303_v42 }
 0x60a   : > { %6185 = vmatpush2.bf16.msra.mxu1 %v9301_v52  ;;  %v9304_v52 = vld [vmem:[%s9949_s9 + $0x908] ss:$16 sps:$4 sm:$0xff]  }
 0x60b   : > { %6236 = vmatprep.subr.bf16.mxu1 %v9309_v54 }
 0x60d   : > { %v5183_v47 = vpop.f32.mrf.mxu0 }
 0x60e   : > { %v5184_v56 = vadd.f32 %v5183_v47, %v4492_v50  ;;  %v9306_v47 = vld [vmem:[%s9949_s9 + $0x90c] ss:$16 sps:$4 sm:$0xff]  }
 0x60f   : > { %v5185_v49 = vpop.f32.mrf.mxu0 }
 0x610   : > { %v5186_v59 = vadd.f32 %v5185_v49, %v4496_v43 }
 0x611   : > { %v5187_v51 = vpop.f32.mrf.mxu0 }
 0x613   : > { %v5188_v53 = vpop.f32.mrf.mxu0 }
 0x64d   : > { %v5224_v57 = vpop.f32.mrf.mxu1  ;;  %v10400_v58 = vpop.f32.mrf.mxu0 }
 0x64e   : > { %v5225_v60 = vadd.f32 %v5224_v57, %v5184_v56  ;;  %v5266_v44 = vadd.f32 %v10400_v58, %v4500_v39  ;;  %v9307_v56 = vld [vmem:[%s9949_s9 + $0xae8] ss:$16 sps:$4 sm:$0xff]   ;;  %v9312_v58 = vld [vmem:[%s9949_s9 + $0xacc] ss:$16 sps:$4 sm:$0xff]  }
 0x64f   : > { %v5226_v61 = vpop.f32.mrf.mxu1  ;;  %v10402_v62 = vpop.f32.mrf.mxu0  ;;  %v9340_v39 = vld [vmem:[%s9949_s9 + $0xb88] ss:$16 sps:$4 sm:$0xff]  }
 0x650   : > { %v5227_v63 = vadd.f32 %v5226_v61, %v5186_v59  ;;  %v5313_v0 = vmax.f32 %v5225_v60, 0.0  ;;  %v5268_v48 = vadd.f32 %v10402_v62, %v4504_v41  ;;  %v9310_v59 = vld [vmem:[%s9949_s9 + $0xac8] ss:$16 sps:$4 sm:$0xff]   ;;  %v9315_v60 = vld [vmem:[%s9949_s9 + $0xaac] ss:$16 sps:$4 sm:$0xff]  }
 0x651   : > { %v5228_v1 = vpop.f32.mrf.mxu1  ;;  %v5269_v36 = vpop.f32.mrf.mxu0  ;;  %v9313_v61 = vld [vmem:[%s9949_s9 + $0xaa8] ss:$16 sps:$4 sm:$0xff]   ;;  %v9318_v62 = vld [vmem:[%s9949_s9 + $0xa8c] ss:$16 sps:$4 sm:$0xff]   ;;  %v9387_v41 = vld [vmem:[%s9949_s9 + $0xda4] ss:$16 sps:$4 sm:$0xff]  }
 0x652   : > { %v5314_v2 = vmax.f32 %v5227_v63, 0.0  ;;  %v10405_v8 = vpack.c.bf16 %v5313_v0, %v5313_v0  ;;  %v9355_v63 = vld [vmem:[%s9949_s9 + $0xce0] ss:$16 sps:$4 sm:$0xff]   ;;  %v9357_v0 = vld [vmem:[%s9949_s9 + $0xce4] ss:$16 sps:$4 sm:$0xff]  }
 0x653   : > { %v5229_v4 = vpop.f32.mrf.mxu1  ;;  %v5270_v3 = vpop.f32.mrf.mxu0  ;;  %v9360_v1 = vld [vmem:[%s9949_s9 + $0xcc4] ss:$16 sps:$4 sm:$0xff]   ;;  %v9316_v36 = vld [vmem:[%s9949_s9 + $0xa88] ss:$16 sps:$4 sm:$0xff]  }
 0x654   : > { %v5318_v5 = vpack.c.bf16 %v5314_v2, %v5314_v2  ;;  %v9358_v2 = vld [vmem:[%s9949_s9 + $0xcc0] ss:$16 sps:$4 sm:$0xff]   ;;  %v9321_v4 = vld [vmem:[%s9949_s9 + $0xa6c] ss:$16 sps:$4 sm:$0xff]   ;;  %v9363_v3 = vld [vmem:[%s9949_s9 + $0xca4] ss:$16 sps:$4 sm:$0xff]  }
 0x656   : > { %6145 = vmatprep.mubr.bf16.mxu0 %v5318_v5 }
 0x657   : > { %6146 = vmatmul.mubr.bf16.vlgmr.msra.gmra.mxu0 %v10405_v8 }
 0x658   : > { %6196 = vmatpush1.bf16.msra.mxu0 %v9214_v6  ;;  %6227 = vmatprep.mubr.bf16.mxu0 %v5318_v5  ;;  %v9319_v5 = vld [vmem:[%s9949_s9 + $0xa68] ss:$16 sps:$4 sm:$0xff]   ;;  %v9361_v6 = vld [vmem:[%s9949_s9 + $0xca0] ss:$16 sps:$4 sm:$0xff]  }
 0x659   : > { %6197 = vmatprep.subr.bf16.mxu0 %v9222_v9  ;;  %v9366_v9 = vld [vmem:[%s9949_s9 + $0xc84] ss:$16 sps:$4 sm:$0xff]  }
 0x65c   : > { %6198 = vmatpush1.bf16.msra.mxu0 %v9220_v10  ;;  %v9322_v10 = vld [vmem:[%s9949_s9 + $0xa48] ss:$16 sps:$4 sm:$0xff]  }
 0x65d   : > { %6199 = vmatprep.subr.bf16.mxu0 %v9228_v11  ;;  %v9364_v11 = vld [vmem:[%s9949_s9 + $0xc80] ss:$16 sps:$4 sm:$0xff]  }
 0x660   : > { %6200 = vmatpush1.bf16.msra.mxu0 %v9226_v16  ;;  %v9327_v16 = vld [vmem:[%s9949_s9 + $0xa2c] ss:$16 sps:$4 sm:$0xff]  }
 0x661   : > { %6201 = vmatprep.subr.bf16.mxu0 %v9234_v17  ;;  %v9369_v17 = vld [vmem:[%s9949_s9 + $0xc64] ss:$16 sps:$4 sm:$0xff]  }
 0x664   : > { %6202 = vmatpush1.bf16.msra.mxu0 %v9232_v7  ;;  %v9325_v7 = vld [vmem:[%s9949_s9 + $0xa28] ss:$16 sps:$4 sm:$0xff]  }
 0x665   : > { %6203 = vmatprep.subr.bf16.mxu0 %v9240_v18  ;;  %v9367_v18 = vld [vmem:[%s9949_s9 + $0xc60] ss:$16 sps:$4 sm:$0xff]  }
 0x668   : > { %6204 = vmatpush1.bf16.msra.mxu0 %v9238_v19  ;;  %v9330_v19 = vld [vmem:[%s9949_s9 + $0xa0c] ss:$16 sps:$4 sm:$0xff]  }
 0x669   : > { %6205 = vmatprep.subr.bf16.mxu0 %v9246_v20  ;;  %v9372_v20 = vld [vmem:[%s9949_s9 + $0xc44] ss:$16 sps:$4 sm:$0xff]  }
 0x66c   : > { %6206 = vmatpush1.bf16.msra.mxu0 %v9244_v21  ;;  %v9328_v21 = vld [vmem:[%s9949_s9 + $0xa08] ss:$16 sps:$4 sm:$0xff]  }
 0x66d   : > { %6207 = vmatprep.subr.bf16.mxu0 %v9252_v22  ;;  %v9370_v22 = vld [vmem:[%s9949_s9 + $0xc40] ss:$16 sps:$4 sm:$0xff]  }
 0x670   : > { %6208 = vmatpush1.bf16.msra.mxu0 %v9250_v23  ;;  %v9333_v23 = vld [vmem:[%s9949_s9 + $0xbec] ss:$16 sps:$4 sm:$0xff]  }
 0x671   : > { %6209 = vmatprep.subr.bf16.mxu0 %v9258_v24  ;;  %v9375_v24 = vld [vmem:[%s9949_s9 + $0xc24] ss:$16 sps:$4 sm:$0xff]  }
 0x674   : > { %6210 = vmatpush1.bf16.msra.mxu0 %v9256_v25  ;;  %v9331_v25 = vld [vmem:[%s9949_s9 + $0xbe8] ss:$16 sps:$4 sm:$0xff]  }
 0x675   : > { %6211 = vmatprep.subr.bf16.mxu0 %v9264_v27  ;;  %v9373_v27 = vld [vmem:[%s9949_s9 + $0xc20] ss:$16 sps:$4 sm:$0xff]  }
 0x678   : > { %6212 = vmatpush2.bf16.msra.mxu0 %v9262_v28  ;;  %v9336_v28 = vld [vmem:[%s9949_s9 + $0xbcc] ss:$16 sps:$4 sm:$0xff]  }
 0x679   : > { %6213 = vmatprep.subr.bf16.mxu0 %v9270_v29  ;;  %v9378_v29 = vld [vmem:[%s9949_s9 + $0xc04] ss:$16 sps:$4 sm:$0xff]  }
 0x67c   : > { %6214 = vmatpush2.bf16.msra.mxu0 %v9268_v30  ;;  %v9334_v30 = vld [vmem:[%s9949_s9 + $0xbc8] ss:$16 sps:$4 sm:$0xff]  }
 0x67d   : > { %6215 = vmatprep.subr.bf16.mxu0 %v9276_v31  ;;  %v9376_v31 = vld [vmem:[%s9949_s9 + $0xc00] ss:$16 sps:$4 sm:$0xff]  }
 0x680   : > { %6216 = vmatpush2.bf16.msra.mxu0 %v9274_v32  ;;  %v9339_v32 = vld [vmem:[%s9949_s9 + $0xbac] ss:$16 sps:$4 sm:$0xff]  }
 0x681   : > { %6217 = vmatprep.subr.bf16.mxu0 %v9282_v26  ;;  %v9381_v26 = vld [vmem:[%s9949_s9 + $0xde4] ss:$16 sps:$4 sm:$0xff]  }
 0x684   : > { %6218 = vmatpush2.bf16.msra.mxu0 %v9280_v33  ;;  %v9337_v33 = vld [vmem:[%s9949_s9 + $0xba8] ss:$16 sps:$4 sm:$0xff]  }
 0x685   : > { %6219 = vmatprep.subr.bf16.mxu0 %v9288_v34  ;;  %v9379_v34 = vld [vmem:[%s9949_s9 + $0xde0] ss:$16 sps:$4 sm:$0xff]  }
 0x688   : > { %6220 = vmatpush2.bf16.msra.mxu0 %v9286_v35  ;;  %v9342_v35 = vld [vmem:[%s9949_s9 + $0xb8c] ss:$16 sps:$4 sm:$0xff]  }
 0x689   : > { %6221 = vmatprep.subr.bf16.mxu0 %v9294_v37  ;;  %v9384_v37 = vld [vmem:[%s9949_s9 + $0xdc4] ss:$16 sps:$4 sm:$0xff]  }
 0x68c   : > { %6222 = vmatpush2.bf16.msra.mxu0 %v9292_v40  ;;  %v9382_v40 = vld [vmem:[%s9949_s9 + $0xdc0] ss:$16 sps:$4 sm:$0xff]  }
 0x68d   : > { %v5306_v46 = vpop.f32.mrf.mxu1  ;;  %6223 = vmatprep.subr.bf16.mxu0 %v9300_v38  ;;  %v9345_v38 = vld [vmem:[%s9949_s9 + $0xb6c] ss:$16 sps:$4 sm:$0xff]  }
 0x68e   : > { %v5307_v49 = vadd.f32 %v5306_v46, %v5266_v44  ;;  %v9343_v44 = vld [vmem:[%s9949_s9 + $0xb68] ss:$16 sps:$4 sm:$0xff]   ;;  %v9348_v46 = vld [vmem:[%s9949_s9 + $0xb4c] ss:$16 sps:$4 sm:$0xff]  }
 0x68f   : > { %v5308_v42 = vpop.f32.mrf.mxu1 }
 0x690   : > { %v5309_v51 = vadd.f32 %v5308_v42, %v5268_v48  ;;  %6224 = vmatpush2.bf16.msra.mxu0 %v9298_v45  ;;  %v5315_v53 = vmax.f32 %v5307_v49, 0.0  ;;  %v9385_v45 = vld [vmem:[%s9949_s9 + $0xda0] ss:$16 sps:$4 sm:$0xff]   ;;  %v9346_v48 = vld [vmem:[%s9949_s9 + $0xb48] ss:$16 sps:$4 sm:$0xff]  }
 0x691   : > { %v5310_v54 = vpop.f32.mrf.mxu1  ;;  %6225 = vmatprep.subr.bf16.mxu0 %v9306_v47  ;;  %v9390_v47 = vld [vmem:[%s9949_s9 + $0xd84] ss:$16 sps:$4 sm:$0xff]   ;;  %v9388_v49 = vld [vmem:[%s9949_s9 + $0xd80] ss:$16 sps:$4 sm:$0xff]   ;;  %v9351_v42 = vld [vmem:[%s9949_s9 + $0xb2c] ss:$16 sps:$4 sm:$0xff]  }
 0x692   : > { %v5316_v55 = vmax.f32 %v5309_v51, 0.0  ;;  %v10445_v57 = vpack.c.bf16 %v5315_v53, %v5315_v53  ;;  %v9393_v51 = vld [vmem:[%s9949_s9 + $0xd64] ss:$16 sps:$4 sm:$0xff]   ;;  %v9391_v53 = vld [vmem:[%s9949_s9 + $0xd60] ss:$16 sps:$4 sm:$0xff]  }
 0x693   : > { %v5311_v50 = vpop.f32.mrf.mxu1  ;;  %v9354_v54 = vld [vmem:[%s9949_s9 + $0xb0c] ss:$16 sps:$4 sm:$0xff]  }
 0x694   : > { %v5320_v43 = vpack.c.bf16 %v5316_v55, %v5316_v55  ;;  %6226 = vmatpush2.bf16.msra.mxu0 %v9304_v52  ;;  %v9349_v52 = vld [vmem:[%s9949_s9 + $0xb28] ss:$16 sps:$4 sm:$0xff]   ;;  %v9396_v55 = vld [vmem:[%s9949_s9 + $0xd44] ss:$16 sps:$4 sm:$0xff]  }
 0x695   : > { %6683 = vmatprep.subr.bf16.mxu0 %v9357_v0  ;;  %v9352_v50 = vld [vmem:[%s9949_s9 + $0xb08] ss:$16 sps:$4 sm:$0xff]   ;;  %v9411_v0 = vld [vmem:[%s9949_s9 + $0xea4] ss:$16 sps:$4 sm:$0xff]  }
 0x696   : > { %6186 = vmatprep.mubr.bf16.mxu1 %v5320_v43 }
 0x697   : > { %6187 = vmatmul.mubr.bf16.vlgmr.msra.gmra.mxu1 %v10445_v57  ;;  %6228 = vmatmul.mubr.bf16.vlgmr.msra.gmra.mxu0 %v10405_v8  ;;  %v9324_v8 = vld [vmem:[%s9949_s9 + $0xa4c] ss:$16 sps:$4 sm:$0xff]  }
 0x698   : > { %6237 = vmatpush1.bf16.msra.mxu1 %v9307_v56  ;;  %6268 = vmatprep.mubr.bf16.mxu1 %v5320_v43  ;;  %v9394_v43 = vld [vmem:[%s9949_s9 + $0xd40] ss:$16 sps:$4 sm:$0xff]   ;;  %v9399_v56 = vld [vmem:[%s9949_s9 + $0xd24] ss:$16 sps:$4 sm:$0xff]  }
 0x699   : > { %6238 = vmatprep.subr.bf16.mxu1 %v9312_v58  ;;  %6684 = vmatpush1.bf16.msra.mxu0 %v9355_v63  ;;  %v9397_v58 = vld [vmem:[%s9949_s9 + $0xd20] ss:$16 sps:$4 sm:$0xff]   ;;  %v9408_v63 = vld [vmem:[%s9949_s9 + $0xec4] ss:$16 sps:$4 sm:$0xff]  }
 0x69a   : > { %6685 = vmatprep.subr.bf16.mxu0 %v9360_v1  ;;  %v9409_v1 = vld [vmem:[%s9949_s9 + $0xea0] ss:$16 sps:$4 sm:$0xff]  }
 0x69c   : > { %6239 = vmatpush1.bf16.msra.mxu1 %v9310_v59  ;;  %v9402_v59 = vld [vmem:[%s9949_s9 + $0xd04] ss:$16 sps:$4 sm:$0xff]  }
 0x69d   : > { %6240 = vmatprep.subr.bf16.mxu1 %v9315_v60  ;;  %6686 = vmatpush1.bf16.msra.mxu0 %v9358_v2  ;;  %v9400_v60 = vld [vmem:[%s9949_s9 + $0xd00] ss:$16 sps:$4 sm:$0xff]  }
 0x69e   : > { %6687 = vmatprep.subr.bf16.mxu0 %v9363_v3  ;;  %v9412_v2 = vld [vmem:[%s9949_s9 + $0xe80] ss:$16 sps:$4 sm:$0xff]  }
 0x69f   : > { %v9415_v3 = vld [vmem:[%s9949_s9 + $0xe60] ss:$16 sps:$4 sm:$0xff]  }
 0x6a0   : > { %6241 = vmatpush1.bf16.msra.mxu1 %v9313_v61  ;;  %v9405_v61 = vld [vmem:[%s9949_s9 + $0xee4] ss:$16 sps:$4 sm:$0xff]  }
 0x6a1   : > { %6242 = vmatprep.subr.bf16.mxu1 %v9318_v62  ;;  %6688 = vmatpush1.bf16.msra.mxu0 %v9361_v6  ;;  %v9403_v62 = vld [vmem:[%s9949_s9 + $0xee0] ss:$16 sps:$4 sm:$0xff]  }
 0x6a2   : > { %6689 = vmatprep.subr.bf16.mxu0 %v9366_v9  ;;  %v9418_v6 = vld [vmem:[%s9949_s9 + $0xe40] ss:$16 sps:$4 sm:$0xff]  }
 0x6a3   : > { %v9421_v9 = vld [vmem:[%s9949_s9 + $0xe20] ss:$16 sps:$4 sm:$0xff]  }
 0x6a4   : > { %6243 = vmatpush1.bf16.msra.mxu1 %v9316_v36  ;;  %v9414_v36 = vld [vmem:[%s9949_s9 + $0xe84] ss:$16 sps:$4 sm:$0xff]  }
 0x6a5   : > { %6244 = vmatprep.subr.bf16.mxu1 %v9321_v4  ;;  %6690 = vmatpush1.bf16.msra.mxu0 %v9364_v11  ;;  %v9417_v4 = vld [vmem:[%s9949_s9 + $0xe64] ss:$16 sps:$4 sm:$0xff]   ;;  %v9424_v11 = vld [vmem:[%s9949_s9 + $0xe00] ss:$16 sps:$4 sm:$0xff]  }
 0x6a6   : > { %6691 = vmatprep.subr.bf16.mxu0 %v9369_v17  ;;  %v9427_v17 = vld [vmem:[%s9949_s9 + $0xfe0] ss:$16 sps:$4 sm:$0xff]  }
 0x6a8   : > { %6245 = vmatpush1.bf16.msra.mxu1 %v9319_v5  ;;  %v9420_v5 = vld [vmem:[%s9949_s9 + $0xe44] ss:$16 sps:$4 sm:$0xff]  }
 0x6a9   : > { %6246 = vmatprep.subr.bf16.mxu1 %v9324_v8  ;;  %6692 = vmatpush1.bf16.msra.mxu0 %v9367_v18  ;;  %v9423_v8 = vld [vmem:[%s9949_s9 + $0xe24] ss:$16 sps:$4 sm:$0xff]   ;;  %v9430_v18 = vld [vmem:[%s9949_s9 + $0xfc0] ss:$16 sps:$4 sm:$0xff]  }
 0x6aa   : > { %6693 = vmatprep.subr.bf16.mxu0 %v9372_v20  ;;  %v9433_v20 = vld [vmem:[%s9949_s9 + $0xfa0] ss:$16 sps:$4 sm:$0xff]  }
 0x6ac   : > { %6247 = vmatpush1.bf16.msra.mxu1 %v9322_v10  ;;  %v9426_v10 = vld [vmem:[%s9949_s9 + $0xe04] ss:$16 sps:$4 sm:$0xff]  }
 0x6ad   : > { %6248 = vmatprep.subr.bf16.mxu1 %v9327_v16  ;;  %6694 = vmatpush1.bf16.msra.mxu0 %v9370_v22  ;;  %v9429_v16 = vld [vmem:[%s9949_s9 + $0xfe4] ss:$16 sps:$4 sm:$0xff]   ;;  %v9436_v22 = vld [vmem:[%s9949_s9 + $0xf80] ss:$16 sps:$4 sm:$0xff]  }
 0x6ae   : > { %6695 = vmatprep.subr.bf16.mxu0 %v9375_v24  ;;  %v9439_v24 = vld [vmem:[%s9949_s9 + $0xf60] ss:$16 sps:$4 sm:$0xff]  }
 0x6b0   : > { %6249 = vmatpush1.bf16.msra.mxu1 %v9325_v7  ;;  %v9432_v7 = vld [vmem:[%s9949_s9 + $0xfc4] ss:$16 sps:$4 sm:$0xff]  }
 0x6b1   : > { %6250 = vmatprep.subr.bf16.mxu1 %v9330_v19  ;;  %6696 = vmatpush1.bf16.msra.mxu0 %v9373_v27  ;;  %v9435_v19 = vld [vmem:[%s9949_s9 + $0xfa4] ss:$16 sps:$4 sm:$0xff]   ;;  %v9442_v27 = vld [vmem:[%s9949_s9 + $0xf40] ss:$16 sps:$4 sm:$0xff]  }
 0x6b2   : > { %6697 = vmatprep.subr.bf16.mxu0 %v9378_v29  ;;  %v9447_v29 = vld [vmem:[%s9949_s9 + $0xf24] ss:$16 sps:$4 sm:$0xff]  }
 0x6b4   : > { %6251 = vmatpush1.bf16.msra.mxu1 %v9328_v21  ;;  %v9438_v21 = vld [vmem:[%s9949_s9 + $0xf84] ss:$16 sps:$4 sm:$0xff]  }
 0x6b5   : > { %6252 = vmatprep.subr.bf16.mxu1 %v9333_v23  ;;  %6698 = vmatpush1.bf16.msra.mxu0 %v9376_v31  ;;  %v9441_v23 = vld [vmem:[%s9949_s9 + $0xf64] ss:$16 sps:$4 sm:$0xff]  }
 0x6b6   : > { %6699 = vmatprep.subr.bf16.mxu0 %v9381_v26  ;;  %v9450_v26 = vld [vmem:[%s9949_s9 + $0xf04] ss:$16 sps:$4 sm:$0xff]  }
 0x6b8   : > { %6253 = vmatpush2.bf16.msra.mxu1 %v9331_v25  ;;  %v9444_v25 = vld [vmem:[%s9949_s9 + $0xf44] ss:$16 sps:$4 sm:$0xff]  }
 0x6b9   : > { %6254 = vmatprep.subr.bf16.mxu1 %v9336_v28  ;;  %6700 = vmatpush2.bf16.msra.mxu0 %v9379_v34 }
 0x6ba   : > { %6701 = vmatprep.subr.bf16.mxu0 %v9384_v37 }
 0x6bc   : > { %6255 = vmatpush2.bf16.msra.mxu1 %v9334_v30  ;;  %v9445_v30 = vld [vmem:[%s9949_s9 + $0xf20] ss:$16 sps:$4 sm:$0xff]  }
 0x6bd   : > { %6256 = vmatprep.subr.bf16.mxu1 %v9339_v32  ;;  %6702 = vmatpush2.bf16.msra.mxu0 %v9382_v40 }
 0x6be   : > { %6703 = vmatprep.subr.bf16.mxu0 %v9387_v41 }
 0x6c0   : > { %6257 = vmatpush2.bf16.msra.mxu1 %v9337_v33  ;;  %v9448_v33 = vld [vmem:[%s9949_s9 + $0xf00] ss:$16 sps:$4 sm:$0xff]  }
 0x6c1   : > { %6258 = vmatprep.subr.bf16.mxu1 %v9342_v35  ;;  %6704 = vmatpush2.bf16.msra.mxu0 %v9385_v45  ;;  %v7834_v35 = vld [vmem:[%s10238_s11 + $0x8] sm:$0xf] }
 0x6c2   : > { %6705 = vmatprep.subr.bf16.mxu0 %v9390_v47  ;;  %v5456_v37 = vrot.slane %v7834_v35, %v9955_v12 }
 0x6c4   : > { %6259 = vmatpush2.bf16.msra.mxu1 %v9340_v39  ;;  %v5460_v39 = vrot.slane %v7834_v35, %v9959_v14 }
 0x6c5   : > { %6260 = vmatprep.subr.bf16.mxu1 %v9345_v38  ;;  %6706 = vmatpush2.bf16.msra.mxu0 %v9388_v49 }
 0x6c6   : > { %6707 = vmatprep.subr.bf16.mxu0 %v9393_v51 }
 0x6c8   : > { %6261 = vmatpush2.bf16.msra.mxu1 %v9343_v44 }
 0x6c9   : > { %6262 = vmatprep.subr.bf16.mxu1 %v9348_v46  ;;  %6708 = vmatpush2.bf16.msra.mxu0 %v9391_v53 }
 0x6ca   : > { %6709 = vmatprep.subr.bf16.mxu0 %v9396_v55 }
 0x6cc   : > { %6263 = vmatpush2.bf16.msra.mxu1 %v9346_v48 }
 0x6cd   : > { %6264 = vmatprep.subr.bf16.mxu1 %v9351_v42  ;;  %6710 = vmatpush2.bf16.msra.mxu0 %v9394_v43  ;;  %v5464_v43 = vrot.slane %v7834_v35, %v9957_v13 }
 0x6ce   : > { %6711 = vmatprep.subr.bf16.mxu0 %v9399_v56  ;;  %v5468_v56 = vrot.slane %v7834_v35, %v9961_v15 }
 0x6d0   : > { %6265 = vmatpush2.bf16.msra.mxu1 %v9349_v52 }
 0x6d1   : > { %6266 = vmatprep.subr.bf16.mxu1 %v9354_v54  ;;  %6712 = vmatpush2.bf16.msra.mxu0 %v9397_v58 }
 0x6d2   : > { %6713 = vmatprep.subr.bf16.mxu0 %v9402_v59 }
 0x6d4   : > { %6267 = vmatpush2.bf16.msra.mxu1 %v9352_v50 }
 0x6d5   : > { %6714 = vmatpush2.bf16.msra.mxu0 %v9400_v60  ;;  %6724 = vmatprep.subr.bf16.mxu1 %v9405_v61 }
 0x6d7   : > { %6269 = vmatmul.mubr.bf16.vlgmr.msra.gmra.mxu1 %v10445_v57  ;;  %v9406_v57 = vld [vmem:[%s9949_s9 + $0xec0] ss:$16 sps:$4 sm:$0xff]  }
 0x6d8   : > { %6725 = vmatpush1.bf16.msra.mxu1 %v9403_v62 }
 0x6d9   : > { %6726 = vmatprep.subr.bf16.mxu1 %v9408_v63 }
 0x6dc   : > { %6727 = vmatpush1.bf16.msra.mxu1 %v9406_v57 }
 0x6dd   : > { %6728 = vmatprep.subr.bf16.mxu1 %v9411_v0 }
 0x6e0   : > { %6729 = vmatpush1.bf16.msra.mxu1 %v9409_v1 }
 0x6e1   : > { %6730 = vmatprep.subr.bf16.mxu1 %v9414_v36 }
 0x6e4   : > { %6731 = vmatpush1.bf16.msra.mxu1 %v9412_v2 }
 0x6e5   : > { %6732 = vmatprep.subr.bf16.mxu1 %v9417_v4 }
 0x6e8   : > { %6733 = vmatpush1.bf16.msra.mxu1 %v9415_v3 }
 0x6e9   : > { %6734 = vmatprep.subr.bf16.mxu1 %v9420_v5 }
 0x6ec   : > { %6735 = vmatpush1.bf16.msra.mxu1 %v9418_v6  ;;  %v8027_v6 = vld [vmem:[%s10238_s11 + $0xc] sm:$0xf] }
 0x6ed   : > { %6736 = vmatprep.subr.bf16.mxu1 %v9423_v8  ;;  %v6356_v8 = vrot.slane %v8027_v6, %v9955_v12 }
 0x6f0   : > { %6737 = vmatpush1.bf16.msra.mxu1 %v9421_v9  ;;  %v6360_v9 = vrot.slane %v8027_v6, %v9959_v14 }
 0x6f1   : > { %6738 = vmatprep.subr.bf16.mxu1 %v9426_v10 }
 0x6f4   : > { %6739 = vmatpush1.bf16.msra.mxu1 %v9424_v11 }
 0x6f5   : > { %6740 = vmatprep.subr.bf16.mxu1 %v9429_v16 }
 0x6f8   : > { %6741 = vmatpush2.bf16.msra.mxu1 %v9427_v17 }
 0x6f9   : > { %6742 = vmatprep.subr.bf16.mxu1 %v9432_v7 }
 0x6fc   : > { %6743 = vmatpush2.bf16.msra.mxu1 %v9430_v18 }
 0x6fd   : > { %6744 = vmatprep.subr.bf16.mxu1 %v9435_v19 }
 0x700   : > { %6745 = vmatpush2.bf16.msra.mxu1 %v9433_v20 }
 0x701   : > { %6746 = vmatprep.subr.bf16.mxu1 %v9438_v21 }
 0x704   : > { %6747 = vmatpush2.bf16.msra.mxu1 %v9436_v22 }
 0x705   : > { %6748 = vmatprep.subr.bf16.mxu1 %v9441_v23 }
 0x708   : > { %6749 = vmatpush2.bf16.msra.mxu1 %v9439_v24 }
 0x709   : > { %6750 = vmatprep.subr.bf16.mxu1 %v9444_v25 }
 0x70c   : > { %6751 = vmatpush2.bf16.msra.mxu1 %v9442_v27 }
 0x70d   : > { %6752 = vmatprep.subr.bf16.mxu1 %v9447_v29 }
 0x710   : > { %6753 = vmatpush2.bf16.msra.mxu1 %v9445_v30 }
 0x711   : > { %6754 = vmatprep.subr.bf16.mxu1 %v9450_v26 }
 0x714   : > { %6755 = vmatpush2.bf16.msra.mxu1 %v9448_v33 }
 0x717   : > { %v6147_v28 = vpop.f32.mrf.mxu0 }
 0x718   : > { %v6148_v40 = vadd.f32 %v6147_v28, %v5456_v37 }
 0x719   : > { %v6149_v31 = vpop.f32.mrf.mxu0 }
 0x71a   : > { %v6150_v44 = vadd.f32 %v6149_v31, %v5460_v39 }
 0x71b   : > { %v6151_v32 = vpop.f32.mrf.mxu0 }
 0x71d   : > { %v6152_v34 = vpop.f32.mrf.mxu0 }
 0x757   : > { %v6188_v38 = vpop.f32.mrf.mxu1  ;;  %v6229_v41 = vpop.f32.mrf.mxu0 }
 0x758   : > { %v6189_v45 = vadd.f32 %v6188_v38, %v6148_v40  ;;  %v6230_v58 = vadd.f32 %v6229_v41, %v5464_v43 }
 0x759   : > { %v6190_v46 = vpop.f32.mrf.mxu1  ;;  %v6231_v47 = vpop.f32.mrf.mxu0 }
 0x75a   : > { %v6191_v48 = vadd.f32 %v6190_v46, %v6150_v44  ;;  %v6277_v49 = vmax.f32 %v6189_v45, 0.0  ;;  %v6232_v60 = vadd.f32 %v6231_v47, %v5468_v56 }
 0x75b   : > { %v6192_v42 = vpop.f32.mrf.mxu1  ;;  %v6233_v51 = vpop.f32.mrf.mxu0 }
 0x75c   : > { %v6278_v52 = vmax.f32 %v6191_v48, 0.0  ;;  %v6281_v50 = vpack.c.bf16 %v6277_v49, %v6277_v49 }
 0x75d   : > { %v6193_v53 = vpop.f32.mrf.mxu1  ;;  %v6234_v54 = vpop.f32.mrf.mxu0 }
 0x75e   : > { %v6282_v55 = vpack.c.bf16 %v6278_v52, %v6278_v52 }
 0x760   : > { %6715 = vmatprep.mubr.bf16.mxu0 %v6282_v55 }
 0x761   : > { %6716 = vmatmul.mubr.bf16.vlgmr.msra.gmra.mxu0 %v6281_v50 }
 0x797   : > { %v6270_v59 = vpop.f32.mrf.mxu1 }
 0x798   : > { %v6271_v61 = vadd.f32 %v6270_v59, %v6230_v58 }
 0x799   : > { %v6272_v62 = vpop.f32.mrf.mxu1 }
 0x79a   : > { %v6273_v63 = vadd.f32 %v6272_v62, %v6232_v60  ;;  %v6279_v57 = vmax.f32 %v6271_v61, 0.0 }
 0x79b   : > { %v6274_v0 = vpop.f32.mrf.mxu1 }
 0x79c   : > { %v6280_v1 = vmax.f32 %v6273_v63, 0.0  ;;  %v6283_v4 = vpack.c.bf16 %v6279_v57, %v6279_v57 }
 0x79d   : > { %v6275_v36 = vpop.f32.mrf.mxu1 }
 0x79e   : > { %v6284_v2 = vpack.c.bf16 %v6280_v1, %v6280_v1 }
 0x7a0   : > { %6756 = vmatprep.mubr.bf16.mxu1 %v6284_v2 }
 0x7a1   : > { %6757 = vmatmul.mubr.bf16.vlgmr.msra.gmra.mxu1 %v6283_v4 }
 0x821   : > { %v6717_v13 = vpop.f32.mrf.mxu0 }
 0x822   : > { %v6718_v10 = vadd.f32 %v6717_v13, %v6356_v8 }
 0x823   : > { %v6719_v3 = vpop.f32.mrf.mxu0 }
 0x824   : > { %v6720_v16 = vadd.f32 %v6719_v3, %v6360_v9 }
 0x825   : > { %v6721_v15 = vpop.f32.mrf.mxu0 }
 0x827   : > { %v6722_v5 = vpop.f32.mrf.mxu0 }
 0x861   : > { %v6758_v11 = vpop.f32.mrf.mxu1 }
 0x862   : > { %v6759_v17 = vadd.f32 %v6758_v11, %v6718_v10 }
 0x863   : > { %v6760_v7 = vpop.f32.mrf.mxu1 }
 0x864   : > { %6765 = vst [vmem:[%s360_s10] sm:$0xff] %v6759_v17  ;;  %v6761_v18 = vadd.f32 %v6760_v7, %v6720_v16 }
 0x865   : > { %v6762_v12 = vpop.f32.mrf.mxu1 }
 0x866   : > { %6766 = vst [vmem:[%s360_s10 + $0x8] sm:$0xff] %v6761_v18 }
 0x867   : > { %v6763_v14 = vpop.f32.mrf.mxu1 }
 0x868   : > { %9624 = shalt.err (!%p9621_p11)
}
 0x869   : > { %s9625_s17 = scalar_lea.hbm %s10558_s12, 256  ;;  %s9629_s15 = scalar_lea.hbm %s10607_s6, 512 }
 0x86a   : > { %p9626_p3 = scmp.ne.s32.totalorder %s10558_s12, %s9625_s17  ;;  %p9630_p1 = scmp.lt.s32.totalorder %s10558_s12, %s10607_s6 }
 0x86b   : > { %p9631_p5 = scmp.lt.s32.totalorder %s9629_s15, %s9625_s17 }
 0x86c   : > { %p9627_p7 = pnand %p9626_p3, %p10644_p4 }
 0x86d   : > { %p9632_p0 = por %p9631_p5, %p9630_p1 }
 0x86e   : > { %p9628_p13 = pneg %p9627_p7 }
 0x870   : > { %p9633_p2 = pnand %p9632_p0, %p9628_p13 }
 0x872   : > { %9636 = shalt.err (!%p9633_p2)
}
 0x873   : > { %8120 = dma.vmem_to_hbm [thread:$0]  (%p10644_p4), %s10560_s26, 256, %s10558_s12, %s6768_s25  }
 0x874 PF: > { %s6794_s27 = sand.u32 1, %s9675_s21   ;;  %p10645_p12 = scmp.ne.s32.totalorder %s10622_s28, 0 }
 0x875   : > { %p10646_p8 = scmp.ge.s32.totalorder %s9687_s24, 2  ;;  %s6795_s11 = scalar_lea.sflag [#allocation4], %s6794_s27 }
 0x877   : > { %p8143_p6 = pnand %p10646_p8, %p10645_p12 }
 0x879   : > { %p8144_p9 = pneg %p8143_p6 }
 0x87b   : > { %9670 = dma.done.wait (%p8144_p9), %s6795_s11, 256  }
 0x87c   : > { %9672 = vsyncadd (%p8144_p9), %s6795_s11, 4294967040  ;;  %p19_p10 = scmp.ge.s32.totalorder %s9811_s19, 4   ;;  %s10647_s21 = smov %s9679_s22 }
 0x87d   : > { %s10648_s22 = smov %s9683_s23  ;;  %s10649_s23 = smov %s9827_s7 }
 0x87e   : > { %s10650_s24 = smov %s9811_s19  ;;  %21 = sbr.rel (!%p19_p10) target bundleno = 10 (0xa), region = 126 }
 0x883   :  { %6800 = vsyncpa [#allocation3], 1 }
 0x884   :  { %6802 = vsyncpa [#allocation3 + $0x1], 1 }
 0x885   :  { %6803 = vsyncpa [#allocation6], 1 }
 0x886   :  { %6804 = vsyncpa [#allocation9], 1 }
 0x887   :  { %6805 = vsyncpa [#allocation4], 1 }
 0x888   :  { %6807 = vsyncpa [#allocation4 + $0x1], 1 }

</bundles_post_ra>
